<compile_context>
chip_gen: v7x
topology: tpu7x:2x2x1
jax: 0.10.0
libtpu: 0.0.40
codegen_flags: <defaults>
</compile_context>

<pallas_src>
import jax
import jax.numpy as jnp
from jax.experimental import pallas as pl
from jax.experimental.pallas import tpu as pltpu


# ----------------------------------------------------------------------------
# Pallas kernels
# ----------------------------------------------------------------------------
def _gemm_bn_kernel(p_ref, w_ref, y_ref, s_ref, ss_ref):
    # One parity / one N-tile per grid step; full K -> single MXU pass, no k loop.
    y = jnp.dot(p_ref[0], w_ref[0], preferred_element_type=jnp.float32)
    y_ref[0] = y
    # BatchNorm partial statistics fused into the epilogue (padded rows are zero
    # and contribute nothing; padded channels are sliced away in the wrapper).
    s_ref[0] = jnp.sum(y, axis=0, keepdims=True)
    ss_ref[0] = jnp.sum(y * y, axis=0, keepdims=True)


def _gemm_tanh_kernel(p_ref, w_ref, y_ref):
    y = jnp.dot(p_ref[0], w_ref[0], preferred_element_type=jnp.float32)
    y_ref[0] = jnp.tanh(y)           # fused final-layer activation (EUP)


def _affine_relu_kernel(y_ref, sc_ref, sh_ref, o_ref):
    o_ref[...] = jnp.maximum(y_ref[...] * sc_ref[...] + sh_ref[...], 0.0)


# ----------------------------------------------------------------------------
# Pallas wrappers
# ----------------------------------------------------------------------------
_VMEM_LIMIT = 32 * 1024 * 1024   # comfortable headroom on v5e/v6e/v7x for these tiles


def _round_up(x, m):
    return (x + m - 1) // m * m


def pallas_subpixel_gemm(P, Wm, *, bn_stats):
    """Parity-batched GEMM.

    P:  (4, Mp, Kp) f32   (per-parity im2col, pre-padded)
    Wm: (4, Kp, Np) f32   (per-parity weight matrix, pre-padded)
    Returns y (4, Mp, Np) and, if bn_stats, per-(parity, N-tile) partial sums and
    sums-of-squares of shape (4, 1, Np).
    """
    _, Mp, Kp = P.shape
    _, _, Np = Wm.shape
    tn = 256 if Np % 256 == 0 else 128        # 256-wide N tiles feed the v6e/v7x MXU
    grid = (4, Np // tn)                      # parity axis + N axis, both parallel

    p_spec = pl.BlockSpec((1, Mp, Kp), lambda p, j: (p, 0, 0))
    w_spec = pl.BlockSpec((1, Kp, tn), lambda p, j: (p, 0, j))
    y_spec = pl.BlockSpec((1, Mp, tn), lambda p, j: (p, 0, j))
    y_shape = jax.ShapeDtypeStruct((4, Mp, Np), jnp.float32)
    cparams = pltpu.CompilerParams(
        dimension_semantics=("parallel", "parallel"),
        vmem_limit_bytes=_VMEM_LIMIT)

    if bn_stats:
        s_spec = pl.BlockSpec((1, 1, tn), lambda p, j: (p, 0, j))
        s_shape = jax.ShapeDtypeStruct((4, 1, Np), jnp.float32)
        return pl.pallas_call(
            _gemm_bn_kernel,
            out_shape=(y_shape, s_shape, s_shape),
            grid_spec=pltpu.PrefetchScalarGridSpec(
                num_scalar_prefetch=0, grid=grid,
                in_specs=[p_spec, w_spec],
                out_specs=(y_spec, s_spec, s_spec)),
            compiler_params=cparams,
        )(P, Wm)

    return pl.pallas_call(
        _gemm_tanh_kernel,
        out_shape=y_shape,
        grid_spec=pltpu.PrefetchScalarGridSpec(
            num_scalar_prefetch=0, grid=grid,
            in_specs=[p_spec, w_spec],
            out_specs=y_spec),
        compiler_params=cparams,
    )(P, Wm)


def pallas_affine_relu(y2d, scale_row, shift_row):
    """out = relu(y * scale + shift); whole slab in one grid step (slabs are tiny)."""
    M, Np = y2d.shape
    return pl.pallas_call(
        _affine_relu_kernel,
        out_shape=jax.ShapeDtypeStruct((M, Np), jnp.float32),
        grid_spec=pltpu.PrefetchScalarGridSpec(
            num_scalar_prefetch=0, grid=(1,),
            in_specs=[pl.BlockSpec((M, Np), lambda i: (0, 0)),
                      pl.BlockSpec((1, Np), lambda i: (0, 0)),
                      pl.BlockSpec((1, Np), lambda i: (0, 0))],
            out_specs=pl.BlockSpec((M, Np), lambda i: (0, 0))),
        compiler_params=pltpu.CompilerParams(
            dimension_semantics=("arbitrary",),
            vmem_limit_bytes=_VMEM_LIMIT),
    )(y2d, scale_row, shift_row)


# ----------------------------------------------------------------------------
# ConvTranspose2d(k=4, s=2, p=1) as a 4-parity sub-pixel GEMM (NHWC, no dilation)
# ----------------------------------------------------------------------------
def _build_subpixel_operands(x_nhwc, w):
    """x_nhwc: (N,H,W,Cin); w: (Cin,Cout,4,4) PyTorch ConvTranspose2d layout.

    out[n, 2r+po, 2c+pw, co] = sum_{dh,dw,ci} xpad[n, r+po+dh, c+pw+dw, ci]
                                              * w[ci, co, 3-(2dh+po), 3-(2dw+pw)]
    -> one (N*H*W, 4*Cin) @ (4*Cin, Cout) GEMM per parity (po, pw).
    """
    N, H, W_, Cin = x_nhwc.shape
    Cout = w.shape[1]
    K = 4 * Cin
    M = N * H * W_
    Mp = _round_up(M, 8)
    Kp = _round_up(K, 128)
    Np = _round_up(Cout, 128)

    # flipped forward-conv kernel, layout (kh, kw, ci, co): wf[kh,kw] = w[...,3-kh,3-kw]
    wf = jnp.flip(w, axis=(2, 3)).transpose(2, 3, 0, 1)
    xp = jnp.pad(x_nhwc, ((0, 0), (1, 1), (1, 1), (0, 0)))

    P_par, W_par = [], []
    for po in range(2):
        for pq in range(2):
            taps = [xp[:, po + dh:po + dh + H, pq + dw:pq + dw + W_, :]
                    for dh in range(2) for dw in range(2)]
            Pp = jnp.stack(taps, axis=3).reshape(M, K)     # column = tap*Cin + ci
            Wp = wf[po::2, pq::2].reshape(K, Cout)         # same (dh,dw,ci) ordering
            P_par.append(Pp)
            W_par.append(Wp)

    P = jnp.pad(jnp.stack(P_par, axis=0), ((0, 0), (0, Mp - M), (0, Kp - K)))
    Wm = jnp.pad(jnp.stack(W_par, axis=0), ((0, 0), (0, Kp - K), (0, Np - Cout)))
    return P, Wm, (N, H, W_, Cout, M, Mp, Np)


def _pixel_shuffle(y, N, H, W_, Cout):
    """(4, M, Cout) parity-major rows -> NHWC (N, 2H, 2W, Cout)."""
    y = y.reshape(2, 2, N, H, W_, Cout)                  # (po, pw, n, r, c, co)
    return y.transpose(2, 3, 0, 4, 1, 5).reshape(N, 2 * H, 2 * W_, Cout)


# ----------------------------------------------------------------------------
# Generator
# ----------------------------------------------------------------------------
GEN_CHANNELS = [512, 256, 128, 64, 3]
BN_EPS = 1e-5


def init_generator_params(latent_vector, key):
    chans = [latent_vector] + GEN_CHANNELS
    weights, gammas, betas = [], [], []
    for i in range(5):
        key, sub = jax.random.split(key)
        w = jax.random.normal(sub, (chans[i], chans[i + 1], 4, 4),
                              jnp.float32) * 0.05
        weights.append(w)
        if i < 4:
            gammas.append(jnp.ones((chans[i + 1],), jnp.float32))
            betas.append(jnp.zeros((chans[i + 1],), jnp.float32))
    return {"weights": weights, "gammas": gammas, "betas": betas}


def generator_forward(params, z, label):
    # `label` is accepted but unused, matching the PyTorch forward.
    del label
    # NCHW -> NHWC once; activations stay channels-last between layers.
    x = z.astype(jnp.float32).transpose(0, 2, 3, 1)
    for i, w in enumerate(params["weights"]):
        P, Wm, (N, H, W_, Cout, M, Mp, Np) = _build_subpixel_operands(x, w)
        if i < 4:
            y, s, ss = pallas_subpixel_gemm(P, Wm, bn_stats=True)
            # Finish BatchNorm2d (training-mode batch stats) from the fused partials.
            count = 4.0 * M                                  # real rows: N*Ho*Wo
            s_tot = jnp.sum(s, axis=(0, 1))[:Cout]
            ss_tot = jnp.sum(ss, axis=(0, 1))[:Cout]
            mean = s_tot / count
            var = jnp.maximum(ss_tot / count - mean * mean, 0.0)
            gamma, beta = params["gammas"][i], params["betas"][i]
            scale = gamma * jax.lax.rsqrt(var + BN_EPS)
            shift = beta - mean * scale
            scale_p = jnp.pad(scale, (0, Np - Cout)).reshape(1, Np)
            shift_p = jnp.pad(shift, (0, Np - Cout)).reshape(1, Np)
            y = pallas_affine_relu(y.reshape(4 * Mp, Np), scale_p, shift_p)
            y = y.reshape(4, Mp, Np)
        else:
            y = pallas_subpixel_gemm(P, Wm, bn_stats=False)   # tanh fused in kernel
        x = _pixel_shuffle(y[:, :M, :Cout], N, H, W_, Cout)
    return x.transpose(0, 3, 1, 2)        # NHWC -> NCHW once at the end


# Pure-JAX reference (same math) for a silent correctness check.
def reference_forward(params, z):
    x = z.astype(jnp.float32)
    for i, w in enumerate(params["weights"]):
        wc = jnp.flip(w, axis=(2, 3)).transpose(1, 0, 2, 3)
        y = jax.lax.conv_general_dilated(
            x, wc, window_strides=(1, 1), padding=[(2, 2), (2, 2)],
            lhs_dilation=(2, 2),
            dimension_numbers=("NCHW", "OIHW", "NCHW"))
        if i < 4:
            mean = jnp.mean(y, axis=(0, 2, 3), keepdims=True)
            var = jnp.mean((y - mean) ** 2, axis=(0, 2, 3), keepdims=True)
            y = (y - mean) / jnp.sqrt(var + BN_EPS)
            y = jnp.maximum(y, 0.0)
        else:
            y = jnp.tanh(y)
        x = y
    return x


if __name__ == "__main__":
    latent_vector = 8
    batch = 2
    key = jax.random.PRNGKey(0)
    kp, kz, kl = jax.random.split(key, 3)

    params = init_generator_params(latent_vector, kp)
    z = jax.random.normal(kz, (batch, latent_vector, 1, 1), jnp.float32)
    label = jax.random.randint(kl, (batch,), 0, 10)          # unused by forward

    fwd = jax.jit(generator_forward)
    out = jax.block_until_ready(fwd(params, z, label))

    assert out.shape == (batch, 3, 32, 32), out.shape

    ref = jax.block_until_ready(reference_forward(params, z))
    max_err = float(jnp.max(jnp.abs(out - ref)))
    assert max_err < 5e-3, f"max abs error {max_err}"

    print("KERNEL_OK")
</pallas_src>

<mosaic_0001>
module attributes {stable_mosaic.version = 11 : i64} {
  func.func @_affine_relu_kernel(%arg0: i32, %arg1: memref<32x512xf32, #tpu.memory_space<vmem>>, %arg2: memref<1x512xf32, #tpu.memory_space<vmem>>, %arg3: memref<1x512xf32, #tpu.memory_space<vmem>>, %arg4: memref<32x512xf32, #tpu.memory_space<vmem>>) attributes {dimension_semantics = [#tpu.dimension_semantics<arbitrary>], iteration_bounds = array<i64: 1>, scalar_prefetch = 0 : i64, scratch_operands = 0 : i64, tpu.core_type = #tpu.core_type<tc>, window_params = [{pipeline_mode = #tpu.pipeline_mode<synchronous>, transform_indices = @transform_0, window_bounds = array<i64: 32, 512>}, {pipeline_mode = #tpu.pipeline_mode<synchronous>, transform_indices = @transform_1, window_bounds = array<i64: 1, 512>}, {pipeline_mode = #tpu.pipeline_mode<synchronous>, transform_indices = @transform_2, window_bounds = array<i64: 1, 512>}, {pipeline_mode = #tpu.pipeline_mode<synchronous>, transform_indices = @transform_3, window_bounds = array<i64: 32, 512>}]} {
    %c0 = arith.constant 0 : index
    %c0_0 = arith.constant 0 : index
    %0 = vector.load %arg1[%c0, %c0_0] : memref<32x512xf32, #tpu.memory_space<vmem>>, vector<32x512xf32>
    %c0_1 = arith.constant 0 : index
    %c0_2 = arith.constant 0 : index
    %1 = vector.load %arg2[%c0_1, %c0_2] : memref<1x512xf32, #tpu.memory_space<vmem>>, vector<1x512xf32>
    %2 = vector.broadcast %1 : vector<1x512xf32> to vector<32x512xf32>
    %3 = arith.mulf %0, %2 : vector<32x512xf32>
    %c0_3 = arith.constant 0 : index
    %c0_4 = arith.constant 0 : index
    %4 = vector.load %arg3[%c0_3, %c0_4] : memref<1x512xf32, #tpu.memory_space<vmem>>, vector<1x512xf32>
    %5 = vector.broadcast %4 : vector<1x512xf32> to vector<32x512xf32>
    %6 = arith.addf %3, %5 : vector<32x512xf32>
    %cst = arith.constant 0.000000e+00 : f32
    %7 = vector.broadcast %cst : f32 to vector<32x512xf32>
    %8 = arith.maximumf %6, %7 : vector<32x512xf32>
    %c0_5 = arith.constant 0 : index
    %c0_6 = arith.constant 0 : index
    %9 = vector.load %arg4[%c0_5, %c0_6] : memref<32x512xf32, #tpu.memory_space<vmem>>, vector<32x512xf32>
    tpu.vector_store %arg4[%c0_5, %c0_6], %8 {strides = array<i32>} : memref<32x512xf32, #tpu.memory_space<vmem>>, vector<32x512xf32>,
    return
  }
  func.func @transform_0(%arg0: i32) -> (i32, i32) {
    %c0_i32 = arith.constant 0 : i32
    %c0_i32_0 = arith.constant 0 : i32
    %c0_i32_1 = arith.constant 0 : i32
    return %c0_i32, %c0_i32_0 : i32, i32
  }
  func.func @transform_1(%arg0: i32) -> (i32, i32) {
    %c0_i32 = arith.constant 0 : i32
    %c0_i32_0 = arith.constant 0 : i32
    %c0_i32_1 = arith.constant 0 : i32
    return %c0_i32, %c0_i32_0 : i32, i32
  }
  func.func @transform_2(%arg0: i32) -> (i32, i32) {
    %c0_i32 = arith.constant 0 : i32
    %c0_i32_0 = arith.constant 0 : i32
    %c0_i32_1 = arith.constant 0 : i32
    return %c0_i32, %c0_i32_0 : i32, i32
  }
  func.func @transform_3(%arg0: i32) -> (i32, i32) {
    %c0_i32 = arith.constant 0 : i32
    %c0_i32_0 = arith.constant 0 : i32
    %c0_i32_1 = arith.constant 0 : i32
    return %c0_i32, %c0_i32_0 : i32, i32
  }
}

module attributes {stable_mosaic.version = 11 : i64} {
  func.func @_gemm_bn_kernel(%arg0: i32, %arg1: i32, %arg2: memref<1x8x128xf32, #tpu.memory_space<vmem>>, %arg3: memref<1x128x256xf32, #tpu.memory_space<vmem>>, %arg4: memref<1x8x256xf32, #tpu.memory_space<vmem>>, %arg5: memref<1x1x256xf32, #tpu.memory_space<vmem>>, %arg6: memref<1x1x256xf32, #tpu.memory_space<vmem>>) attributes {dimension_semantics = [#tpu.dimension_semantics<parallel>, #tpu.dimension_semantics<parallel>], iteration_bounds = array<i64: 4, 2>, scalar_prefetch = 0 : i64, scratch_operands = 0 : i64, tpu.core_type = #tpu.core_type<tc>, window_params = [{transform_indices = @transform_0, window_bounds = array<i64: 1, 8, 128>}, {transform_indices = @transform_1, window_bounds = array<i64: 1, 128, 256>}, {transform_indices = @transform_2, window_bounds = array<i64: 1, 8, 256>}, {transform_indices = @transform_3, window_bounds = array<i64: 1, 1, 256>}, {transform_indices = @transform_4, window_bounds = array<i64: 1, 1, 256>}]} {
    %c0 = arith.constant 0 : index
    %c0_0 = arith.constant 0 : index
    %c0_1 = arith.constant 0 : index
    %0 = vector.load %arg2[%c0, %c0_0, %c0_1] : memref<1x8x128xf32, #tpu.memory_space<vmem>>, vector<1x8x128xf32>
    %1 = vector.shape_cast %0 : vector<1x8x128xf32> to vector<8x128xf32>
    %c0_2 = arith.constant 0 : index
    %c0_3 = arith.constant 0 : index
    %c0_4 = arith.constant 0 : index
    %2 = vector.load %arg3[%c0_2, %c0_3, %c0_4] : memref<1x128x256xf32, #tpu.memory_space<vmem>>, vector<1x128x256xf32>
    %3 = vector.shape_cast %2 : vector<1x128x256xf32> to vector<128x256xf32>
    %cst = arith.constant dense<0.000000e+00> : vector<8x256xf32>
    %4 = tpu.matmul %1, %3, %cst {dimension_numbers = #tpu.dot_dimension_numbers<[1], [0], [0], [1], [0, 0, 1, 1], [], []>} : vector<8x128xf32>, vector<128x256xf32>, vector<8x256xf32> -> vector<8x256xf32>
    %c0_5 = arith.constant 0 : index
    %c0_6 = arith.constant 0 : index
    %c0_7 = arith.constant 0 : index
    %5 = vector.load %arg4[%c0_5, %c0_6, %c0_7] : memref<1x8x256xf32, #tpu.memory_space<vmem>>, vector<1x8x256xf32>
    %6 = vector.shape_cast %5 : vector<1x8x256xf32> to vector<8x256xf32>
    %7 = vector.shape_cast %4 : vector<8x256xf32> to vector<1x8x256xf32>
    tpu.vector_store %arg4[%c0_5, %c0_6, %c0_7], %7 {strides = array<i32>} : memref<1x8x256xf32, #tpu.memory_space<vmem>>, vector<1x8x256xf32>,
    %cst_8 = arith.constant dense<0.000000e+00> : vector<256xf32>
    %8 = vector.multi_reduction <add>, %4, %cst_8 [0] : vector<8x256xf32> to vector<256xf32>
    %9 = vector.shape_cast %8 : vector<256xf32> to vector<1x256xf32>
    %c0_9 = arith.constant 0 : index
    %c0_10 = arith.constant 0 : index
    %c0_11 = arith.constant 0 : index
    %10 = vector.load %arg5[%c0_9, %c0_10, %c0_11] : memref<1x1x256xf32, #tpu.memory_space<vmem>>, vector<1x1x256xf32>
    %11 = vector.shape_cast %10 : vector<1x1x256xf32> to vector<1x256xf32>
    %12 = vector.shape_cast %9 : vector<1x256xf32> to vector<1x1x256xf32>
    tpu.vector_store %arg5[%c0_9, %c0_10, %c0_11], %12 {strides = array<i32>} : memref<1x1x256xf32, #tpu.memory_space<vmem>>, vector<1x1x256xf32>,
    %13 = arith.mulf %4, %4 : vector<8x256xf32>
    %cst_12 = arith.constant dense<0.000000e+00> : vector<256xf32>
    %14 = vector.multi_reduction <add>, %13, %cst_12 [0] : vector<8x256xf32> to vector<256xf32>
    %15 = vector.shape_cast %14 : vector<256xf32> to vector<1x256xf32>
    %c0_13 = arith.constant 0 : index
    %c0_14 = arith.constant 0 : index
    %c0_15 = arith.constant 0 : index
    %16 = vector.load %arg6[%c0_13, %c0_14, %c0_15] : memref<1x1x256xf32, #tpu.memory_space<vmem>>, vector<1x1x256xf32>
    %17 = vector.shape_cast %16 : vector<1x1x256xf32> to vector<1x256xf32>
    %18 = vector.shape_cast %15 : vector<1x256xf32> to vector<1x1x256xf32>
    tpu.vector_store %arg6[%c0_13, %c0_14, %c0_15], %18 {strides = array<i32>} : memref<1x1x256xf32, #tpu.memory_space<vmem>>, vector<1x1x256xf32>,
    return
  }
  func.func @transform_0(%arg0: i32, %arg1: i32) -> (i32, i32, i32) {
    %c0_i32 = arith.constant 0 : i32
    %c0_i32_0 = arith.constant 0 : i32
    %c0_i32_1 = arith.constant 0 : i32
    return %arg0, %c0_i32, %c0_i32_0 : i32, i32, i32
  }
  func.func @transform_1(%arg0: i32, %arg1: i32) -> (i32, i32, i32) {
    %c0_i32 = arith.constant 0 : i32
    %c0_i32_0 = arith.constant 0 : i32
    return %arg0, %c0_i32, %arg1 : i32, i32, i32
  }
  func.func @transform_2(%arg0: i32, %arg1: i32) -> (i32, i32, i32) {
    %c0_i32 = arith.constant 0 : i32
    %c0_i32_0 = arith.constant 0 : i32
    return %arg0, %c0_i32, %arg1 : i32, i32, i32
  }
  func.func @transform_3(%arg0: i32, %arg1: i32) -> (i32, i32, i32) {
    %c0_i32 = arith.constant 0 : i32
    %c0_i32_0 = arith.constant 0 : i32
    return %arg0, %c0_i32, %arg1 : i32, i32, i32
  }
  func.func @transform_4(%arg0: i32, %arg1: i32) -> (i32, i32, i32) {
    %c0_i32 = arith.constant 0 : i32
    %c0_i32_0 = arith.constant 0 : i32
    return %arg0, %c0_i32, %arg1 : i32, i32, i32
  }
}

module attributes {stable_mosaic.version = 11 : i64} {
  func.func @_gemm_bn_kernel(%arg0: i32, %arg1: i32, %arg2: memref<1x8x2048xf32, #tpu.memory_space<vmem>>, %arg3: memref<1x2048x256xf32, #tpu.memory_space<vmem>>, %arg4: memref<1x8x256xf32, #tpu.memory_space<vmem>>, %arg5: memref<1x1x256xf32, #tpu.memory_space<vmem>>, %arg6: memref<1x1x256xf32, #tpu.memory_space<vmem>>) attributes {dimension_semantics = [#tpu.dimension_semantics<parallel>, #tpu.dimension_semantics<parallel>], iteration_bounds = array<i64: 4, 1>, scalar_prefetch = 0 : i64, scratch_operands = 0 : i64, tpu.core_type = #tpu.core_type<tc>, window_params = [{transform_indices = @transform_0, window_bounds = array<i64: 1, 8, 2048>}, {transform_indices = @transform_1, window_bounds = array<i64: 1, 2048, 256>}, {transform_indices = @transform_2, window_bounds = array<i64: 1, 8, 256>}, {transform_indices = @transform_3, window_bounds = array<i64: 1, 1, 256>}, {transform_indices = @transform_4, window_bounds = array<i64: 1, 1, 256>}]} {
    %c0 = arith.constant 0 : index
    %c0_0 = arith.constant 0 : index
    %c0_1 = arith.constant 0 : index
    %0 = vector.load %arg2[%c0, %c0_0, %c0_1] : memref<1x8x2048xf32, #tpu.memory_space<vmem>>, vector<1x8x2048xf32>
    %1 = vector.shape_cast %0 : vector<1x8x2048xf32> to vector<8x2048xf32>
    %c0_2 = arith.constant 0 : index
    %c0_3 = arith.constant 0 : index
    %c0_4 = arith.constant 0 : index
    %2 = vector.load %arg3[%c0_2, %c0_3, %c0_4] : memref<1x2048x256xf32, #tpu.memory_space<vmem>>, vector<1x2048x256xf32>
    %3 = vector.shape_cast %2 : vector<1x2048x256xf32> to vector<2048x256xf32>
    %cst = arith.constant dense<0.000000e+00> : vector<8x256xf32>
    %4 = tpu.matmul %1, %3, %cst {dimension_numbers = #tpu.dot_dimension_numbers<[1], [0], [0], [1], [0, 0, 1, 1], [], []>} : vector<8x2048xf32>, vector<2048x256xf32>, vector<8x256xf32> -> vector<8x256xf32>
    %c0_5 = arith.constant 0 : index
    %c0_6 = arith.constant 0 : index
    %c0_7 = arith.constant 0 : index
    %5 = vector.load %arg4[%c0_5, %c0_6, %c0_7] : memref<1x8x256xf32, #tpu.memory_space<vmem>>, vector<1x8x256xf32>
    %6 = vector.shape_cast %5 : vector<1x8x256xf32> to vector<8x256xf32>
    %7 = vector.shape_cast %4 : vector<8x256xf32> to vector<1x8x256xf32>
    tpu.vector_store %arg4[%c0_5, %c0_6, %c0_7], %7 {strides = array<i32>} : memref<1x8x256xf32, #tpu.memory_space<vmem>>, vector<1x8x256xf32>,
    %cst_8 = arith.constant dense<0.000000e+00> : vector<256xf32>
    %8 = vector.multi_reduction <add>, %4, %cst_8 [0] : vector<8x256xf32> to vector<256xf32>
    %9 = vector.shape_cast %8 : vector<256xf32> to vector<1x256xf32>
    %c0_9 = arith.constant 0 : index
    %c0_10 = arith.constant 0 : index
    %c0_11 = arith.constant 0 : index
    %10 = vector.load %arg5[%c0_9, %c0_10, %c0_11] : memref<1x1x256xf32, #tpu.memory_space<vmem>>, vector<1x1x256xf32>
    %11 = vector.shape_cast %10 : vector<1x1x256xf32> to vector<1x256xf32>
    %12 = vector.shape_cast %9 : vector<1x256xf32> to vector<1x1x256xf32>
    tpu.vector_store %arg5[%c0_9, %c0_10, %c0_11], %12 {strides = array<i32>} : memref<1x1x256xf32, #tpu.memory_space<vmem>>, vector<1x1x256xf32>,
    %13 = arith.mulf %4, %4 : vector<8x256xf32>
    %cst_12 = arith.constant dense<0.000000e+00> : vector<256xf32>
    %14 = vector.multi_reduction <add>, %13, %cst_12 [0] : vector<8x256xf32> to vector<256xf32>
    %15 = vector.shape_cast %14 : vector<256xf32> to vector<1x256xf32>
    %c0_13 = arith.constant 0 : index
    %c0_14 = arith.constant 0 : index
    %c0_15 = arith.constant 0 : index
    %16 = vector.load %arg6[%c0_13, %c0_14, %c0_15] : memref<1x1x256xf32, #tpu.memory_space<vmem>>, vector<1x1x256xf32>
    %17 = vector.shape_cast %16 : vector<1x1x256xf32> to vector<1x256xf32>
    %18 = vector.shape_cast %15 : vector<1x256xf32> to vector<1x1x256xf32>
    tpu.vector_store %arg6[%c0_13, %c0_14, %c0_15], %18 {strides = array<i32>} : memref<1x1x256xf32, #tpu.memory_space<vmem>>, vector<1x1x256xf32>,
    return
  }
  func.func @transform_0(%arg0: i32, %arg1: i32) -> (i32, i32, i32) {
    %c0_i32 = arith.constant 0 : i32
    %c0_i32_0 = arith.constant 0 : i32
    %c0_i32_1 = arith.constant 0 : i32
    return %arg0, %c0_i32, %c0_i32_0 : i32, i32, i32
  }
  func.func @transform_1(%arg0: i32, %arg1: i32) -> (i32, i32, i32) {
    %c0_i32 = arith.constant 0 : i32
    %c0_i32_0 = arith.constant 0 : i32
    return %arg0, %c0_i32, %arg1 : i32, i32, i32
  }
  func.func @transform_2(%arg0: i32, %arg1: i32) -> (i32, i32, i32) {
    %c0_i32 = arith.constant 0 : i32
    %c0_i32_0 = arith.constant 0 : i32
    return %arg0, %c0_i32, %arg1 : i32, i32, i32
  }
  func.func @transform_3(%arg0: i32, %arg1: i32) -> (i32, i32, i32) {
    %c0_i32 = arith.constant 0 : i32
    %c0_i32_0 = arith.constant 0 : i32
    return %arg0, %c0_i32, %arg1 : i32, i32, i32
  }
  func.func @transform_4(%arg0: i32, %arg1: i32) -> (i32, i32, i32) {
    %c0_i32 = arith.constant 0 : i32
    %c0_i32_0 = arith.constant 0 : i32
    return %arg0, %c0_i32, %arg1 : i32, i32, i32
  }
}

module attributes {stable_mosaic.version = 11 : i64} {
  func.func @_affine_relu_kernel(%arg0: i32, %arg1: memref<32x256xf32, #tpu.memory_space<vmem>>, %arg2: memref<1x256xf32, #tpu.memory_space<vmem>>, %arg3: memref<1x256xf32, #tpu.memory_space<vmem>>, %arg4: memref<32x256xf32, #tpu.memory_space<vmem>>) attributes {dimension_semantics = [#tpu.dimension_semantics<arbitrary>], iteration_bounds = array<i64: 1>, scalar_prefetch = 0 : i64, scratch_operands = 0 : i64, tpu.core_type = #tpu.core_type<tc>, window_params = [{pipeline_mode = #tpu.pipeline_mode<synchronous>, transform_indices = @transform_0, window_bounds = array<i64: 32, 256>}, {pipeline_mode = #tpu.pipeline_mode<synchronous>, transform_indices = @transform_1, window_bounds = array<i64: 1, 256>}, {pipeline_mode = #tpu.pipeline_mode<synchronous>, transform_indices = @transform_2, window_bounds = array<i64: 1, 256>}, {pipeline_mode = #tpu.pipeline_mode<synchronous>, transform_indices = @transform_3, window_bounds = array<i64: 32, 256>}]} {
    %c0 = arith.constant 0 : index
    %c0_0 = arith.constant 0 : index
    %0 = vector.load %arg1[%c0, %c0_0] : memref<32x256xf32, #tpu.memory_space<vmem>>, vector<32x256xf32>
    %c0_1 = arith.constant 0 : index
    %c0_2 = arith.constant 0 : index
    %1 = vector.load %arg2[%c0_1, %c0_2] : memref<1x256xf32, #tpu.memory_space<vmem>>, vector<1x256xf32>
    %2 = vector.broadcast %1 : vector<1x256xf32> to vector<32x256xf32>
    %3 = arith.mulf %0, %2 : vector<32x256xf32>
    %c0_3 = arith.constant 0 : index
    %c0_4 = arith.constant 0 : index
    %4 = vector.load %arg3[%c0_3, %c0_4] : memref<1x256xf32, #tpu.memory_space<vmem>>, vector<1x256xf32>
    %5 = vector.broadcast %4 : vector<1x256xf32> to vector<32x256xf32>
    %6 = arith.addf %3, %5 : vector<32x256xf32>
    %cst = arith.constant 0.000000e+00 : f32
    %7 = vector.broadcast %cst : f32 to vector<32x256xf32>
    %8 = arith.maximumf %6, %7 : vector<32x256xf32>
    %c0_5 = arith.constant 0 : index
    %c0_6 = arith.constant 0 : index
    %9 = vector.load %arg4[%c0_5, %c0_6] : memref<32x256xf32, #tpu.memory_space<vmem>>, vector<32x256xf32>
    tpu.vector_store %arg4[%c0_5, %c0_6], %8 {strides = array<i32>} : memref<32x256xf32, #tpu.memory_space<vmem>>, vector<32x256xf32>,
    return
  }
  func.func @transform_0(%arg0: i32) -> (i32, i32) {
    %c0_i32 = arith.constant 0 : i32
    %c0_i32_0 = arith.constant 0 : i32
    %c0_i32_1 = arith.constant 0 : i32
    return %c0_i32, %c0_i32_0 : i32, i32
  }
  func.func @transform_1(%arg0: i32) -> (i32, i32) {
    %c0_i32 = arith.constant 0 : i32
    %c0_i32_0 = arith.constant 0 : i32
    %c0_i32_1 = arith.constant 0 : i32
    return %c0_i32, %c0_i32_0 : i32, i32
  }
  func.func @transform_2(%arg0: i32) -> (i32, i32) {
    %c0_i32 = arith.constant 0 : i32
    %c0_i32_0 = arith.constant 0 : i32
    %c0_i32_1 = arith.constant 0 : i32
    return %c0_i32, %c0_i32_0 : i32, i32
  }
  func.func @transform_3(%arg0: i32) -> (i32, i32) {
    %c0_i32 = arith.constant 0 : i32
    %c0_i32_0 = arith.constant 0 : i32
    %c0_i32_1 = arith.constant 0 : i32
    return %c0_i32, %c0_i32_0 : i32, i32
  }
}

module attributes {stable_mosaic.version = 11 : i64} {
  func.func @_gemm_bn_kernel(%arg0: i32, %arg1: i32, %arg2: memref<1x32x1024xf32, #tpu.memory_space<vmem>>, %arg3: memref<1x1024x128xf32, #tpu.memory_space<vmem>>, %arg4: memref<1x32x128xf32, #tpu.memory_space<vmem>>, %arg5: memref<1x1x128xf32, #tpu.memory_space<vmem>>, %arg6: memref<1x1x128xf32, #tpu.memory_space<vmem>>) attributes {dimension_semantics = [#tpu.dimension_semantics<parallel>, #tpu.dimension_semantics<parallel>], iteration_bounds = array<i64: 4, 1>, scalar_prefetch = 0 : i64, scratch_operands = 0 : i64, tpu.core_type = #tpu.core_type<tc>, window_params = [{transform_indices = @transform_0, window_bounds = array<i64: 1, 32, 1024>}, {transform_indices = @transform_1, window_bounds = array<i64: 1, 1024, 128>}, {transform_indices = @transform_2, window_bounds = array<i64: 1, 32, 128>}, {transform_indices = @transform_3, window_bounds = array<i64: 1, 1, 128>}, {transform_indices = @transform_4, window_bounds = array<i64: 1, 1, 128>}]} {
    %c0 = arith.constant 0 : index
    %c0_0 = arith.constant 0 : index
    %c0_1 = arith.constant 0 : index
    %0 = vector.load %arg2[%c0, %c0_0, %c0_1] : memref<1x32x1024xf32, #tpu.memory_space<vmem>>, vector<1x32x1024xf32>
    %1 = vector.shape_cast %0 : vector<1x32x1024xf32> to vector<32x1024xf32>
    %c0_2 = arith.constant 0 : index
    %c0_3 = arith.constant 0 : index
    %c0_4 = arith.constant 0 : index
    %2 = vector.load %arg3[%c0_2, %c0_3, %c0_4] : memref<1x1024x128xf32, #tpu.memory_space<vmem>>, vector<1x1024x128xf32>
    %3 = vector.shape_cast %2 : vector<1x1024x128xf32> to vector<1024x128xf32>
    %cst = arith.constant dense<0.000000e+00> : vector<32x128xf32>
    %4 = tpu.matmul %1, %3, %cst {dimension_numbers = #tpu.dot_dimension_numbers<[1], [0], [0], [1], [0, 0, 1, 1], [], []>} : vector<32x1024xf32>, vector<1024x128xf32>, vector<32x128xf32> -> vector<32x128xf32>
    %c0_5 = arith.constant 0 : index
    %c0_6 = arith.constant 0 : index
    %c0_7 = arith.constant 0 : index
    %5 = vector.load %arg4[%c0_5, %c0_6, %c0_7] : memref<1x32x128xf32, #tpu.memory_space<vmem>>, vector<1x32x128xf32>
    %6 = vector.shape_cast %5 : vector<1x32x128xf32> to vector<32x128xf32>
    %7 = vector.shape_cast %4 : vector<32x128xf32> to vector<1x32x128xf32>
    tpu.vector_store %arg4[%c0_5, %c0_6, %c0_7], %7 {strides = array<i32>} : memref<1x32x128xf32, #tpu.memory_space<vmem>>, vector<1x32x128xf32>,
    %cst_8 = arith.constant dense<0.000000e+00> : vector<128xf32>
    %8 = vector.multi_reduction <add>, %4, %cst_8 [0] : vector<32x128xf32> to vector<128xf32>
    %9 = vector.shape_cast %8 : vector<128xf32> to vector<1x128xf32>
    %c0_9 = arith.constant 0 : index
    %c0_10 = arith.constant 0 : index
    %c0_11 = arith.constant 0 : index
    %10 = vector.load %arg5[%c0_9, %c0_10, %c0_11] : memref<1x1x128xf32, #tpu.memory_space<vmem>>, vector<1x1x128xf32>
    %11 = vector.shape_cast %10 : vector<1x1x128xf32> to vector<1x128xf32>
    %12 = vector.shape_cast %9 : vector<1x128xf32> to vector<1x1x128xf32>
    tpu.vector_store %arg5[%c0_9, %c0_10, %c0_11], %12 {strides = array<i32>} : memref<1x1x128xf32, #tpu.memory_space<vmem>>, vector<1x1x128xf32>,
    %13 = arith.mulf %4, %4 : vector<32x128xf32>
    %cst_12 = arith.constant dense<0.000000e+00> : vector<128xf32>
    %14 = vector.multi_reduction <add>, %13, %cst_12 [0] : vector<32x128xf32> to vector<128xf32>
    %15 = vector.shape_cast %14 : vector<128xf32> to vector<1x128xf32>
    %c0_13 = arith.constant 0 : index
    %c0_14 = arith.constant 0 : index
    %c0_15 = arith.constant 0 : index
    %16 = vector.load %arg6[%c0_13, %c0_14, %c0_15] : memref<1x1x128xf32, #tpu.memory_space<vmem>>, vector<1x1x128xf32>
    %17 = vector.shape_cast %16 : vector<1x1x128xf32> to vector<1x128xf32>
    %18 = vector.shape_cast %15 : vector<1x128xf32> to vector<1x1x128xf32>
    tpu.vector_store %arg6[%c0_13, %c0_14, %c0_15], %18 {strides = array<i32>} : memref<1x1x128xf32, #tpu.memory_space<vmem>>, vector<1x1x128xf32>,
    return
  }
  func.func @transform_0(%arg0: i32, %arg1: i32) -> (i32, i32, i32) {
    %c0_i32 = arith.constant 0 : i32
    %c0_i32_0 = arith.constant 0 : i32
    %c0_i32_1 = arith.constant 0 : i32
    return %arg0, %c0_i32, %c0_i32_0 : i32, i32, i32
  }
  func.func @transform_1(%arg0: i32, %arg1: i32) -> (i32, i32, i32) {
    %c0_i32 = arith.constant 0 : i32
    %c0_i32_0 = arith.constant 0 : i32
    return %arg0, %c0_i32, %arg1 : i32, i32, i32
  }
  func.func @transform_2(%arg0: i32, %arg1: i32) -> (i32, i32, i32) {
    %c0_i32 = arith.constant 0 : i32
    %c0_i32_0 = arith.constant 0 : i32
    return %arg0, %c0_i32, %arg1 : i32, i32, i32
  }
  func.func @transform_3(%arg0: i32, %arg1: i32) -> (i32, i32, i32) {
    %c0_i32 = arith.constant 0 : i32
    %c0_i32_0 = arith.constant 0 : i32
    return %arg0, %c0_i32, %arg1 : i32, i32, i32
  }
  func.func @transform_4(%arg0: i32, %arg1: i32) -> (i32, i32, i32) {
    %c0_i32 = arith.constant 0 : i32
    %c0_i32_0 = arith.constant 0 : i32
    return %arg0, %c0_i32, %arg1 : i32, i32, i32
  }
}

module attributes {stable_mosaic.version = 11 : i64} {
  func.func @_affine_relu_kernel(%arg0: i32, %arg1: memref<128x128xf32, #tpu.memory_space<vmem>>, %arg2: memref<1x128xf32, #tpu.memory_space<vmem>>, %arg3: memref<1x128xf32, #tpu.memory_space<vmem>>, %arg4: memref<128x128xf32, #tpu.memory_space<vmem>>) attributes {dimension_semantics = [#tpu.dimension_semantics<arbitrary>], iteration_bounds = array<i64: 1>, scalar_prefetch = 0 : i64, scratch_operands = 0 : i64, tpu.core_type = #tpu.core_type<tc>, window_params = [{pipeline_mode = #tpu.pipeline_mode<synchronous>, transform_indices = @transform_0, window_bounds = array<i64: 128, 128>}, {pipeline_mode = #tpu.pipeline_mode<synchronous>, transform_indices = @transform_1, window_bounds = array<i64: 1, 128>}, {pipeline_mode = #tpu.pipeline_mode<synchronous>, transform_indices = @transform_2, window_bounds = array<i64: 1, 128>}, {pipeline_mode = #tpu.pipeline_mode<synchronous>, transform_indices = @transform_3, window_bounds = array<i64: 128, 128>}]} {
    %c0 = arith.constant 0 : index
    %c0_0 = arith.constant 0 : index
    %0 = vector.load %arg1[%c0, %c0_0] : memref<128x128xf32, #tpu.memory_space<vmem>>, vector<128x128xf32>
    %c0_1 = arith.constant 0 : index
    %c0_2 = arith.constant 0 : index
    %1 = vector.load %arg2[%c0_1, %c0_2] : memref<1x128xf32, #tpu.memory_space<vmem>>, vector<1x128xf32>
    %2 = vector.broadcast %1 : vector<1x128xf32> to vector<128x128xf32>
    %3 = arith.mulf %0, %2 : vector<128x128xf32>
    %c0_3 = arith.constant 0 : index
    %c0_4 = arith.constant 0 : index
    %4 = vector.load %arg3[%c0_3, %c0_4] : memref<1x128xf32, #tpu.memory_space<vmem>>, vector<1x128xf32>
    %5 = vector.broadcast %4 : vector<1x128xf32> to vector<128x128xf32>
    %6 = arith.addf %3, %5 : vector<128x128xf32>
    %cst = arith.constant 0.000000e+00 : f32
    %7 = vector.broadcast %cst : f32 to vector<128x128xf32>
    %8 = arith.maximumf %6, %7 : vector<128x128xf32>
    %c0_5 = arith.constant 0 : index
    %c0_6 = arith.constant 0 : index
    %9 = vector.load %arg4[%c0_5, %c0_6] : memref<128x128xf32, #tpu.memory_space<vmem>>, vector<128x128xf32>
    tpu.vector_store %arg4[%c0_5, %c0_6], %8 {strides = array<i32>} : memref<128x128xf32, #tpu.memory_space<vmem>>, vector<128x128xf32>,
    return
  }
  func.func @transform_0(%arg0: i32) -> (i32, i32) {
    %c0_i32 = arith.constant 0 : i32
    %c0_i32_0 = arith.constant 0 : i32
    %c0_i32_1 = arith.constant 0 : i32
    return %c0_i32, %c0_i32_0 : i32, i32
  }
  func.func @transform_1(%arg0: i32) -> (i32, i32) {
    %c0_i32 = arith.constant 0 : i32
    %c0_i32_0 = arith.constant 0 : i32
    %c0_i32_1 = arith.constant 0 : i32
    return %c0_i32, %c0_i32_0 : i32, i32
  }
  func.func @transform_2(%arg0: i32) -> (i32, i32) {
    %c0_i32 = arith.constant 0 : i32
    %c0_i32_0 = arith.constant 0 : i32
    %c0_i32_1 = arith.constant 0 : i32
    return %c0_i32, %c0_i32_0 : i32, i32
  }
  func.func @transform_3(%arg0: i32) -> (i32, i32) {
    %c0_i32 = arith.constant 0 : i32
    %c0_i32_0 = arith.constant 0 : i32
    %c0_i32_1 = arith.constant 0 : i32
    return %c0_i32, %c0_i32_0 : i32, i32
  }
}

module attributes {stable_mosaic.version = 11 : i64} {
  func.func @_gemm_bn_kernel(%arg0: i32, %arg1: i32, %arg2: memref<1x128x512xf32, #tpu.memory_space<vmem>>, %arg3: memref<1x512x128xf32, #tpu.memory_space<vmem>>, %arg4: memref<1x128x128xf32, #tpu.memory_space<vmem>>, %arg5: memref<1x1x128xf32, #tpu.memory_space<vmem>>, %arg6: memref<1x1x128xf32, #tpu.memory_space<vmem>>) attributes {dimension_semantics = [#tpu.dimension_semantics<parallel>, #tpu.dimension_semantics<parallel>], iteration_bounds = array<i64: 4, 1>, scalar_prefetch = 0 : i64, scratch_operands = 0 : i64, tpu.core_type = #tpu.core_type<tc>, window_params = [{transform_indices = @transform_0, window_bounds = array<i64: 1, 128, 512>}, {transform_indices = @transform_1, window_bounds = array<i64: 1, 512, 128>}, {transform_indices = @transform_2, window_bounds = array<i64: 1, 128, 128>}, {transform_indices = @transform_3, window_bounds = array<i64: 1, 1, 128>}, {transform_indices = @transform_4, window_bounds = array<i64: 1, 1, 128>}]} {
    %c0 = arith.constant 0 : index
    %c0_0 = arith.constant 0 : index
    %c0_1 = arith.constant 0 : index
    %0 = vector.load %arg2[%c0, %c0_0, %c0_1] : memref<1x128x512xf32, #tpu.memory_space<vmem>>, vector<1x128x512xf32>
    %1 = vector.shape_cast %0 : vector<1x128x512xf32> to vector<128x512xf32>
    %c0_2 = arith.constant 0 : index
    %c0_3 = arith.constant 0 : index
    %c0_4 = arith.constant 0 : index
    %2 = vector.load %arg3[%c0_2, %c0_3, %c0_4] : memref<1x512x128xf32, #tpu.memory_space<vmem>>, vector<1x512x128xf32>
    %3 = vector.shape_cast %2 : vector<1x512x128xf32> to vector<512x128xf32>
    %cst = arith.constant dense<0.000000e+00> : vector<128x128xf32>
    %4 = tpu.matmul %1, %3, %cst {dimension_numbers = #tpu.dot_dimension_numbers<[1], [0], [0], [1], [0, 0, 1, 1], [], []>} : vector<128x512xf32>, vector<512x128xf32>, vector<128x128xf32> -> vector<128x128xf32>
    %c0_5 = arith.constant 0 : index
    %c0_6 = arith.constant 0 : index
    %c0_7 = arith.constant 0 : index
    %5 = vector.load %arg4[%c0_5, %c0_6, %c0_7] : memref<1x128x128xf32, #tpu.memory_space<vmem>>, vector<1x128x128xf32>
    %6 = vector.shape_cast %5 : vector<1x128x128xf32> to vector<128x128xf32>
    %7 = vector.shape_cast %4 : vector<128x128xf32> to vector<1x128x128xf32>
    tpu.vector_store %arg4[%c0_5, %c0_6, %c0_7], %7 {strides = array<i32>} : memref<1x128x128xf32, #tpu.memory_space<vmem>>, vector<1x128x128xf32>,
    %cst_8 = arith.constant dense<0.000000e+00> : vector<128xf32>
    %8 = vector.multi_reduction <add>, %4, %cst_8 [0] : vector<128x128xf32> to vector<128xf32>
    %9 = vector.shape_cast %8 : vector<128xf32> to vector<1x128xf32>
    %c0_9 = arith.constant 0 : index
    %c0_10 = arith.constant 0 : index
    %c0_11 = arith.constant 0 : index
    %10 = vector.load %arg5[%c0_9, %c0_10, %c0_11] : memref<1x1x128xf32, #tpu.memory_space<vmem>>, vector<1x1x128xf32>
    %11 = vector.shape_cast %10 : vector<1x1x128xf32> to vector<1x128xf32>
    %12 = vector.shape_cast %9 : vector<1x128xf32> to vector<1x1x128xf32>
    tpu.vector_store %arg5[%c0_9, %c0_10, %c0_11], %12 {strides = array<i32>} : memref<1x1x128xf32, #tpu.memory_space<vmem>>, vector<1x1x128xf32>,
    %13 = arith.mulf %4, %4 : vector<128x128xf32>
    %cst_12 = arith.constant dense<0.000000e+00> : vector<128xf32>
    %14 = vector.multi_reduction <add>, %13, %cst_12 [0] : vector<128x128xf32> to vector<128xf32>
    %15 = vector.shape_cast %14 : vector<128xf32> to vector<1x128xf32>
    %c0_13 = arith.constant 0 : index
    %c0_14 = arith.constant 0 : index
    %c0_15 = arith.constant 0 : index
    %16 = vector.load %arg6[%c0_13, %c0_14, %c0_15] : memref<1x1x128xf32, #tpu.memory_space<vmem>>, vector<1x1x128xf32>
    %17 = vector.shape_cast %16 : vector<1x1x128xf32> to vector<1x128xf32>
    %18 = vector.shape_cast %15 : vector<1x128xf32> to vector<1x1x128xf32>
    tpu.vector_store %arg6[%c0_13, %c0_14, %c0_15], %18 {strides = array<i32>} : memref<1x1x128xf32, #tpu.memory_space<vmem>>, vector<1x1x128xf32>,
    return
  }
  func.func @transform_0(%arg0: i32, %arg1: i32) -> (i32, i32, i32) {
    %c0_i32 = arith.constant 0 : i32
    %c0_i32_0 = arith.constant 0 : i32
    %c0_i32_1 = arith.constant 0 : i32
    return %arg0, %c0_i32, %c0_i32_0 : i32, i32, i32
  }
  func.func @transform_1(%arg0: i32, %arg1: i32) -> (i32, i32, i32) {
    %c0_i32 = arith.constant 0 : i32
    %c0_i32_0 = arith.constant 0 : i32
    return %arg0, %c0_i32, %arg1 : i32, i32, i32
  }
  func.func @transform_2(%arg0: i32, %arg1: i32) -> (i32, i32, i32) {
    %c0_i32 = arith.constant 0 : i32
    %c0_i32_0 = arith.constant 0 : i32
    return %arg0, %c0_i32, %arg1 : i32, i32, i32
  }
  func.func @transform_3(%arg0: i32, %arg1: i32) -> (i32, i32, i32) {
    %c0_i32 = arith.constant 0 : i32
    %c0_i32_0 = arith.constant 0 : i32
    return %arg0, %c0_i32, %arg1 : i32, i32, i32
  }
  func.func @transform_4(%arg0: i32, %arg1: i32) -> (i32, i32, i32) {
    %c0_i32 = arith.constant 0 : i32
    %c0_i32_0 = arith.constant 0 : i32
    return %arg0, %c0_i32, %arg1 : i32, i32, i32
  }
}

module attributes {stable_mosaic.version = 11 : i64} {
  func.func @_affine_relu_kernel(%arg0: i32, %arg1: memref<512x128xf32, #tpu.memory_space<vmem>>, %arg2: memref<1x128xf32, #tpu.memory_space<vmem>>, %arg3: memref<1x128xf32, #tpu.memory_space<vmem>>, %arg4: memref<512x128xf32, #tpu.memory_space<vmem>>) attributes {dimension_semantics = [#tpu.dimension_semantics<arbitrary>], iteration_bounds = array<i64: 1>, scalar_prefetch = 0 : i64, scratch_operands = 0 : i64, tpu.core_type = #tpu.core_type<tc>, window_params = [{pipeline_mode = #tpu.pipeline_mode<synchronous>, transform_indices = @transform_0, window_bounds = array<i64: 512, 128>}, {pipeline_mode = #tpu.pipeline_mode<synchronous>, transform_indices = @transform_1, window_bounds = array<i64: 1, 128>}, {pipeline_mode = #tpu.pipeline_mode<synchronous>, transform_indices = @transform_2, window_bounds = array<i64: 1, 128>}, {pipeline_mode = #tpu.pipeline_mode<synchronous>, transform_indices = @transform_3, window_bounds = array<i64: 512, 128>}]} {
    %c0 = arith.constant 0 : index
    %c0_0 = arith.constant 0 : index
    %0 = vector.load %arg1[%c0, %c0_0] : memref<512x128xf32, #tpu.memory_space<vmem>>, vector<512x128xf32>
    %c0_1 = arith.constant 0 : index
    %c0_2 = arith.constant 0 : index
    %1 = vector.load %arg2[%c0_1, %c0_2] : memref<1x128xf32, #tpu.memory_space<vmem>>, vector<1x128xf32>
    %2 = vector.broadcast %1 : vector<1x128xf32> to vector<512x128xf32>
    %3 = arith.mulf %0, %2 : vector<512x128xf32>
    %c0_3 = arith.constant 0 : index
    %c0_4 = arith.constant 0 : index
    %4 = vector.load %arg3[%c0_3, %c0_4] : memref<1x128xf32, #tpu.memory_space<vmem>>, vector<1x128xf32>
    %5 = vector.broadcast %4 : vector<1x128xf32> to vector<512x128xf32>
    %6 = arith.addf %3, %5 : vector<512x128xf32>
    %cst = arith.constant 0.000000e+00 : f32
    %7 = vector.broadcast %cst : f32 to vector<512x128xf32>
    %8 = arith.maximumf %6, %7 : vector<512x128xf32>
    %c0_5 = arith.constant 0 : index
    %c0_6 = arith.constant 0 : index
    %9 = vector.load %arg4[%c0_5, %c0_6] : memref<512x128xf32, #tpu.memory_space<vmem>>, vector<512x128xf32>
    tpu.vector_store %arg4[%c0_5, %c0_6], %8 {strides = array<i32>} : memref<512x128xf32, #tpu.memory_space<vmem>>, vector<512x128xf32>,
    return
  }
  func.func @transform_0(%arg0: i32) -> (i32, i32) {
    %c0_i32 = arith.constant 0 : i32
    %c0_i32_0 = arith.constant 0 : i32
    %c0_i32_1 = arith.constant 0 : i32
    return %c0_i32, %c0_i32_0 : i32, i32
  }
  func.func @transform_1(%arg0: i32) -> (i32, i32) {
    %c0_i32 = arith.constant 0 : i32
    %c0_i32_0 = arith.constant 0 : i32
    %c0_i32_1 = arith.constant 0 : i32
    return %c0_i32, %c0_i32_0 : i32, i32
  }
  func.func @transform_2(%arg0: i32) -> (i32, i32) {
    %c0_i32 = arith.constant 0 : i32
    %c0_i32_0 = arith.constant 0 : i32
    %c0_i32_1 = arith.constant 0 : i32
    return %c0_i32, %c0_i32_0 : i32, i32
  }
  func.func @transform_3(%arg0: i32) -> (i32, i32) {
    %c0_i32 = arith.constant 0 : i32
    %c0_i32_0 = arith.constant 0 : i32
    %c0_i32_1 = arith.constant 0 : i32
    return %c0_i32, %c0_i32_0 : i32, i32
  }
}

module attributes {stable_mosaic.version = 11 : i64} {
  func.func @_gemm_tanh_kernel(%arg0: i32, %arg1: i32, %arg2: memref<1x512x256xf32, #tpu.memory_space<vmem>>, %arg3: memref<1x256x128xf32, #tpu.memory_space<vmem>>, %arg4: memref<1x512x128xf32, #tpu.memory_space<vmem>>) attributes {dimension_semantics = [#tpu.dimension_semantics<parallel>, #tpu.dimension_semantics<parallel>], iteration_bounds = array<i64: 4, 1>, scalar_prefetch = 0 : i64, scratch_operands = 0 : i64, tpu.core_type = #tpu.core_type<tc>, window_params = [{transform_indices = @transform_0, window_bounds = array<i64: 1, 512, 256>}, {transform_indices = @transform_1, window_bounds = array<i64: 1, 256, 128>}, {transform_indices = @transform_2, window_bounds = array<i64: 1, 512, 128>}]} {
    %c0 = arith.constant 0 : index
    %c0_0 = arith.constant 0 : index
    %c0_1 = arith.constant 0 : index
    %0 = vector.load %arg2[%c0, %c0_0, %c0_1] : memref<1x512x256xf32, #tpu.memory_space<vmem>>, vector<1x512x256xf32>
    %1 = vector.shape_cast %0 : vector<1x512x256xf32> to vector<512x256xf32>
    %c0_2 = arith.constant 0 : index
    %c0_3 = arith.constant 0 : index
    %c0_4 = arith.constant 0 : index
    %2 = vector.load %arg3[%c0_2, %c0_3, %c0_4] : memref<1x256x128xf32, #tpu.memory_space<vmem>>, vector<1x256x128xf32>
    %3 = vector.shape_cast %2 : vector<1x256x128xf32> to vector<256x128xf32>
    %cst = arith.constant dense<0.000000e+00> : vector<512x128xf32>
    %4 = tpu.matmul %1, %3, %cst {dimension_numbers = #tpu.dot_dimension_numbers<[1], [0], [0], [1], [0, 0, 1, 1], [], []>} : vector<512x256xf32>, vector<256x128xf32>, vector<512x128xf32> -> vector<512x128xf32>
    %5 = math.tanh %4 : vector<512x128xf32>
    %c0_5 = arith.constant 0 : index
    %c0_6 = arith.constant 0 : index
    %c0_7 = arith.constant 0 : index
    %6 = vector.load %arg4[%c0_5, %c0_6, %c0_7] : memref<1x512x128xf32, #tpu.memory_space<vmem>>, vector<1x512x128xf32>
    %7 = vector.shape_cast %6 : vector<1x512x128xf32> to vector<512x128xf32>
    %8 = vector.shape_cast %5 : vector<512x128xf32> to vector<1x512x128xf32>
    tpu.vector_store %arg4[%c0_5, %c0_6, %c0_7], %8 {strides = array<i32>} : memref<1x512x128xf32, #tpu.memory_space<vmem>>, vector<1x512x128xf32>,
    return
  }
  func.func @transform_0(%arg0: i32, %arg1: i32) -> (i32, i32, i32) {
    %c0_i32 = arith.constant 0 : i32
    %c0_i32_0 = arith.constant 0 : i32
    %c0_i32_1 = arith.constant 0 : i32
    return %arg0, %c0_i32, %c0_i32_0 : i32, i32, i32
  }
  func.func @transform_1(%arg0: i32, %arg1: i32) -> (i32, i32, i32) {
    %c0_i32 = arith.constant 0 : i32
    %c0_i32_0 = arith.constant 0 : i32
    return %arg0, %c0_i32, %arg1 : i32, i32, i32
  }
  func.func @transform_2(%arg0: i32, %arg1: i32) -> (i32, i32, i32) {
    %c0_i32 = arith.constant 0 : i32
    %c0_i32_0 = arith.constant 0 : i32
    return %arg0, %c0_i32, %arg1 : i32, i32, i32
  }
}

</mosaic_0001>

<bundles_post_ra>
// kernel: generator_forward.10
= control target key start
LH: loop header
LB: loop body
LE: loop exit
PB: predicated region body
PF: predicated region fallthrough
CT: control target
= control target key end

     0   :  { %v32_v0 = vlaneseq  ;;  %s270_s1 = inlined_call_operand.vmem [shape: f32[1,512], index: 1, kind: input, shape index: {}]   ;;  %s271_s2 = inlined_call_operand.vmem [shape: f32[1,512], index: 2, kind: input, shape index: {}]   ;;  %s272_s0 = inlined_call_operand.vmem [shape: f32[32,512], index: 0, kind: input, shape index: {}]   ;;  %s273_s3 = inlined_call_operand.vmem [shape: f32[32,512], index: 3, kind: output, shape index: {}]  }
   0x1   :  { %v30_v2 = vld [vmem:[%s270_s1] sm:$0xf]  ;;  %v15_v6 = vld [vmem:[%s272_s0 + $0x8] sm:$0xff]  ;;  %v16_v10 = vld [vmem:[%s272_s0 + $0x10] sm:$0xff] }
   0x2   :  { %v33_v1 = vshrl.u32 %v32_v0, 7  ;;  %v68_v3 = vld [vmem:[%s271_s2] sm:$0xf]  ;;  %v19_v12 = vld [vmem:[%s272_s0 + $0x28] sm:$0xff]  ;;  %v17_v17 = vld [vmem:[%s272_s0 + $0x18] sm:$0xff] }
   0x3   :  { %v14_v4 = vld [vmem:[%s272_s0] sm:$0xff]  ;;  %v20_v18 = vld [vmem:[%s272_s0 + $0x30] sm:$0xff]  ;;  %v21_v19 = vld [vmem:[%s272_s0 + $0x38] sm:$0xff] }
   0x4   :  { %v34_v5 = vsub.s32 0, %v33_v1  ;;  %v38_v7 = vsub.s32 1, %v33_v1  ;;  %v42_v8 = vsub.s32 2, %v33_v1  ;;  %v46_v9 = vsub.s32 3, %v33_v1  ;;  %v18_v11 = vld [vmem:[%s272_s0 + $0x20] sm:$0xff]  ;;  %v23_v37 = vld [vmem:[%s272_s0 + $0x48] sm:$0xff] }
   0x5   :  { %v22_v36 = vld [vmem:[%s272_s0 + $0x40] sm:$0xff]  ;;  %v24_v38 = vld [vmem:[%s272_s0 + $0x50] sm:$0xff]  ;;  %v25_v43 = vld [vmem:[%s272_s0 + $0x58] sm:$0xff] }
   0x6   :  { %v35_v13 = vrot.slane %v30_v2, %v34_v5  ;;  %v183_v14 = vrot.slane %v68_v3, %v34_v5  ;;  %v39_v15 = vrot.slane %v30_v2, %v38_v7  ;;  %v77_v16 = vrot.slane %v68_v3, %v38_v7  ;;  %v26_v44 = vld [vmem:[%s272_s0 + $0x60] sm:$0xff]  ;;  %v27_v45 = vld [vmem:[%s272_s0 + $0x68] sm:$0xff]  ;;  %v28_v50 = vld [vmem:[%s272_s0 + $0x70] sm:$0xff] }
   0x7   :  { %v43_v20 = vrot.slane %v30_v2, %v42_v8  ;;  %v81_v21 = vrot.slane %v68_v3, %v42_v8  ;;  %v47_v22 = vrot.slane %v30_v2, %v46_v9  ;;  %v85_v23 = vrot.slane %v68_v3, %v46_v9  ;;  %v29_v51 = vld [vmem:[%s272_s0 + $0x78] sm:$0xff] }
   0x8   :  { %v52_v24 = vmul.f32 %v35_v13, %v14_v4  ;;  %v53_v25 = vmul.f32 %v39_v15, %v15_v6  ;;  %v56_v26 = vmul.f32 %v35_v13, %v18_v11  ;;  %v57_v27 = vmul.f32 %v39_v15, %v19_v12 }
   0x9   :  { %v54_v28 = vmul.f32 %v43_v20, %v16_v10  ;;  %v55_v29 = vmul.f32 %v47_v22, %v17_v17  ;;  %v58_v30 = vmul.f32 %v43_v20, %v20_v18  ;;  %v59_v31 = vmul.f32 %v47_v22, %v21_v19 }
   0xa   :  { %v90_v32 = vadd.f32 %v183_v14, %v52_v24  ;;  %v91_v33 = vadd.f32 %v77_v16, %v53_v25  ;;  %v94_v34 = vadd.f32 %v183_v14, %v56_v26  ;;  %v95_v35 = vadd.f32 %v77_v16, %v57_v27 }
   0xb   :  { %v92_v39 = vadd.f32 %v81_v21, %v54_v28  ;;  %v93_v40 = vadd.f32 %v85_v23, %v55_v29  ;;  %v96_v41 = vadd.f32 %v81_v21, %v58_v30  ;;  %v97_v42 = vadd.f32 %v85_v23, %v59_v31 }
   0xc   :  { %v106_v46 = vmax.f32 %v90_v32, 0.0  ;;  %v107_v47 = vmax.f32 %v91_v33, 0.0  ;;  %v110_v48 = vmax.f32 %v94_v34, 0.0  ;;  %v111_v49 = vmax.f32 %v95_v35, 0.0 }
   0xd   :  { %v108_v52 = vmax.f32 %v92_v39, 0.0  ;;  %v109_v53 = vmax.f32 %v93_v40, 0.0  ;;  %v112_v54 = vmax.f32 %v96_v41, 0.0  ;;  %v113_v55 = vmax.f32 %v97_v42, 0.0 }
   0xe   :  { %122 = vst [vmem:[%s273_s3] sm:$0xff] %v106_v46  ;;  %123 = vst [vmem:[%s273_s3 + $0x8] sm:$0xff] %v107_v47  ;;  %v60_v56 = vmul.f32 %v35_v13, %v22_v36  ;;  %v61_v57 = vmul.f32 %v39_v15, %v23_v37  ;;  %v62_v58 = vmul.f32 %v43_v20, %v24_v38 }
   0xf   :  { %126 = vst [vmem:[%s273_s3 + $0x20] sm:$0xff] %v110_v48  ;;  %127 = vst [vmem:[%s273_s3 + $0x28] sm:$0xff] %v111_v49  ;;  %v63_v59 = vmul.f32 %v47_v22, %v25_v43  ;;  %v64_v60 = vmul.f32 %v35_v13, %v26_v44  ;;  %v65_v61 = vmul.f32 %v39_v15, %v27_v45 }
  0x10   :  { %124 = vst [vmem:[%s273_s3 + $0x10] sm:$0xff] %v108_v52  ;;  %125 = vst [vmem:[%s273_s3 + $0x18] sm:$0xff] %v109_v53  ;;  %v66_v62 = vmul.f32 %v43_v20, %v28_v50  ;;  %v67_v63 = vmul.f32 %v47_v22, %v29_v51  ;;  %v98_v0 = vadd.f32 %v183_v14, %v60_v56 }
  0x11   :  { %128 = vst [vmem:[%s273_s3 + $0x30] sm:$0xff] %v112_v54  ;;  %129 = vst [vmem:[%s273_s3 + $0x38] sm:$0xff] %v113_v55  ;;  %v99_v1 = vadd.f32 %v77_v16, %v61_v57  ;;  %v100_v2 = vadd.f32 %v81_v21, %v62_v58  ;;  %v101_v3 = vadd.f32 %v85_v23, %v63_v59 }
  0x12   :  { %v102_v4 = vadd.f32 %v183_v14, %v64_v60  ;;  %v103_v5 = vadd.f32 %v77_v16, %v65_v61  ;;  %v104_v6 = vadd.f32 %v81_v21, %v66_v62  ;;  %v105_v7 = vadd.f32 %v85_v23, %v67_v63 }
  0x13   :  { %v114_v8 = vmax.f32 %v98_v0, 0.0  ;;  %v115_v9 = vmax.f32 %v99_v1, 0.0  ;;  %v116_v10 = vmax.f32 %v100_v2, 0.0  ;;  %v117_v11 = vmax.f32 %v101_v3, 0.0 }
  0x14   :  { %v118_v12 = vmax.f32 %v102_v4, 0.0  ;;  %v119_v17 = vmax.f32 %v103_v5, 0.0  ;;  %v120_v13 = vmax.f32 %v104_v6, 0.0  ;;  %v121_v15 = vmax.f32 %v105_v7, 0.0 }
  0x15   :  { %130 = vst [vmem:[%s273_s3 + $0x40] sm:$0xff] %v114_v8  ;;  %131 = vst [vmem:[%s273_s3 + $0x48] sm:$0xff] %v115_v9 }
  0x16   :  { %132 = vst [vmem:[%s273_s3 + $0x50] sm:$0xff] %v116_v10  ;;  %133 = vst [vmem:[%s273_s3 + $0x58] sm:$0xff] %v117_v11 }
  0x17   :  { %134 = vst [vmem:[%s273_s3 + $0x60] sm:$0xff] %v118_v12  ;;  %135 = vst [vmem:[%s273_s3 + $0x68] sm:$0xff] %v119_v17 }
  0x18   :  { %136 = vst [vmem:[%s273_s3 + $0x70] sm:$0xff] %v120_v13  ;;  %137 = vst [vmem:[%s273_s3 + $0x78] sm:$0xff] %v121_v15 }

// kernel: generator_forward.9
= control target key start
LH: loop header
LB: loop body
LE: loop exit
PB: predicated region body
PF: predicated region fallthrough
CT: control target
= control target key end

     0   :  { %s928_s15 = smov 0   ;;  %s930_s16 = smov 0   ;;  %s1134_s0 = inlined_call_operand.vmem [shape: f32[4,8,128], index: 0, kind: input, shape index: {}]   ;;  %s1135_s1 = inlined_call_operand.vmem [shape: f32[4,128,512], index: 1, kind: input, shape index: {}]   ;;  %s1136_s2 = inlined_call_operand.vmem [shape: f32[4,8,512], index: 2, kind: output, shape index: {0}]   ;;  %s1137_s3 = inlined_call_operand.vmem [shape: f32[4,1,512], index: 3, kind: output, shape index: {1}]   ;;  %s1138_s4 = inlined_call_operand.vmem [shape: f32[4,1,512], index: 4, kind: output, shape index: {2}]  }
   0x1   :  { %s932_s17 = smov 0   ;;  %s934_s18 = smov 0  }
   0x2   :  { %s936_s19 = smov 0   ;;  %s938_s20 = smov 0  }
   0x3   :  { %s940_s21 = smov 0  }
   0x4 LB: > { %s24_s22 = sadd.s32 1, %s891_s19  ;;  %s27_s23 = sadd.s32 1, %s895_s20  ;;  %s899_s21 = sphi %s940_s21, %s15_s21   ;;  %s895_s20 = sphi %s938_s20, %s1144_s20   ;;  %s891_s19 = sphi %s936_s19, %s1143_s19   ;;  %s887_s18 = sphi %s934_s18, %s1142_s18   ;;  %s883_s17 = sphi %s932_s17, %s1141_s17   ;;  %s879_s16 = sphi %s930_s16, %s1140_s16   ;;  %s875_s15 = sphi %s928_s15, %s1139_s15  }
   0x5   : > { %p25_p0 = scmp.ge.s32.totalorder %s24_s22, 2  ;;  %p69_p1 = scmp.ne.s32.totalorder %s879_s16, %s875_s15 }
   0x6   : > { %p70_p2 = scmp.eq.s32.totalorder %s899_s21, 0  ;;  %s62_s27 = sadd.s32 1, %s879_s16 }
   0x7   : > { %s1146_s22 = smov (%p25_p0, %s24_s22), 0  ;;  %s1148_s23 = smov (!%p25_p0, %s27_s23), %s895_s20 }
   0x8   : > { %p71_p3 = por %p70_p2, %p69_p1  ;;  %p29_p4 = scmp.ge.s32.totalorder %s1148_s23, 4 }
   0x9   : > { %s58_s24 = ssub.s32 %s891_s19, %s1146_s22  ;;  %p738_p6 = scmp.ge.s32.totalorder %s899_s21, 8 }
   0xa   : > { %s1150_s23 = smov (%p29_p4, %s1148_s23), 0 }
   0xb   : > { %s57_s25 = ssub.s32 %s895_s20, %s1150_s23  ;;  %179 = sbr.rel (%p738_p6) target bundleno = 41 (0x29), region = 16 }
   0xc   : > { %s59_s26 = sor.u32 %s58_s24, %s57_s25 }
   0xd   : > { %p60_p5 = scmp.eq.s32.totalorder %s59_s26, 0 }
   0xf   : > { %s979_s28 = scalar_select %p60_p5, %s879_s16, %s62_s27  }
  0x12   : > { %189 = sbr.rel (!%p71_p3) target bundleno = 41 (0x29), region = 24  ;;  %s191_s29 = sand.u32 (%p71_p3), 1, %s879_s16  }
  0x13   : > { %s740_s30 = sshll.u32 (%p71_p3), %s891_s19, 1  ;;  %s739_s5 = sshll.u32 (%p71_p3), %s191_s29, 8 }
  0x14   : > { %s741_s6 = sshll.u32 (%p71_p3), %s895_s20, 6  ;;  %s993_s12 = scalar_lea.vmem (%p71_p3), [#allocation2], %s739_s5 }
  0x15   : > { %s196_s7 = sadd.s32 (%p71_p3), %s741_s6, %s740_s30 }
  0x16   : > { %s742_s8 = sshll.u32 (%p71_p3), %s196_s7, 3 }
  0x17   : > { %s988_s11 = scalar_lea.vmem (%p71_p3), %s1135_s1, %s742_s8 }
  0x18   : > { %v211_v0 = vld [vmem:[%s988_s11] sm:$0xff] (%p71_p3)  ;;  %v213_v1 = vld [vmem:[%s988_s11 + $0x8] sm:$0xff] (%p71_p3) }
  0x19   : > { %v215_v2 = vld [vmem:[%s988_s11 + $0x20] sm:$0xff]  ;;  %212 = vst [vmem:[%s993_s12] sm:$0xff] %v211_v0  ;;  %214 = vst [vmem:[%s993_s12 + $0x8] sm:$0xff] %v213_v1  ;;  %v217_v3 = vld [vmem:[%s988_s11 + $0x28] sm:$0xff] }
  0x1a   : > { %216 = vst [vmem:[%s993_s12 + $0x10] sm:$0xff] %v215_v2  ;;  %v219_v4 = vld [vmem:[%s988_s11 + $0x40] sm:$0xff]  ;;  %v221_v5 = vld [vmem:[%s988_s11 + $0x48] sm:$0xff]  ;;  %218 = vst [vmem:[%s993_s12 + $0x18] sm:$0xff] %v217_v3 }
  0x1b   : > { %220 = vst [vmem:[%s993_s12 + $0x20] sm:$0xff] %v219_v4  ;;  %222 = vst [vmem:[%s993_s12 + $0x28] sm:$0xff] %v221_v5  ;;  %v223_v6 = vld [vmem:[%s988_s11 + $0x60] sm:$0xff]  ;;  %v225_v7 = vld [vmem:[%s988_s11 + $0x68] sm:$0xff] }
  0x1c   : > { %v227_v8 = vld [vmem:[%s988_s11 + $0x80] sm:$0xff]  ;;  %224 = vst [vmem:[%s993_s12 + $0x30] sm:$0xff] %v223_v6  ;;  %226 = vst [vmem:[%s993_s12 + $0x38] sm:$0xff] %v225_v7  ;;  %v229_v9 = vld [vmem:[%s988_s11 + $0x88] sm:$0xff] }
  0x1d   : > { %228 = vst [vmem:[%s993_s12 + $0x40] sm:$0xff] %v227_v8  ;;  %v231_v10 = vld [vmem:[%s988_s11 + $0xa0] sm:$0xff]  ;;  %v233_v11 = vld [vmem:[%s988_s11 + $0xa8] sm:$0xff]  ;;  %230 = vst [vmem:[%s993_s12 + $0x48] sm:$0xff] %v229_v9 }
  0x1e   : > { %232 = vst [vmem:[%s993_s12 + $0x50] sm:$0xff] %v231_v10  ;;  %234 = vst [vmem:[%s993_s12 + $0x58] sm:$0xff] %v233_v11  ;;  %v235_v12 = vld [vmem:[%s988_s11 + $0xc0] sm:$0xff]  ;;  %v237_v13 = vld [vmem:[%s988_s11 + $0xc8] sm:$0xff] }
  0x1f   : > { %v239_v14 = vld [vmem:[%s988_s11 + $0xe0] sm:$0xff]  ;;  %236 = vst [vmem:[%s993_s12 + $0x60] sm:$0xff] %v235_v12  ;;  %238 = vst [vmem:[%s993_s12 + $0x68] sm:$0xff] %v237_v13  ;;  %v241_v15 = vld [vmem:[%s988_s11 + $0xe8] sm:$0xff] }
  0x20   : > { %240 = vst [vmem:[%s993_s12 + $0x70] sm:$0xff] %v239_v14  ;;  %v243_v16 = vld [vmem:[%s988_s11 + $0x100] sm:$0xff]  ;;  %v245_v17 = vld [vmem:[%s988_s11 + $0x108] sm:$0xff]  ;;  %242 = vst [vmem:[%s993_s12 + $0x78] sm:$0xff] %v241_v15 }
  0x21   : > { %244 = vst [vmem:[%s993_s12 + $0x80] sm:$0xff] %v243_v16  ;;  %246 = vst [vmem:[%s993_s12 + $0x88] sm:$0xff] %v245_v17  ;;  %v247_v18 = vld [vmem:[%s988_s11 + $0x120] sm:$0xff]  ;;  %v249_v19 = vld [vmem:[%s988_s11 + $0x128] sm:$0xff] }
  0x22   : > { %v251_v20 = vld [vmem:[%s988_s11 + $0x140] sm:$0xff]  ;;  %248 = vst [vmem:[%s993_s12 + $0x90] sm:$0xff] %v247_v18  ;;  %250 = vst [vmem:[%s993_s12 + $0x98] sm:$0xff] %v249_v19  ;;  %v253_v21 = vld [vmem:[%s988_s11 + $0x148] sm:$0xff] }
  0x23   : > { %252 = vst [vmem:[%s993_s12 + $0xa0] sm:$0xff] %v251_v20  ;;  %v255_v22 = vld [vmem:[%s988_s11 + $0x160] sm:$0xff]  ;;  %v257_v23 = vld [vmem:[%s988_s11 + $0x168] sm:$0xff]  ;;  %254 = vst [vmem:[%s993_s12 + $0xa8] sm:$0xff] %v253_v21 }
  0x24   : > { %256 = vst [vmem:[%s993_s12 + $0xb0] sm:$0xff] %v255_v22  ;;  %258 = vst [vmem:[%s993_s12 + $0xb8] sm:$0xff] %v257_v23  ;;  %v259_v24 = vld [vmem:[%s988_s11 + $0x180] sm:$0xff]  ;;  %v261_v25 = vld [vmem:[%s988_s11 + $0x188] sm:$0xff] }
  0x25   : > { %v263_v26 = vld [vmem:[%s988_s11 + $0x1a0] sm:$0xff]  ;;  %260 = vst [vmem:[%s993_s12 + $0xc0] sm:$0xff] %v259_v24  ;;  %262 = vst [vmem:[%s993_s12 + $0xc8] sm:$0xff] %v261_v25  ;;  %v265_v27 = vld [vmem:[%s988_s11 + $0x1a8] sm:$0xff] }
  0x26   : > { %264 = vst [vmem:[%s993_s12 + $0xd0] sm:$0xff] %v263_v26  ;;  %v267_v28 = vld [vmem:[%s988_s11 + $0x1c0] sm:$0xff]  ;;  %v269_v29 = vld [vmem:[%s988_s11 + $0x1c8] sm:$0xff]  ;;  %266 = vst [vmem:[%s993_s12 + $0xd8] sm:$0xff] %v265_v27 }
  0x27   : > { %268 = vst [vmem:[%s993_s12 + $0xe0] sm:$0xff] %v267_v28  ;;  %270 = vst [vmem:[%s993_s12 + $0xe8] sm:$0xff] %v269_v29  ;;  %v271_v30 = vld [vmem:[%s988_s11 + $0x1e0] sm:$0xff]  ;;  %v273_v31 = vld [vmem:[%s988_s11 + $0x1e8] sm:$0xff] }
  0x28   : > { %272 = vst [vmem:[%s993_s12 + $0xf0] sm:$0xff] %v271_v30  ;;  %274 = vst [vmem:[%s993_s12 + $0xf8] sm:$0xff] %v273_v31 }
  0x29 PF: > { %p743_p7 = scmp.ge.s32.totalorder %s899_s21, 1  ;;  %p279_p8 = scmp.lt.s32.totalorder %s899_s21, 9 }
  0x2b   : > { %p280_p9 = pnand %p743_p7, %p279_p8 }
  0x2c   : > { %s286_s13 = sand.u32 (!%p280_p9), 1, %s875_s15   ;;  %v901_v32 = vmov (!%p280_p9), 0.0   ;;  %p335_p10 = scmp.lt.s32.totalorder (!%p280_p9), %s887_s18, 3  ;;  %v902_v27 = vmov (!%p280_p9), 1966171168   ;;  %v492_v29 = vlaneseq (!%p280_p9) }
  0x2d   : > { %283 = sbr.rel (%p280_p9) target bundleno = 316 (0x13c), region = 47  ;;  %s744_s14 = sshll.u32 (!%p280_p9), %s286_s13, 8  ;;  %465 = vmatprep.mubr.f32.mxu0 (!%p280_p9), %v901_v32  ;;  %v490_v28 = vunpack.c.l.s4 (!%p280_p9), %v902_v27 }
  0x2e   : > { %s1059_s24 = scalar_lea.vmem (!%p280_p9), [#allocation2], %s744_s14  ;;  %s746_s29 = sshll.u32 (!%p280_p9), %s883_s17, 1  ;;  %vm506_vm0 = vcmp.lt.s32.totalorder (!%p280_p9), %v492_v29, 256 }
  0x2f   : > { %v370_v33 = vld [vmem:[%s1059_s24 + $0x8] sm:$0xff] (!%p280_p9)  ;;  %v372_v34 = vld [vmem:[%s1059_s24 + $0x18] sm:$0xff] (!%p280_p9)  ;;  %v369_v35 = vld [vmem:[%s1059_s24] sm:$0xff] (!%p280_p9)  ;;  %p343_p11 = scmp.lt.s32.totalorder (!%p280_p9), %s746_s29, 3 }
  0x30   : > { %v755_v36 = vpack.c.bf16 (!%p280_p9), %v372_v34, %v370_v33  ;;  %v371_v37 = vld [vmem:[%s1059_s24 + $0x10] sm:$0xff] (!%p280_p9)  ;;  %v374_v38 = vld [vmem:[%s1059_s24 + $0x28] sm:$0xff] (!%p280_p9)  ;;  %v376_v39 = vld [vmem:[%s1059_s24 + $0x38] sm:$0xff] (!%p280_p9) }
  0x31   : > { %v757_v40 = vpack.c.bf16 (!%p280_p9), %v371_v37, %v369_v35  ;;  %v759_v41 = vpack.c.bf16 (!%p280_p9), %v376_v39, %v374_v38  ;;  %v373_v42 = vld [vmem:[%s1059_s24 + $0x20] sm:$0xff] (!%p280_p9)  ;;  %v375_v43 = vld [vmem:[%s1059_s24 + $0x30] sm:$0xff] (!%p280_p9)  ;;  %v378_v44 = vld [vmem:[%s1059_s24 + $0x48] sm:$0xff] (!%p280_p9)  ;;  %v491_v38 = vunpack.c.0.s8 (!%p280_p9), %v490_v28  ;;  %v493_v39 = vshrl.u32 (!%p280_p9), %v492_v29, 7 }
  0x32   : > { %756 = vmatprep.subr.bf16.mxu0 (!%p280_p9), %v755_v36  ;;  %v380_v45 = vld [vmem:[%s1059_s24 + $0x58] sm:$0xff] (!%p280_p9)  ;;  %v761_v46 = vpack.c.bf16 (!%p280_p9), %v375_v43, %v373_v42  ;;  %v377_v48 = vld [vmem:[%s1059_s24 + $0x40] sm:$0xff] (!%p280_p9)  ;;  %v379_v49 = vld [vmem:[%s1059_s24 + $0x50] sm:$0xff] (!%p280_p9) }
  0x33   : > { %758 = vmatpush1.bf16.msra.mxu0 (!%p280_p9), %v757_v40  ;;  %v763_v47 = vpack.c.bf16 (!%p280_p9), %v380_v45, %v378_v44  ;;  %v382_v50 = vld [vmem:[%s1059_s24 + $0x68] sm:$0xff] (!%p280_p9)  ;;  %v384_v51 = vld [vmem:[%s1059_s24 + $0x78] sm:$0xff] (!%p280_p9)  ;;  %v765_v52 = vpack.c.bf16 (!%p280_p9), %v379_v49, %v377_v48  ;;  %v381_v54 = vld [vmem:[%s1059_s24 + $0x60] sm:$0xff] (!%p280_p9)  ;;  %v494_v48 = vsub.s32 (!%p280_p9), %v491_v38, %v493_v39 }
  0x34   : > { %760 = vmatprep.subr.bf16.mxu0 %v759_v41  ;;  %v767_v53 = vpack.c.bf16 %v384_v51, %v382_v50  ;;  %v383_v55 = vld [vmem:[%s1059_s24 + $0x70] sm:$0xff]  ;;  %v386_v56 = vld [vmem:[%s1059_s24 + $0x88] sm:$0xff]  ;;  %v388_v57 = vld [vmem:[%s1059_s24 + $0x98] sm:$0xff]  ;;  %s1152_s18 = smov (!%p335_p10, %s887_s18), 3  ;;  %s1154_s29 = smov (!%p343_p11, %s746_s29), 3 }
  0x35   : > { %v769_v58 = vpack.c.bf16 %v383_v55, %v381_v54  ;;  %v771_v59 = vpack.c.bf16 %v388_v57, %v386_v56  ;;  %v385_v60 = vld [vmem:[%s1059_s24 + $0x80] sm:$0xff]  ;;  %v387_v61 = vld [vmem:[%s1059_s24 + $0x90] sm:$0xff]  ;;  %v390_v62 = vld [vmem:[%s1059_s24 + $0xa8] sm:$0xff]  ;;  %s745_s15 = sshll.u32 %s1152_s18, 3  ;;  %s747_s30 = sshll.u32 %s1152_s18, 2 }
  0x36   : > { %v392_v63 = vld [vmem:[%s1059_s24 + $0xb8] sm:$0xff]  ;;  %v773_v0 = vpack.c.bf16 %v387_v61, %v385_v60  ;;  %v389_v2 = vld [vmem:[%s1059_s24 + $0xa0] sm:$0xff]  ;;  %v391_v3 = vld [vmem:[%s1059_s24 + $0xb0] sm:$0xff]  ;;  %s338_s27 = scalar_lea.vmem %s1134_s0, %s745_s15  ;;  %s1099_s5 = sadd.s32 %s747_s30, %s1154_s29 }
  0x37   : > { %762 = vmatpush1.bf16.msra.mxu0 %v761_v46  ;;  %v775_v1 = vpack.c.bf16 %v392_v63, %v390_v62  ;;  %v394_v4 = vld [vmem:[%s1059_s24 + $0xc8] sm:$0xff]  ;;  %v396_v5 = vld [vmem:[%s1059_s24 + $0xd8] sm:$0xff]  ;;  %v777_v6 = vpack.c.bf16 %v391_v3, %v389_v2  ;;  %v393_v8 = vld [vmem:[%s1059_s24 + $0xc0] sm:$0xff]  ;;  %s748_s6 = sshll.u32 %s1099_s5, 3  ;;  %s357_s10 = scalar_lea.vmem %s1137_s3, %s1099_s5 }
  0x38   : > { %764 = vmatprep.subr.bf16.mxu0 %v763_v47  ;;  %v779_v7 = vpack.c.bf16 %v396_v5, %v394_v4  ;;  %v395_v9 = vld [vmem:[%s1059_s24 + $0xd0] sm:$0xff]  ;;  %v398_v10 = vld [vmem:[%s1059_s24 + $0xe8] sm:$0xff]  ;;  %v400_v11 = vld [vmem:[%s1059_s24 + $0xf8] sm:$0xff]  ;;  %s348_s9 = scalar_lea.vmem %s1136_s2, %s748_s6  ;;  %s366_s13 = scalar_lea.vmem %s1138_s4, %s1099_s5 }
  0x39   : > { %v781_v12 = vpack.c.bf16 %v395_v9, %v393_v8  ;;  %v783_v13 = vpack.c.bf16 %v400_v11, %v398_v10  ;;  %v397_v14 = vld [vmem:[%s1059_s24 + $0xe0] sm:$0xff]  ;;  %v399_v15 = vld [vmem:[%s1059_s24 + $0xf0] sm:$0xff] }
  0x3a   : > { %v785_v16 = vpack.c.bf16 %v399_v15, %v397_v14  ;;  %v368_v17 = vld [vmem:[%s338_s27] sm:$0xff] }
  0x3b   : > { %766 = vmatpush1.bf16.msra.mxu0 %v765_v52 }
  0x3c   : > { %768 = vmatprep.subr.bf16.mxu0 %v767_v53 }
  0x3f   : > { %770 = vmatpush1.bf16.msra.mxu0 %v769_v58 }
  0x40   : > { %772 = vmatprep.subr.bf16.mxu0 %v771_v59 }
  0x43   : > { %774 = vmatpush1.bf16.msra.mxu0 %v773_v0 }
  0x44   : > { %776 = vmatprep.subr.bf16.mxu0 %v775_v1 }
  0x47   : > { %778 = vmatpush1.bf16.msra.mxu0 %v777_v6 }
  0x48   : > { %780 = vmatprep.subr.bf16.mxu0 %v779_v7 }
  0x4b   : > { %782 = vmatpush1.bf16.msra.mxu0 %v781_v12 }
  0x4c   : > { %784 = vmatprep.subr.bf16.mxu0 %v783_v13 }
  0x4f   : > { %786 = vmatpush1.bf16.msra.mxu0 %v785_v16 }
  0x52   : > { %466 = vmatmul.mubr.f32.vlgmr.msra.gmra.mrb[0].mxu0 %v368_v17 }
 0x125   : > { %v467_v18 = vpop.f32.mrb[0].mxu0 }
 0x126   : > { %v474_v19 = vrot.slane %v467_v18, 4  ;;  %v509_v20 = vmul.f32 %v467_v18, %v467_v18  ;;  %v469_v21 = vpop.f32.mrb[1].mxu0  ;;  %472 = vst [vmem:[%s348_s9] sm:$0xff] %v467_v18 }
 0x127   : > { %473 = vst [vmem:[%s348_s9 + $0x8] sm:$0xff] %v469_v21  ;;  %v480_v22 = vrot.slane %v469_v21, 4  ;;  %v510_v23 = vmul.f32 %v469_v21, %v469_v21 }
 0x128   : > { %v475_v24 = vadd.f32 %v474_v19, %v467_v18  ;;  %v511_v25 = vrot.slane %v509_v20, 4 }
 0x129   : > { %v481_v26 = vadd.f32 %v480_v22, %v469_v21  ;;  %v517_v30 = vrot.slane %v510_v23, 4 }
 0x12a   : > { %v476_v31 = vrot.slane %v475_v24, 2  ;;  %v512_v32 = vadd.f32 %v511_v25, %v509_v20 }
 0x12b   : > { %v482_v33 = vrot.slane %v481_v26, 2  ;;  %v518_v34 = vadd.f32 %v517_v30, %v510_v23 }
 0x12c   : > { %v477_v35 = vadd.f32 %v476_v31, %v475_v24  ;;  %v513_v36 = vrot.slane %v512_v32, 2 }
 0x12d   : > { %v483_v37 = vadd.f32 %v482_v33, %v481_v26  ;;  %v519_v40 = vrot.slane %v518_v34, 2 }
 0x12e   : > { %v478_v41 = vrot.slane %v477_v35, 1  ;;  %v514_v42 = vadd.f32 %v513_v36, %v512_v32 }
 0x12f   : > { %v484_v43 = vrot.slane %v483_v37, 1  ;;  %v520_v44 = vadd.f32 %v519_v40, %v518_v34 }
 0x130   : > { %v479_v45 = vadd.f32 %v478_v41, %v477_v35  ;;  %v515_v46 = vrot.slane %v514_v42, 1 }
 0x131   : > { %v485_v47 = vadd.f32 %v484_v43, %v483_v37  ;;  %v521_v49 = vrot.slane %v520_v44, 1 }
 0x132   : > { %v516_v50 = vadd.f32 %v515_v46, %v514_v42 }
 0x133   : > { %v488_v51 = vcombine.low %v479_v45, %v485_v47  ;;  %v522_v52 = vadd.f32 %v521_v49, %v520_v44 }
 0x135   : > { %v495_v53 = vrot.slane %v488_v51, %v494_v48  ;;  %v525_v54 = vcombine.low %v516_v50, %v522_v52 }
 0x137   : > { %v502_v55 = vrot.slane %v495_v53, %v494_v48  ;;  %v532_v56 = vrot.slane %v525_v54, %v494_v48 }
 0x139   : > { %508 = vst.msk [vmem:[%s357_s10] sm:$0x3] %vm506_vm0, %v502_v55  ;;  %v539_v57 = vrot.slane %v532_v56, %v494_v48 }
 0x13b   : > { %541 = vst.msk [vmem:[%s366_s13] sm:$0x3] %vm506_vm0, %v539_v57 }
 0x13c PF: > { %s15_s21 = sadd.s32 1, %s899_s21   ;;  %s1139_s15 = smov %s879_s16 }
 0x13d   : > { %p12_p12 = scmp.ge.s32.totalorder %s15_s21, 10   ;;  %s1140_s16 = smov %s979_s28 }
 0x13e   : > { %s1141_s17 = smov %s891_s19  ;;  %s1142_s18 = smov %s895_s20 }
 0x13f   : > { %s1143_s19 = smov %s1146_s22  ;;  %s1144_s20 = smov %s1150_s23 }
 0x140   :  { %14 = sbr.rel (!%p12_p12) target bundleno = 4 (0x4), region = 113 }

// kernel: generator_forward.11
= control target key start
LH: loop header
LB: loop body
LE: loop exit
PB: predicated region body
PF: predicated region fallthrough
CT: control target
= control target key end

     0   :  { %s2272_s15 = smov 0   ;;  %s2274_s16 = smov 0   ;;  %s2852_s0 = inlined_call_operand.vmem [shape: f32[4,8,2048], index: 0, kind: input, shape index: {}]   ;;  %s2853_s1 = inlined_call_operand.vmem [shape: f32[4,2048,256], index: 1, kind: input, shape index: {}]   ;;  %s2854_s2 = inlined_call_operand.vmem [shape: f32[4,8,256], index: 2, kind: output, shape index: {0}]   ;;  %s2855_s3 = inlined_call_operand.vmem [shape: f32[4,1,256], index: 3, kind: output, shape index: {1}]   ;;  %s2856_s4 = inlined_call_operand.vmem [shape: f32[4,1,256], index: 4, kind: output, shape index: {2}]  }
   0x1   :  { %s2276_s17 = smov 0  }
   0x2 LB: > { %s27_s18 = sadd.s32 1, %s2240_s16  ;;  %p1657_p0 = scmp.ge.s32.totalorder %s2244_s17, 1  ;;  %s2244_s17 = sphi %s2276_s17, %s15_s17   ;;  %s2240_s16 = sphi %s2274_s16, %s2858_s16   ;;  %s2236_s15 = sphi %s2272_s15, %s2857_s15  }
   0x3   : > { %p29_p1 = scmp.ge.s32.totalorder %s27_s18, 4  ;;  %p202_p2 = scmp.lt.s32.totalorder %s2244_s17, 5 }
   0x5   : > { %s2860_s18 = smov (%p29_p1, %s27_s18), 0  ;;  %p203_p3 = pnand %p1657_p0, %p202_p2 }
   0x6   : > { %p257_p4 = scmp.lt.s32.totalorder (!%p203_p3), %s2236_s15, 3 }
   0x7   : > { %206 = sbr.rel (%p203_p3) target bundleno = 513 (0x201), region = 28 }
   0xe   : > { %s2862_s15 = smov (!%p257_p4, %s2236_s15), 3 }
   0xf   : > { %s1669_s19 = sshll.u32 %s2862_s15, 12  ;;  %s1668_s23 = sshll.u32 %s2862_s15, 7 }
  0x10   : > { %s2296_s22 = scalar_lea.vmem %s2853_s1, %s1669_s19  ;;  %s2394_s26 = scalar_lea.vmem %s2852_s0, %s1668_s23 }
  0x11   : > { %v317_v0 = vld [vmem:[%s2296_s22 + $0x8] sm:$0xff]  ;;  %v319_v1 = vld [vmem:[%s2296_s22 + $0x18] sm:$0xff]  ;;  %v316_v5 = vld [vmem:[%s2296_s22] sm:$0xff]  ;;  %s1670_s27 = sshll.u32 %s2862_s15, 4  ;;  %s1664_s5 = sshll.u32 %s2862_s15, 1 }
  0x12   : > { %v573_v2 = vld [vmem:[%s2296_s22 + $0x808] sm:$0xff]  ;;  %v1671_v3 = vpack.c.bf16 %v319_v1, %v317_v0  ;;  %v575_v4 = vld [vmem:[%s2296_s22 + $0x818] sm:$0xff]  ;;  %v318_v6 = vld [vmem:[%s2296_s22 + $0x10] sm:$0xff]  ;;  %s280_s30 = scalar_lea.vmem %s2854_s2, %s1670_s27  ;;  %s289_s8 = scalar_lea.vmem %s2855_s3, %s1664_s5 }
  0x13   : > { %v1927_v7 = vpack.c.bf16 %v575_v4, %v573_v2  ;;  %v1673_v8 = vpack.c.bf16 %v318_v6, %v316_v5  ;;  %v572_v9 = vld [vmem:[%s2296_s22 + $0x800] sm:$0xff]  ;;  %v574_v10 = vld [vmem:[%s2296_s22 + $0x810] sm:$0xff]  ;;  %v321_v11 = vld [vmem:[%s2296_s22 + $0x28] sm:$0xff]  ;;  %s298_s11 = scalar_lea.vmem %s2856_s4, %s1664_s5 }
  0x14   : > { %1672 = vmatprep.subr.bf16.mxu1 %v1671_v3  ;;  %v1929_v12 = vpack.c.bf16 %v574_v10, %v572_v9  ;;  %v323_v13 = vld [vmem:[%s2296_s22 + $0x38] sm:$0xff]  ;;  %v577_v14 = vld [vmem:[%s2296_s22 + $0x828] sm:$0xff]  ;;  %v320_v18 = vld [vmem:[%s2296_s22 + $0x20] sm:$0xff] }
  0x15   : > { %v579_v15 = vld [vmem:[%s2296_s22 + $0x838] sm:$0xff]  ;;  %1928 = vmatprep.subr.bf16.mxu0 %v1927_v7  ;;  %1674 = vmatpush1.bf16.msra.mxu1 %v1673_v8  ;;  %v1675_v16 = vpack.c.bf16 %v323_v13, %v321_v11  ;;  %v322_v19 = vld [vmem:[%s2296_s22 + $0x30] sm:$0xff]  ;;  %v576_v20 = vld [vmem:[%s2296_s22 + $0x820] sm:$0xff] }
  0x16   : > { %v1931_v17 = vpack.c.bf16 %v579_v15, %v577_v14  ;;  %1930 = vmatpush1.bf16.msra.mxu0 %v1929_v12  ;;  %v1677_v21 = vpack.c.bf16 %v322_v19, %v320_v18  ;;  %v578_v22 = vld [vmem:[%s2296_s22 + $0x830] sm:$0xff]  ;;  %v325_v23 = vld [vmem:[%s2296_s22 + $0x48] sm:$0xff]  ;;  %v327_v24 = vld [vmem:[%s2296_s22 + $0x58] sm:$0xff] }
  0x17   : > { %1676 = vmatprep.subr.bf16.mxu1 %v1675_v16  ;;  %v1933_v25 = vpack.c.bf16 %v578_v22, %v576_v20  ;;  %v1679_v26 = vpack.c.bf16 %v327_v24, %v325_v23  ;;  %v581_v27 = vld [vmem:[%s2296_s22 + $0x848] sm:$0xff]  ;;  %v583_v28 = vld [vmem:[%s2296_s22 + $0x858] sm:$0xff]  ;;  %v324_v29 = vld [vmem:[%s2296_s22 + $0x40] sm:$0xff] }
  0x18   : > { %1932 = vmatprep.subr.bf16.mxu0 %v1931_v17  ;;  %v1935_v30 = vpack.c.bf16 %v583_v28, %v581_v27  ;;  %v326_v31 = vld [vmem:[%s2296_s22 + $0x50] sm:$0xff]  ;;  %v580_v32 = vld [vmem:[%s2296_s22 + $0x840] sm:$0xff]  ;;  %v329_v35 = vld [vmem:[%s2296_s22 + $0x68] sm:$0xff] }
  0x19   : > { %v582_v33 = vld [vmem:[%s2296_s22 + $0x850] sm:$0xff]  ;;  %1678 = vmatpush1.bf16.msra.mxu1 %v1677_v21  ;;  %v1681_v34 = vpack.c.bf16 %v326_v31, %v324_v29  ;;  %v331_v36 = vld [vmem:[%s2296_s22 + $0x78] sm:$0xff]  ;;  %v585_v37 = vld [vmem:[%s2296_s22 + $0x868] sm:$0xff] }
  0x1a   : > { %1934 = vmatpush1.bf16.msra.mxu0 %v1933_v25  ;;  %1680 = vmatprep.subr.bf16.mxu1 %v1679_v26  ;;  %v1937_v38 = vpack.c.bf16 %v582_v33, %v580_v32  ;;  %v1683_v39 = vpack.c.bf16 %v331_v36, %v329_v35  ;;  %v587_v40 = vld [vmem:[%s2296_s22 + $0x878] sm:$0xff]  ;;  %v328_v41 = vld [vmem:[%s2296_s22 + $0x60] sm:$0xff]  ;;  %v330_v42 = vld [vmem:[%s2296_s22 + $0x70] sm:$0xff] }
  0x1b   : > { %1936 = vmatprep.subr.bf16.mxu0 %v1935_v30  ;;  %v1939_v43 = vpack.c.bf16 %v587_v40, %v585_v37  ;;  %v584_v44 = vld [vmem:[%s2296_s22 + $0x860] sm:$0xff]  ;;  %v586_v45 = vld [vmem:[%s2296_s22 + $0x870] sm:$0xff]  ;;  %v333_v46 = vld [vmem:[%s2296_s22 + $0x88] sm:$0xff]  ;;  %v1685_v50 = vpack.c.bf16 %v330_v42, %v328_v41 }
  0x1c   : > { %v335_v47 = vld [vmem:[%s2296_s22 + $0x98] sm:$0xff]  ;;  %v589_v48 = vld [vmem:[%s2296_s22 + $0x888] sm:$0xff]  ;;  %v1941_v51 = vpack.c.bf16 %v586_v45, %v584_v44  ;;  %v332_v53 = vld [vmem:[%s2296_s22 + $0x80] sm:$0xff] }
  0x1d   : > { %v591_v49 = vld [vmem:[%s2296_s22 + $0x898] sm:$0xff]  ;;  %1682 = vmatpush1.bf16.msra.mxu1 %v1681_v34  ;;  %v1687_v52 = vpack.c.bf16 %v335_v47, %v333_v46  ;;  %v334_v54 = vld [vmem:[%s2296_s22 + $0x90] sm:$0xff]  ;;  %v588_v55 = vld [vmem:[%s2296_s22 + $0x880] sm:$0xff] }
  0x1e   : > { %1938 = vmatpush1.bf16.msra.mxu0 %v1937_v38  ;;  %1684 = vmatprep.subr.bf16.mxu1 %v1683_v39  ;;  %v1943_v56 = vpack.c.bf16 %v591_v49, %v589_v48  ;;  %v590_v57 = vld [vmem:[%s2296_s22 + $0x890] sm:$0xff]  ;;  %v337_v58 = vld [vmem:[%s2296_s22 + $0xa8] sm:$0xff]  ;;  %v339_v59 = vld [vmem:[%s2296_s22 + $0xb8] sm:$0xff]  ;;  %v1689_v62 = vpack.c.bf16 %v334_v54, %v332_v53 }
  0x1f   : > { %1940 = vmatprep.subr.bf16.mxu0 %v1939_v43  ;;  %v593_v60 = vld [vmem:[%s2296_s22 + $0x8a8] sm:$0xff]  ;;  %v595_v61 = vld [vmem:[%s2296_s22 + $0x8b8] sm:$0xff]  ;;  %v1945_v63 = vpack.c.bf16 %v590_v57, %v588_v55  ;;  %v1691_v0 = vpack.c.bf16 %v339_v59, %v337_v58  ;;  %v336_v1 = vld [vmem:[%s2296_s22 + $0xa0] sm:$0xff] }
  0x20   : > { %v338_v2 = vld [vmem:[%s2296_s22 + $0xb0] sm:$0xff]  ;;  %v592_v3 = vld [vmem:[%s2296_s22 + $0x8a0] sm:$0xff]  ;;  %v1947_v4 = vpack.c.bf16 %v595_v61, %v593_v60  ;;  %v341_v6 = vld [vmem:[%s2296_s22 + $0xc8] sm:$0xff] }
  0x21   : > { %1686 = vmatpush1.bf16.msra.mxu1 %v1685_v50  ;;  %v594_v5 = vld [vmem:[%s2296_s22 + $0x8b0] sm:$0xff]  ;;  %v343_v7 = vld [vmem:[%s2296_s22 + $0xd8] sm:$0xff]  ;;  %v597_v8 = vld [vmem:[%s2296_s22 + $0x8c8] sm:$0xff]  ;;  %v1693_v10 = vpack.c.bf16 %v338_v2, %v336_v1 }
  0x22   : > { %1942 = vmatpush1.bf16.msra.mxu0 %v1941_v51  ;;  %1688 = vmatprep.subr.bf16.mxu1 %v1687_v52  ;;  %v599_v9 = vld [vmem:[%s2296_s22 + $0x8d8] sm:$0xff]  ;;  %v1949_v11 = vpack.c.bf16 %v594_v5, %v592_v3  ;;  %v1695_v12 = vpack.c.bf16 %v343_v7, %v341_v6  ;;  %v340_v13 = vld [vmem:[%s2296_s22 + $0xc0] sm:$0xff]  ;;  %v342_v14 = vld [vmem:[%s2296_s22 + $0xd0] sm:$0xff] }
  0x23   : > { %1944 = vmatprep.subr.bf16.mxu0 %v1943_v56  ;;  %v596_v15 = vld [vmem:[%s2296_s22 + $0x8c0] sm:$0xff]  ;;  %v1951_v16 = vpack.c.bf16 %v599_v9, %v597_v8  ;;  %v598_v17 = vld [vmem:[%s2296_s22 + $0x8d0] sm:$0xff]  ;;  %v345_v18 = vld [vmem:[%s2296_s22 + $0xe8] sm:$0xff]  ;;  %v1697_v22 = vpack.c.bf16 %v342_v14, %v340_v13 }
  0x24   : > { %v347_v19 = vld [vmem:[%s2296_s22 + $0xf8] sm:$0xff]  ;;  %v601_v20 = vld [vmem:[%s2296_s22 + $0x8e8] sm:$0xff]  ;;  %v1953_v23 = vpack.c.bf16 %v598_v17, %v596_v15  ;;  %v344_v25 = vld [vmem:[%s2296_s22 + $0xe0] sm:$0xff] }
  0x25   : > { %1690 = vmatpush1.bf16.msra.mxu1 %v1689_v62  ;;  %v603_v21 = vld [vmem:[%s2296_s22 + $0x8f8] sm:$0xff]  ;;  %v1699_v24 = vpack.c.bf16 %v347_v19, %v345_v18  ;;  %v346_v26 = vld [vmem:[%s2296_s22 + $0xf0] sm:$0xff]  ;;  %v600_v27 = vld [vmem:[%s2296_s22 + $0x8e0] sm:$0xff] }
  0x26   : > { %1946 = vmatpush1.bf16.msra.mxu0 %v1945_v63  ;;  %1692 = vmatprep.subr.bf16.mxu1 %v1691_v0  ;;  %v1955_v28 = vpack.c.bf16 %v603_v21, %v601_v20  ;;  %v602_v29 = vld [vmem:[%s2296_s22 + $0x8f0] sm:$0xff]  ;;  %v349_v30 = vld [vmem:[%s2296_s22 + $0x108] sm:$0xff]  ;;  %v351_v31 = vld [vmem:[%s2296_s22 + $0x118] sm:$0xff]  ;;  %v1701_v34 = vpack.c.bf16 %v346_v26, %v344_v25 }
  0x27   : > { %1948 = vmatprep.subr.bf16.mxu0 %v1947_v4  ;;  %v605_v32 = vld [vmem:[%s2296_s22 + $0x908] sm:$0xff]  ;;  %v607_v33 = vld [vmem:[%s2296_s22 + $0x918] sm:$0xff]  ;;  %v1957_v35 = vpack.c.bf16 %v602_v29, %v600_v27  ;;  %v1703_v36 = vpack.c.bf16 %v351_v31, %v349_v30  ;;  %v348_v37 = vld [vmem:[%s2296_s22 + $0x100] sm:$0xff] }
  0x28   : > { %v350_v38 = vld [vmem:[%s2296_s22 + $0x110] sm:$0xff]  ;;  %v604_v39 = vld [vmem:[%s2296_s22 + $0x900] sm:$0xff]  ;;  %v1959_v40 = vpack.c.bf16 %v607_v33, %v605_v32  ;;  %v353_v42 = vld [vmem:[%s2296_s22 + $0x128] sm:$0xff] }
  0x29   : > { %1694 = vmatpush1.bf16.msra.mxu1 %v1693_v10  ;;  %v606_v41 = vld [vmem:[%s2296_s22 + $0x910] sm:$0xff]  ;;  %v355_v43 = vld [vmem:[%s2296_s22 + $0x138] sm:$0xff]  ;;  %v609_v44 = vld [vmem:[%s2296_s22 + $0x928] sm:$0xff]  ;;  %v1705_v46 = vpack.c.bf16 %v350_v38, %v348_v37 }
  0x2a   : > { %1950 = vmatpush1.bf16.msra.mxu0 %v1949_v11  ;;  %1696 = vmatprep.subr.bf16.mxu1 %v1695_v12  ;;  %v611_v45 = vld [vmem:[%s2296_s22 + $0x938] sm:$0xff]  ;;  %v1961_v47 = vpack.c.bf16 %v606_v41, %v604_v39  ;;  %v1707_v48 = vpack.c.bf16 %v355_v43, %v353_v42  ;;  %v352_v49 = vld [vmem:[%s2296_s22 + $0x120] sm:$0xff]  ;;  %v354_v50 = vld [vmem:[%s2296_s22 + $0x130] sm:$0xff] }
  0x2b   : > { %1952 = vmatprep.subr.bf16.mxu0 %v1951_v16  ;;  %v608_v51 = vld [vmem:[%s2296_s22 + $0x920] sm:$0xff]  ;;  %v1963_v52 = vpack.c.bf16 %v611_v45, %v609_v44  ;;  %v610_v53 = vld [vmem:[%s2296_s22 + $0x930] sm:$0xff]  ;;  %v357_v54 = vld [vmem:[%s2296_s22 + $0x148] sm:$0xff]  ;;  %v1709_v58 = vpack.c.bf16 %v354_v50, %v352_v49 }
  0x2c   : > { %v359_v55 = vld [vmem:[%s2296_s22 + $0x158] sm:$0xff]  ;;  %v613_v56 = vld [vmem:[%s2296_s22 + $0x948] sm:$0xff]  ;;  %v1965_v59 = vpack.c.bf16 %v610_v53, %v608_v51  ;;  %v356_v61 = vld [vmem:[%s2296_s22 + $0x140] sm:$0xff] }
  0x2d   : > { %1698 = vmatpush1.bf16.msra.mxu1 %v1697_v22  ;;  %v615_v57 = vld [vmem:[%s2296_s22 + $0x958] sm:$0xff]  ;;  %v1711_v60 = vpack.c.bf16 %v359_v55, %v357_v54  ;;  %v358_v62 = vld [vmem:[%s2296_s22 + $0x150] sm:$0xff]  ;;  %v612_v63 = vld [vmem:[%s2296_s22 + $0x940] sm:$0xff] }
  0x2e   : > { %1954 = vmatpush1.bf16.msra.mxu0 %v1953_v23  ;;  %1700 = vmatprep.subr.bf16.mxu1 %v1699_v24  ;;  %v1967_v0 = vpack.c.bf16 %v615_v57, %v613_v56  ;;  %v614_v1 = vld [vmem:[%s2296_s22 + $0x950] sm:$0xff]  ;;  %v361_v2 = vld [vmem:[%s2296_s22 + $0x168] sm:$0xff]  ;;  %v363_v3 = vld [vmem:[%s2296_s22 + $0x178] sm:$0xff]  ;;  %v1713_v6 = vpack.c.bf16 %v358_v62, %v356_v61 }
  0x2f   : > { %1956 = vmatprep.subr.bf16.mxu0 %v1955_v28  ;;  %v617_v4 = vld [vmem:[%s2296_s22 + $0x968] sm:$0xff]  ;;  %v619_v5 = vld [vmem:[%s2296_s22 + $0x978] sm:$0xff]  ;;  %v360_v7 = vld [vmem:[%s2296_s22 + $0x160] sm:$0xff]  ;;  %v1969_v8 = vpack.c.bf16 %v614_v1, %v612_v63  ;;  %v1715_v9 = vpack.c.bf16 %v363_v3, %v361_v2 }
  0x30   : > { %v362_v10 = vld [vmem:[%s2296_s22 + $0x170] sm:$0xff]  ;;  %v616_v11 = vld [vmem:[%s2296_s22 + $0x960] sm:$0xff]  ;;  %v1971_v13 = vpack.c.bf16 %v619_v5, %v617_v4  ;;  %v365_v14 = vld [vmem:[%s2296_s22 + $0x188] sm:$0xff] }
  0x31   : > { %1702 = vmatpush1.bf16.msra.mxu1 %v1701_v34  ;;  %v618_v12 = vld [vmem:[%s2296_s22 + $0x970] sm:$0xff]  ;;  %v367_v15 = vld [vmem:[%s2296_s22 + $0x198] sm:$0xff]  ;;  %v301_v16 = vld [vmem:[%s2394_s26 + $0x8] sm:$0xff]  ;;  %v1717_v20 = vpack.c.bf16 %v362_v10, %v360_v7 }
  0x32   : > { %1958 = vmatpush1.bf16.msra.mxu0 %v1957_v35  ;;  %1704 = vmatprep.subr.bf16.mxu1 %v1703_v36  ;;  %v621_v17 = vld [vmem:[%s2296_s22 + $0x988] sm:$0xff]  ;;  %v623_v18 = vld [vmem:[%s2296_s22 + $0x998] sm:$0xff]  ;;  %v1973_v21 = vpack.c.bf16 %v618_v12, %v616_v11  ;;  %v1719_v22 = vpack.c.bf16 %v367_v15, %v365_v14  ;;  %v364_v23 = vld [vmem:[%s2296_s22 + $0x180] sm:$0xff] }
  0x33   : > { %1960 = vmatprep.subr.bf16.mxu0 %v1959_v40  ;;  %892 = vmatprep.mubr.f32.mxu1 %v301_v16  ;;  %v309_v19 = vld [vmem:[%s2394_s26 + $0x48] sm:$0xff]  ;;  %v366_v24 = vld [vmem:[%s2296_s22 + $0x190] sm:$0xff]  ;;  %v620_v25 = vld [vmem:[%s2296_s22 + $0x980] sm:$0xff]  ;;  %v1975_v26 = vpack.c.bf16 %v623_v18, %v621_v17 }
  0x34   : > { %1176 = vmatprep.mubr.f32.mxu0 %v309_v19  ;;  %v622_v27 = vld [vmem:[%s2296_s22 + $0x990] sm:$0xff]  ;;  %v369_v28 = vld [vmem:[%s2296_s22 + $0x1a8] sm:$0xff]  ;;  %v371_v29 = vld [vmem:[%s2296_s22 + $0x1b8] sm:$0xff]  ;;  %v1721_v32 = vpack.c.bf16 %v366_v24, %v364_v23 }
  0x35   : > { %1706 = vmatpush1.bf16.msra.mxu1 %v1705_v46  ;;  %v625_v30 = vld [vmem:[%s2296_s22 + $0x9a8] sm:$0xff]  ;;  %v627_v31 = vld [vmem:[%s2296_s22 + $0x9b8] sm:$0xff]  ;;  %v1977_v33 = vpack.c.bf16 %v622_v27, %v620_v25  ;;  %v1723_v34 = vpack.c.bf16 %v371_v29, %v369_v28  ;;  %v368_v35 = vld [vmem:[%s2296_s22 + $0x1a0] sm:$0xff] }
  0x36   : > { %1962 = vmatpush1.bf16.msra.mxu0 %v1961_v47  ;;  %1708 = vmatprep.subr.bf16.mxu1 %v1707_v48  ;;  %v370_v36 = vld [vmem:[%s2296_s22 + $0x1b0] sm:$0xff]  ;;  %v624_v37 = vld [vmem:[%s2296_s22 + $0x9a0] sm:$0xff]  ;;  %v1979_v38 = vpack.c.bf16 %v627_v31, %v625_v30  ;;  %v373_v40 = vld [vmem:[%s2296_s22 + $0x1c8] sm:$0xff] }
  0x37   : > { %1964 = vmatprep.subr.bf16.mxu0 %v1963_v52  ;;  %v626_v39 = vld [vmem:[%s2296_s22 + $0x9b0] sm:$0xff]  ;;  %v375_v41 = vld [vmem:[%s2296_s22 + $0x1d8] sm:$0xff]  ;;  %v629_v42 = vld [vmem:[%s2296_s22 + $0x9c8] sm:$0xff]  ;;  %v1725_v44 = vpack.c.bf16 %v370_v36, %v368_v35 }
  0x38   : > { %v631_v43 = vld [vmem:[%s2296_s22 + $0x9d8] sm:$0xff]  ;;  %v1981_v45 = vpack.c.bf16 %v626_v39, %v624_v37  ;;  %v1727_v46 = vpack.c.bf16 %v375_v41, %v373_v40  ;;  %v372_v47 = vld [vmem:[%s2296_s22 + $0x1c0] sm:$0xff]  ;;  %v374_v48 = vld [vmem:[%s2296_s22 + $0x1d0] sm:$0xff] }
  0x39   : > { %1710 = vmatpush1.bf16.msra.mxu1 %v1709_v58  ;;  %v628_v49 = vld [vmem:[%s2296_s22 + $0x9c0] sm:$0xff]  ;;  %v1983_v50 = vpack.c.bf16 %v631_v43, %v629_v42  ;;  %v630_v51 = vld [vmem:[%s2296_s22 + $0x9d0] sm:$0xff]  ;;  %v377_v52 = vld [vmem:[%s2296_s22 + $0x1e8] sm:$0xff]  ;;  %v1729_v56 = vpack.c.bf16 %v374_v48, %v372_v47 }
  0x3a   : > { %1966 = vmatpush1.bf16.msra.mxu0 %v1965_v59  ;;  %1712 = vmatprep.subr.bf16.mxu1 %v1711_v60  ;;  %v379_v53 = vld [vmem:[%s2296_s22 + $0x1f8] sm:$0xff]  ;;  %v633_v54 = vld [vmem:[%s2296_s22 + $0x9e8] sm:$0xff]  ;;  %v1985_v57 = vpack.c.bf16 %v630_v51, %v628_v49  ;;  %v376_v59 = vld [vmem:[%s2296_s22 + $0x1e0] sm:$0xff] }
  0x3b   : > { %1968 = vmatprep.subr.bf16.mxu0 %v1967_v0  ;;  %v635_v55 = vld [vmem:[%s2296_s22 + $0x9f8] sm:$0xff]  ;;  %v1731_v58 = vpack.c.bf16 %v379_v53, %v377_v52  ;;  %v378_v60 = vld [vmem:[%s2296_s22 + $0x1f0] sm:$0xff]  ;;  %v632_v61 = vld [vmem:[%s2296_s22 + $0x9e0] sm:$0xff] }
  0x3c   : > { %v1987_v62 = vpack.c.bf16 %v635_v55, %v633_v54  ;;  %v634_v63 = vld [vmem:[%s2296_s22 + $0x9f0] sm:$0xff]  ;;  %v381_v0 = vld [vmem:[%s2296_s22 + $0x208] sm:$0xff]  ;;  %v383_v1 = vld [vmem:[%s2296_s22 + $0x218] sm:$0xff]  ;;  %v1733_v4 = vpack.c.bf16 %v378_v60, %v376_v59 }
  0x3d   : > { %1714 = vmatpush1.bf16.msra.mxu1 %v1713_v6  ;;  %v637_v2 = vld [vmem:[%s2296_s22 + $0xa08] sm:$0xff]  ;;  %v639_v3 = vld [vmem:[%s2296_s22 + $0xa18] sm:$0xff]  ;;  %v1989_v5 = vpack.c.bf16 %v634_v63, %v632_v61  ;;  %v1735_v6 = vpack.c.bf16 %v383_v1, %v381_v0  ;;  %v380_v7 = vld [vmem:[%s2296_s22 + $0x200] sm:$0xff] }
  0x3e   : > { %1970 = vmatpush1.bf16.msra.mxu0 %v1969_v8  ;;  %1716 = vmatprep.subr.bf16.mxu1 %v1715_v9  ;;  %v382_v8 = vld [vmem:[%s2296_s22 + $0x210] sm:$0xff]  ;;  %v636_v9 = vld [vmem:[%s2296_s22 + $0xa00] sm:$0xff]  ;;  %v1991_v10 = vpack.c.bf16 %v639_v3, %v637_v2  ;;  %v385_v12 = vld [vmem:[%s2296_s22 + $0x228] sm:$0xff] }
  0x3f   : > { %1972 = vmatprep.subr.bf16.mxu0 %v1971_v13  ;;  %v638_v11 = vld [vmem:[%s2296_s22 + $0xa10] sm:$0xff]  ;;  %v387_v13 = vld [vmem:[%s2296_s22 + $0x238] sm:$0xff]  ;;  %v641_v14 = vld [vmem:[%s2296_s22 + $0xa28] sm:$0xff]  ;;  %v1737_v17 = vpack.c.bf16 %v382_v8, %v380_v7 }
  0x40   : > { %v643_v15 = vld [vmem:[%s2296_s22 + $0xa38] sm:$0xff]  ;;  %v300_v16 = vld [vmem:[%s2394_s26] sm:$0xff]  ;;  %v1993_v19 = vpack.c.bf16 %v638_v11, %v636_v9  ;;  %v642_v25 = vld [vmem:[%s2296_s22 + $0xa30] sm:$0xff] }
  0x41   : > { %1718 = vmatpush1.bf16.msra.mxu1 %v1717_v20  ;;  %v308_v18 = vld [vmem:[%s2394_s26 + $0x40] sm:$0xff]  ;;  %v1739_v20 = vpack.c.bf16 %v387_v13, %v385_v12  ;;  %v1995_v24 = vpack.c.bf16 %v643_v15, %v641_v14  ;;  %v391_v27 = vld [vmem:[%s2296_s22 + $0x258] sm:$0xff]  ;;  %v645_v28 = vld [vmem:[%s2296_s22 + $0xa48] sm:$0xff] }
  0x42   : > { %1974 = vmatpush1.bf16.msra.mxu0 %v1973_v21  ;;  %1720 = vmatprep.subr.bf16.mxu1 %v1719_v22  ;;  %v384_v21 = vld [vmem:[%s2296_s22 + $0x220] sm:$0xff]  ;;  %v386_v22 = vld [vmem:[%s2296_s22 + $0x230] sm:$0xff]  ;;  %v647_v29 = vld [vmem:[%s2296_s22 + $0xa58] sm:$0xff] }
  0x43   : > { %1976 = vmatprep.subr.bf16.mxu0 %v1975_v26  ;;  %v640_v23 = vld [vmem:[%s2296_s22 + $0xa20] sm:$0xff]  ;;  %v389_v26 = vld [vmem:[%s2296_s22 + $0x248] sm:$0xff]  ;;  %v1741_v30 = vpack.c.bf16 %v386_v22, %v384_v21  ;;  %v1999_v36 = vpack.c.bf16 %v647_v29, %v645_v28  ;;  %v646_v37 = vld [vmem:[%s2296_s22 + $0xa50] sm:$0xff] }
  0x44   : > { %v1997_v31 = vpack.c.bf16 %v642_v25, %v640_v23  ;;  %v644_v35 = vld [vmem:[%s2296_s22 + $0xa40] sm:$0xff]  ;;  %v395_v39 = vld [vmem:[%s2296_s22 + $0x278] sm:$0xff]  ;;  %v649_v40 = vld [vmem:[%s2296_s22 + $0xa68] sm:$0xff] }
  0x45   : > { %1722 = vmatpush1.bf16.msra.mxu1 %v1721_v32  ;;  %v1743_v32 = vpack.c.bf16 %v391_v27, %v389_v26  ;;  %v651_v41 = vld [vmem:[%s2296_s22 + $0xa78] sm:$0xff]  ;;  %v2001_v43 = vpack.c.bf16 %v646_v37, %v644_v35  ;;  %v648_v47 = vld [vmem:[%s2296_s22 + $0xa60] sm:$0xff]  ;;  %v650_v49 = vld [vmem:[%s2296_s22 + $0xa70] sm:$0xff] }
  0x46   : > { %1978 = vmatpush1.bf16.msra.mxu0 %v1977_v33  ;;  %1724 = vmatprep.subr.bf16.mxu1 %v1723_v34  ;;  %v388_v33 = vld [vmem:[%s2296_s22 + $0x240] sm:$0xff]  ;;  %v390_v34 = vld [vmem:[%s2296_s22 + $0x250] sm:$0xff]  ;;  %v2003_v48 = vpack.c.bf16 %v651_v41, %v649_v40  ;;  %v399_v51 = vld [vmem:[%s2296_s22 + $0x298] sm:$0xff]  ;;  %v2005_v55 = vpack.c.bf16 %v650_v49, %v648_v47 }
  0x47   : > { %1980 = vmatprep.subr.bf16.mxu0 %v1979_v38  ;;  %v393_v38 = vld [vmem:[%s2296_s22 + $0x268] sm:$0xff]  ;;  %v1745_v42 = vpack.c.bf16 %v390_v34, %v388_v33  ;;  %v655_v53 = vld [vmem:[%s2296_s22 + $0xa98] sm:$0xff]  ;;  %v652_v59 = vld [vmem:[%s2296_s22 + $0xa80] sm:$0xff] }
  0x48   : > { %v653_v52 = vld [vmem:[%s2296_s22 + $0xa88] sm:$0xff]  ;;  %v654_v61 = vld [vmem:[%s2296_s22 + $0xa90] sm:$0xff]  ;;  %v403_v63 = vld [vmem:[%s2296_s22 + $0x2b8] sm:$0xff] }
  0x49   : > { %1726 = vmatpush1.bf16.msra.mxu1 %v1725_v44  ;;  %v1747_v44 = vpack.c.bf16 %v395_v39, %v393_v38  ;;  %v2007_v60 = vpack.c.bf16 %v655_v53, %v653_v52  ;;  %v657_v0 = vld [vmem:[%s2296_s22 + $0xaa8] sm:$0xff]  ;;  %v659_v1 = vld [vmem:[%s2296_s22 + $0xab8] sm:$0xff]  ;;  %v2009_v3 = vpack.c.bf16 %v654_v61, %v652_v59  ;;  %v656_v7 = vld [vmem:[%s2296_s22 + $0xaa0] sm:$0xff] }
  0x4a   : > { %1982 = vmatpush1.bf16.msra.mxu0 %v1981_v45  ;;  %1728 = vmatprep.subr.bf16.mxu1 %v1727_v46  ;;  %v392_v45 = vld [vmem:[%s2296_s22 + $0x260] sm:$0xff]  ;;  %v394_v46 = vld [vmem:[%s2296_s22 + $0x270] sm:$0xff]  ;;  %v2011_v8 = vpack.c.bf16 %v659_v1, %v657_v0  ;;  %v407_v11 = vld [vmem:[%s2296_s22 + $0x2d8] sm:$0xff] }
  0x4b   : > { %1984 = vmatprep.subr.bf16.mxu0 %v1983_v50  ;;  %v397_v50 = vld [vmem:[%s2296_s22 + $0x288] sm:$0xff]  ;;  %v1749_v54 = vpack.c.bf16 %v394_v46, %v392_v45  ;;  %v658_v9 = vld [vmem:[%s2296_s22 + $0xab0] sm:$0xff]  ;;  %v663_v13 = vld [vmem:[%s2296_s22 + $0xad8] sm:$0xff] }
  0x4c   : > { %v661_v12 = vld [vmem:[%s2296_s22 + $0xac8] sm:$0xff]  ;;  %v404_v15 = vld [vmem:[%s2296_s22 + $0x2c0] sm:$0xff]  ;;  %v411_v23 = vld [vmem:[%s2296_s22 + $0x2f8] sm:$0xff] }
  0x4d   : > { %1730 = vmatpush1.bf16.msra.mxu1 %v1729_v56  ;;  %v1751_v56 = vpack.c.bf16 %v399_v51, %v397_v50  ;;  %v2015_v21 = vpack.c.bf16 %v663_v13, %v661_v12  ;;  %v409_v22 = vld [vmem:[%s2296_s22 + $0x2e8] sm:$0xff]  ;;  %v667_v26 = vld [vmem:[%s2296_s22 + $0xaf8] sm:$0xff]  ;;  %v664_v33 = vld [vmem:[%s2296_s22 + $0xae0] sm:$0xff] }
  0x4e   : > { %1986 = vmatpush1.bf16.msra.mxu0 %v1985_v57  ;;  %1732 = vmatprep.subr.bf16.mxu1 %v1731_v58  ;;  %v396_v57 = vld [vmem:[%s2296_s22 + $0x280] sm:$0xff]  ;;  %v398_v58 = vld [vmem:[%s2296_s22 + $0x290] sm:$0xff]  ;;  %v665_v25 = vld [vmem:[%s2296_s22 + $0xae8] sm:$0xff] }
  0x4f   : > { %1988 = vmatprep.subr.bf16.mxu0 %v1987_v62  ;;  %v401_v62 = vld [vmem:[%s2296_s22 + $0x2a8] sm:$0xff]  ;;  %v1753_v2 = vpack.c.bf16 %v398_v58, %v396_v57  ;;  %v311_v27 = vld [vmem:[%s2394_s26 + $0x58] sm:$0xff]  ;;  %v2019_v34 = vpack.c.bf16 %v667_v26, %v665_v25  ;;  %v666_v35 = vld [vmem:[%s2296_s22 + $0xaf0] sm:$0xff] }
  0x50   : > { %v415_v37 = vld [vmem:[%s2296_s22 + $0x318] sm:$0xff]  ;;  %v669_v38 = vld [vmem:[%s2296_s22 + $0xb08] sm:$0xff]  ;;  %v2021_v41 = vpack.c.bf16 %v666_v35, %v664_v33  ;;  %v668_v45 = vld [vmem:[%s2296_s22 + $0xb00] sm:$0xff] }
  0x51   : > { %1734 = vmatpush1.bf16.msra.mxu1 %v1733_v4  ;;  %v1755_v4 = vpack.c.bf16 %v403_v63, %v401_v62  ;;  %v671_v39 = vld [vmem:[%s2296_s22 + $0xb18] sm:$0xff]  ;;  %v670_v47 = vld [vmem:[%s2296_s22 + $0xb10] sm:$0xff]  ;;  %v673_v50 = vld [vmem:[%s2296_s22 + $0xb28] sm:$0xff] }
  0x52   : > { %1990 = vmatpush1.bf16.msra.mxu0 %v1989_v5  ;;  %1736 = vmatprep.subr.bf16.mxu1 %v1735_v6  ;;  %v400_v5 = vld [vmem:[%s2296_s22 + $0x2a0] sm:$0xff]  ;;  %v402_v6 = vld [vmem:[%s2296_s22 + $0x2b0] sm:$0xff]  ;;  %v2023_v46 = vpack.c.bf16 %v671_v39, %v669_v38  ;;  %v419_v49 = vld [vmem:[%s2296_s22 + $0x338] sm:$0xff]  ;;  %v2025_v53 = vpack.c.bf16 %v670_v47, %v668_v45 }
  0x53   : > { %1992 = vmatprep.subr.bf16.mxu0 %v1991_v10  ;;  %v405_v10 = vld [vmem:[%s2296_s22 + $0x2c8] sm:$0xff]  ;;  %v1757_v14 = vpack.c.bf16 %v402_v6, %v400_v5  ;;  %v675_v51 = vld [vmem:[%s2296_s22 + $0xb38] sm:$0xff]  ;;  %v672_v57 = vld [vmem:[%s2296_s22 + $0xb20] sm:$0xff] }
  0x54   : > { %893 = vmatmul.mubr.f32.vlgmr.msra.gmra.mrb[0].mxu1 %v300_v16  ;;  %v2013_v16 = vpack.c.bf16 %v658_v9, %v656_v7  ;;  %v2027_v58 = vpack.c.bf16 %v675_v51, %v673_v50  ;;  %v674_v59 = vld [vmem:[%s2296_s22 + $0xb30] sm:$0xff]  ;;  %v423_v61 = vld [vmem:[%s2296_s22 + $0x358] sm:$0xff]  ;;  %v677_v62 = vld [vmem:[%s2296_s22 + $0xb48] sm:$0xff] }
  0x55   : > { %1738 = vmatpush1.bf16.msra.mxu1 %v1737_v17  ;;  %1177 = vmatmul.mubr.f32.vlgmr.msra.gmra.mrb[0].mxu0 %v308_v18  ;;  %v1759_v17 = vpack.c.bf16 %v407_v11, %v405_v10  ;;  %v406_v18 = vld [vmem:[%s2296_s22 + $0x2d0] sm:$0xff]  ;;  %v679_v63 = vld [vmem:[%s2296_s22 + $0xb58] sm:$0xff]  ;;  %v2029_v1 = vpack.c.bf16 %v674_v59, %v672_v57  ;;  %v676_v5 = vld [vmem:[%s2296_s22 + $0xb40] sm:$0xff] }
  0x56   : > { %1994 = vmatpush1.bf16.msra.mxu0 %v1993_v19  ;;  %1740 = vmatprep.subr.bf16.mxu1 %v1739_v20  ;;  %v660_v19 = vld [vmem:[%s2296_s22 + $0xac0] sm:$0xff]  ;;  %v662_v20 = vld [vmem:[%s2296_s22 + $0xad0] sm:$0xff]  ;;  %v1761_v28 = vpack.c.bf16 %v406_v18, %v404_v15  ;;  %v2031_v6 = vpack.c.bf16 %v679_v63, %v677_v62  ;;  %v427_v9 = vld [vmem:[%s2296_s22 + $0x378] sm:$0xff] }
  0x57   : > { %1996 = vmatprep.subr.bf16.mxu0 %v1995_v24  ;;  %v303_v24 = vld [vmem:[%s2394_s26 + $0x18] sm:$0xff]  ;;  %1247 = vmatprep.mubr.f32.mxu0 %v311_v27  ;;  %v2017_v29 = vpack.c.bf16 %v662_v20, %v660_v19  ;;  %v678_v7 = vld [vmem:[%s2296_s22 + $0xb50] sm:$0xff]  ;;  %v681_v10 = vld [vmem:[%s2296_s22 + $0xb68] sm:$0xff] }
  0x58   : > { %963 = vmatprep.mubr.f32.mxu1 %v303_v24  ;;  %v683_v11 = vld [vmem:[%s2296_s22 + $0xb78] sm:$0xff]  ;;  %v2033_v13 = vpack.c.bf16 %v678_v7, %v676_v5  ;;  %v424_v15 = vld [vmem:[%s2296_s22 + $0x360] sm:$0xff]  ;;  %v682_v19 = vld [vmem:[%s2296_s22 + $0xb70] sm:$0xff] }
  0x59   : > { %1742 = vmatpush1.bf16.msra.mxu1 %v1741_v30  ;;  %v1763_v30 = vpack.c.bf16 %v411_v23, %v409_v22  ;;  %v2035_v18 = vpack.c.bf16 %v683_v11, %v681_v10  ;;  %v429_v20 = vld [vmem:[%s2296_s22 + $0x388] sm:$0xff]  ;;  %v687_v23 = vld [vmem:[%s2296_s22 + $0xb98] sm:$0xff]  ;;  %v428_v27 = vld [vmem:[%s2296_s22 + $0x380] sm:$0xff] }
  0x5a   : > { %1998 = vmatpush1.bf16.msra.mxu0 %v1997_v31  ;;  %1744 = vmatprep.subr.bf16.mxu1 %v1743_v32  ;;  %v408_v31 = vld [vmem:[%s2296_s22 + $0x2e0] sm:$0xff]  ;;  %v410_v32 = vld [vmem:[%s2296_s22 + $0x2f0] sm:$0xff]  ;;  %v685_v22 = vld [vmem:[%s2296_s22 + $0xb88] sm:$0xff] }
  0x5b   : > { %2000 = vmatprep.subr.bf16.mxu0 %v1999_v36  ;;  %v413_v36 = vld [vmem:[%s2296_s22 + $0x308] sm:$0xff]  ;;  %v1765_v40 = vpack.c.bf16 %v410_v32, %v408_v31  ;;  %v686_v31 = vld [vmem:[%s2296_s22 + $0xb90] sm:$0xff]  ;;  %v435_v33 = vld [vmem:[%s2296_s22 + $0x3b8] sm:$0xff] }
  0x5c   : > { %v433_v32 = vld [vmem:[%s2296_s22 + $0x3a8] sm:$0xff]  ;;  %v691_v35 = vld [vmem:[%s2296_s22 + $0xbb8] sm:$0xff]  ;;  %v432_v39 = vld [vmem:[%s2296_s22 + $0x3a0] sm:$0xff] }
  0x5d   : > { %1746 = vmatpush1.bf16.msra.mxu1 %v1745_v42  ;;  %v1767_v42 = vpack.c.bf16 %v415_v37, %v413_v36  ;;  %v1787_v38 = vpack.c.bf16 %v435_v33, %v433_v32  ;;  %v439_v45 = vld [vmem:[%s2296_s22 + $0x3d8] sm:$0xff]  ;;  %v436_v51 = vld [vmem:[%s2296_s22 + $0x3c0] sm:$0xff]  ;;  %v709_v32 = vld [vmem:[%s2296_s22 + $0xc48] sm:$0xff] }
  0x5e   : > { %2002 = vmatpush1.bf16.msra.mxu0 %v2001_v43  ;;  %1748 = vmatprep.subr.bf16.mxu1 %v1747_v44  ;;  %v412_v43 = vld [vmem:[%s2296_s22 + $0x300] sm:$0xff]  ;;  %v414_v44 = vld [vmem:[%s2296_s22 + $0x310] sm:$0xff]  ;;  %v695_v47 = vld [vmem:[%s2296_s22 + $0xbd8] sm:$0xff] }
  0x5f   : > { %2004 = vmatprep.subr.bf16.mxu0 %v2003_v48  ;;  %v417_v48 = vld [vmem:[%s2296_s22 + $0x328] sm:$0xff]  ;;  %v1769_v52 = vpack.c.bf16 %v414_v44, %v412_v43  ;;  %v690_v43 = vld [vmem:[%s2296_s22 + $0xbb0] sm:$0xff]  ;;  %v443_v57 = vld [vmem:[%s2296_s22 + $0x3f8] sm:$0xff] }
  0x60   : > { %v437_v44 = vld [vmem:[%s2296_s22 + $0x3c8] sm:$0xff]  ;;  %v699_v59 = vld [vmem:[%s2296_s22 + $0xbf8] sm:$0xff]  ;;  %v440_v63 = vld [vmem:[%s2296_s22 + $0x3e0] sm:$0xff] }
  0x61   : > { %1750 = vmatpush1.bf16.msra.mxu1 %v1749_v54  ;;  %v1771_v54 = vpack.c.bf16 %v419_v49, %v417_v48  ;;  %v1791_v50 = vpack.c.bf16 %v439_v45, %v437_v44  ;;  %v447_v5 = vld [vmem:[%s2296_s22 + $0x418] sm:$0xff]  ;;  %v444_v11 = vld [vmem:[%s2296_s22 + $0x400] sm:$0xff]  ;;  %v457_v44 = vld [vmem:[%s2296_s22 + $0x468] sm:$0xff] }
  0x62   : > { %2006 = vmatpush1.bf16.msra.mxu0 %v2005_v55  ;;  %1752 = vmatprep.subr.bf16.mxu1 %v1751_v56  ;;  %v416_v55 = vld [vmem:[%s2296_s22 + $0x320] sm:$0xff]  ;;  %v418_v56 = vld [vmem:[%s2296_s22 + $0x330] sm:$0xff]  ;;  %v703_v7 = vld [vmem:[%s2296_s22 + $0xc18] sm:$0xff] }
  0x63   : > { %2008 = vmatprep.subr.bf16.mxu0 %v2007_v60  ;;  %v421_v60 = vld [vmem:[%s2296_s22 + $0x348] sm:$0xff]  ;;  %v1773_v0 = vpack.c.bf16 %v418_v56, %v416_v55  ;;  %v694_v55 = vld [vmem:[%s2296_s22 + $0xbd0] sm:$0xff]  ;;  %v711_v33 = vld [vmem:[%s2296_s22 + $0xc58] sm:$0xff] }
  0x64   : > { %v441_v56 = vld [vmem:[%s2296_s22 + $0x3e8] sm:$0xff]  ;;  %v459_v45 = vld [vmem:[%s2296_s22 + $0x478] sm:$0xff] }
  0x65   : > { %1754 = vmatpush1.bf16.msra.mxu1 %v1753_v2  ;;  %v1775_v2 = vpack.c.bf16 %v423_v61, %v421_v60  ;;  %v1795_v62 = vpack.c.bf16 %v443_v57, %v441_v56  ;;  %v461_v56 = vld [vmem:[%s2296_s22 + $0x488] sm:$0xff]  ;;  %v463_v57 = vld [vmem:[%s2296_s22 + $0x498] sm:$0xff] }
  0x66   : > { %2010 = vmatpush1.bf16.msra.mxu0 %v2009_v3  ;;  %1756 = vmatprep.subr.bf16.mxu1 %v1755_v4  ;;  %v420_v3 = vld [vmem:[%s2296_s22 + $0x340] sm:$0xff]  ;;  %v422_v4 = vld [vmem:[%s2296_s22 + $0x350] sm:$0xff] }
  0x67   : > { %2012 = vmatprep.subr.bf16.mxu0 %v2011_v8  ;;  %v425_v8 = vld [vmem:[%s2296_s22 + $0x368] sm:$0xff]  ;;  %v1777_v12 = vpack.c.bf16 %v422_v4, %v420_v3  ;;  %v698_v3 = vld [vmem:[%s2296_s22 + $0xbf0] sm:$0xff] }
  0x68   : > { %v445_v4 = vld [vmem:[%s2296_s22 + $0x408] sm:$0xff] }
  0x69   : > { %1758 = vmatpush1.bf16.msra.mxu1 %v1757_v14  ;;  %v1779_v14 = vpack.c.bf16 %v427_v9, %v425_v8  ;;  %v1799_v10 = vpack.c.bf16 %v447_v5, %v445_v4  ;;  %v465_v4 = vld [vmem:[%s2296_s22 + $0x4a8] sm:$0xff]  ;;  %v467_v5 = vld [vmem:[%s2296_s22 + $0x4b8] sm:$0xff] }
  0x6a   : > { %2014 = vmatpush1.bf16.msra.mxu0 %v2013_v16  ;;  %1760 = vmatprep.subr.bf16.mxu1 %v1759_v17  ;;  %v426_v16 = vld [vmem:[%s2296_s22 + $0x370] sm:$0xff]  ;;  %v680_v17 = vld [vmem:[%s2296_s22 + $0xb60] sm:$0xff] }
  0x6b   : > { %2016 = vmatprep.subr.bf16.mxu0 %v2015_v21  ;;  %v431_v21 = vld [vmem:[%s2296_s22 + $0x398] sm:$0xff]  ;;  %v1781_v24 = vpack.c.bf16 %v426_v16, %v424_v15  ;;  %v2037_v25 = vpack.c.bf16 %v682_v19, %v680_v17  ;;  %v702_v15 = vld [vmem:[%s2296_s22 + $0xc10] sm:$0xff]  ;;  %v449_v16 = vld [vmem:[%s2296_s22 + $0x428] sm:$0xff] }
  0x6c   : > { %v1783_v26 = vpack.c.bf16 %v431_v21, %v429_v20  ;;  %v451_v17 = vld [vmem:[%s2296_s22 + $0x438] sm:$0xff]  ;;  %v302_v20 = vld [vmem:[%s2394_s26 + $0x10] sm:$0xff] }
  0x6d   : > { %1762 = vmatpush1.bf16.msra.mxu1 %v1761_v28  ;;  %v430_v28 = vld [vmem:[%s2296_s22 + $0x390] sm:$0xff]  ;;  %v707_v19 = vld [vmem:[%s2296_s22 + $0xc38] sm:$0xff] }
  0x6e   : > { %2018 = vmatpush1.bf16.msra.mxu0 %v2017_v29  ;;  %1764 = vmatprep.subr.bf16.mxu1 %v1763_v30  ;;  %v684_v29 = vld [vmem:[%s2296_s22 + $0xb80] sm:$0xff]  ;;  %v2039_v30 = vpack.c.bf16 %v687_v23, %v685_v22  ;;  %v1785_v36 = vpack.c.bf16 %v430_v28, %v428_v27  ;;  %v310_v22 = vld [vmem:[%s2394_s26 + $0x50] sm:$0xff] }
  0x6f   : > { %2020 = vmatprep.subr.bf16.mxu0 %v2019_v34  ;;  %v689_v34 = vld [vmem:[%s2296_s22 + $0xba8] sm:$0xff]  ;;  %v2041_v37 = vpack.c.bf16 %v686_v31, %v684_v29  ;;  %v704_v27 = vld [vmem:[%s2296_s22 + $0xc20] sm:$0xff]  ;;  %v706_v29 = vld [vmem:[%s2296_s22 + $0xc30] sm:$0xff] }
  0x70   : > { %v455_v31 = vld [vmem:[%s2296_s22 + $0x458] sm:$0xff] }
  0x71   : > { %1766 = vmatpush1.bf16.msra.mxu1 %v1765_v40  ;;  %v434_v40 = vld [vmem:[%s2296_s22 + $0x3b0] sm:$0xff] }
  0x72   : > { %2022 = vmatpush1.bf16.msra.mxu0 %v2021_v41  ;;  %1768 = vmatprep.subr.bf16.mxu1 %v1767_v42  ;;  %v688_v41 = vld [vmem:[%s2296_s22 + $0xba0] sm:$0xff]  ;;  %v2043_v42 = vpack.c.bf16 %v691_v35, %v689_v34  ;;  %v1789_v48 = vpack.c.bf16 %v434_v40, %v432_v39  ;;  %v305_v34 = vld [vmem:[%s2394_s26 + $0x28] sm:$0xff]  ;;  %v454_v40 = vld [vmem:[%s2296_s22 + $0x450] sm:$0xff] }
  0x73   : > { %2024 = vmatprep.subr.bf16.mxu0 %v2023_v46  ;;  %v693_v46 = vld [vmem:[%s2296_s22 + $0xbc8] sm:$0xff]  ;;  %v2045_v49 = vpack.c.bf16 %v690_v43, %v688_v41  ;;  %v452_v39 = vld [vmem:[%s2296_s22 + $0x440] sm:$0xff]  ;;  %v710_v43 = vld [vmem:[%s2296_s22 + $0xc50] sm:$0xff] }
  0x74   : > { %v708_v41 = vld [vmem:[%s2296_s22 + $0xc40] sm:$0xff] }
  0x75   : > { %1770 = vmatpush1.bf16.msra.mxu1 %v1769_v52  ;;  %v438_v52 = vld [vmem:[%s2296_s22 + $0x3d0] sm:$0xff] }
  0x76   : > { %2026 = vmatpush1.bf16.msra.mxu0 %v2025_v53  ;;  %1772 = vmatprep.subr.bf16.mxu1 %v1771_v54  ;;  %v692_v53 = vld [vmem:[%s2296_s22 + $0xbc0] sm:$0xff]  ;;  %v2047_v54 = vpack.c.bf16 %v695_v47, %v693_v46  ;;  %v1793_v60 = vpack.c.bf16 %v438_v52, %v436_v51  ;;  %v713_v46 = vld [vmem:[%s2296_s22 + $0xc68] sm:$0xff]  ;;  %v715_v47 = vld [vmem:[%s2296_s22 + $0xc78] sm:$0xff] }
  0x77   : > { %2028 = vmatprep.subr.bf16.mxu0 %v2027_v58  ;;  %v697_v58 = vld [vmem:[%s2296_s22 + $0xbe8] sm:$0xff]  ;;  %v2049_v61 = vpack.c.bf16 %v694_v55, %v692_v53  ;;  %v456_v51 = vld [vmem:[%s2296_s22 + $0x460] sm:$0xff]  ;;  %v458_v52 = vld [vmem:[%s2296_s22 + $0x470] sm:$0xff] }
  0x78   : > { %v712_v53 = vld [vmem:[%s2296_s22 + $0xc60] sm:$0xff]  ;;  %v714_v55 = vld [vmem:[%s2296_s22 + $0xc70] sm:$0xff] }
  0x79   : > { %1774 = vmatpush1.bf16.msra.mxu1 %v1773_v0  ;;  %v442_v0 = vld [vmem:[%s2296_s22 + $0x3f0] sm:$0xff] }
  0x7a   : > { %2030 = vmatpush1.bf16.msra.mxu0 %v2029_v1  ;;  %1776 = vmatprep.subr.bf16.mxu1 %v1775_v2  ;;  %v696_v1 = vld [vmem:[%s2296_s22 + $0xbe0] sm:$0xff]  ;;  %v2051_v2 = vpack.c.bf16 %v699_v59, %v697_v58  ;;  %v1797_v8 = vpack.c.bf16 %v442_v0, %v440_v63  ;;  %v717_v58 = vld [vmem:[%s2296_s22 + $0xc88] sm:$0xff]  ;;  %v719_v59 = vld [vmem:[%s2296_s22 + $0xc98] sm:$0xff] }
  0x7b   : > { %2032 = vmatprep.subr.bf16.mxu0 %v2031_v6  ;;  %v701_v6 = vld [vmem:[%s2296_s22 + $0xc08] sm:$0xff]  ;;  %v2053_v9 = vpack.c.bf16 %v698_v3, %v696_v1  ;;  %v460_v63 = vld [vmem:[%s2296_s22 + $0x480] sm:$0xff]  ;;  %v462_v0 = vld [vmem:[%s2296_s22 + $0x490] sm:$0xff] }
  0x7c   : > { %v716_v1 = vld [vmem:[%s2296_s22 + $0xc80] sm:$0xff]  ;;  %v718_v3 = vld [vmem:[%s2296_s22 + $0xc90] sm:$0xff] }
  0x7d   : > { %1778 = vmatpush1.bf16.msra.mxu1 %v1777_v12  ;;  %v446_v12 = vld [vmem:[%s2296_s22 + $0x410] sm:$0xff] }
  0x7e   : > { %2034 = vmatpush1.bf16.msra.mxu0 %v2033_v13  ;;  %1780 = vmatprep.subr.bf16.mxu1 %v1779_v14  ;;  %v700_v13 = vld [vmem:[%s2296_s22 + $0xc00] sm:$0xff]  ;;  %v2055_v14 = vpack.c.bf16 %v703_v7, %v701_v6  ;;  %v1801_v21 = vpack.c.bf16 %v446_v12, %v444_v11  ;;  %v721_v6 = vld [vmem:[%s2296_s22 + $0xca8] sm:$0xff]  ;;  %v723_v7 = vld [vmem:[%s2296_s22 + $0xcb8] sm:$0xff] }
  0x7f   : > { %2036 = vmatprep.subr.bf16.mxu0 %v2035_v18  ;;  %v705_v18 = vld [vmem:[%s2296_s22 + $0xc28] sm:$0xff]  ;;  %v2057_v23 = vpack.c.bf16 %v702_v15, %v700_v13  ;;  %v464_v11 = vld [vmem:[%s2296_s22 + $0x4a0] sm:$0xff]  ;;  %v466_v12 = vld [vmem:[%s2296_s22 + $0x4b0] sm:$0xff] }
  0x80   : > { %v2059_v28 = vpack.c.bf16 %v707_v19, %v705_v18  ;;  %v720_v13 = vld [vmem:[%s2296_s22 + $0xca0] sm:$0xff]  ;;  %v722_v15 = vld [vmem:[%s2296_s22 + $0xcb0] sm:$0xff]  ;;  %v725_v18 = vld [vmem:[%s2296_s22 + $0xcc8] sm:$0xff] }
  0x81   : > { %1782 = vmatpush1.bf16.msra.mxu1 %v1781_v24  ;;  %v1803_v24 = vpack.c.bf16 %v451_v17, %v449_v16  ;;  %v469_v16 = vld [vmem:[%s2296_s22 + $0x4c8] sm:$0xff]  ;;  %v471_v17 = vld [vmem:[%s2296_s22 + $0x4d8] sm:$0xff] }
  0x82   : > { %2038 = vmatpush1.bf16.msra.mxu0 %v2037_v25  ;;  %1784 = vmatprep.subr.bf16.mxu1 %v1783_v26  ;;  %v448_v25 = vld [vmem:[%s2296_s22 + $0x420] sm:$0xff]  ;;  %v450_v26 = vld [vmem:[%s2296_s22 + $0x430] sm:$0xff]  ;;  %v727_v19 = vld [vmem:[%s2296_s22 + $0xcd8] sm:$0xff] }
  0x83   : > { %2040 = vmatprep.subr.bf16.mxu0 %v2039_v30  ;;  %v453_v30 = vld [vmem:[%s2296_s22 + $0x448] sm:$0xff]  ;;  %v1805_v35 = vpack.c.bf16 %v450_v26, %v448_v25  ;;  %v724_v25 = vld [vmem:[%s2296_s22 + $0xcc0] sm:$0xff]  ;;  %v2079_v26 = vpack.c.bf16 %v727_v19, %v725_v18 }
  0x84   : > { %v488_v19 = vld [vmem:[%s2296_s22 + $0x560] sm:$0xff] }
  0x85   : > { %1786 = vmatpush1.bf16.msra.mxu1 %v1785_v36  ;;  %v313_v36 = vld [vmem:[%s2394_s26 + $0x68] sm:$0xff] }
  0x86   : > { %2042 = vmatpush1.bf16.msra.mxu0 %v2041_v37  ;;  %1788 = vmatprep.subr.bf16.mxu1 %v1787_v38  ;;  %v2061_v37 = vpack.c.bf16 %v706_v29, %v704_v27  ;;  %v1807_v38 = vpack.c.bf16 %v455_v31, %v453_v30  ;;  %v726_v27 = vld [vmem:[%s2296_s22 + $0xcd0] sm:$0xff]  ;;  %v475_v29 = vld [vmem:[%s2296_s22 + $0x4f8] sm:$0xff]  ;;  %v729_v30 = vld [vmem:[%s2296_s22 + $0xce8] sm:$0xff] }
  0x87   : > { %2044 = vmatprep.subr.bf16.mxu0 %v2043_v42  ;;  %v2063_v42 = vpack.c.bf16 %v711_v33, %v709_v32  ;;  %v731_v31 = vld [vmem:[%s2296_s22 + $0xcf8] sm:$0xff]  ;;  %v2081_v33 = vpack.c.bf16 %v726_v27, %v724_v25 }
  0x88   : > { %v495_v25 = vld [vmem:[%s2296_s22 + $0x598] sm:$0xff] }
  0x89   : > { %1790 = vmatpush1.bf16.msra.mxu1 %v1789_v48  ;;  %v1809_v48 = vpack.c.bf16 %v454_v40, %v452_v39  ;;  %v730_v39 = vld [vmem:[%s2296_s22 + $0xcf0] sm:$0xff]  ;;  %v477_v40 = vld [vmem:[%s2296_s22 + $0x508] sm:$0xff]  ;;  %v751_v27 = vld [vmem:[%s2296_s22 + $0xd98] sm:$0xff] }
  0x8a   : > { %2046 = vmatpush1.bf16.msra.mxu0 %v2045_v49  ;;  %1792 = vmatprep.subr.bf16.mxu1 %v1791_v50  ;;  %v2065_v49 = vpack.c.bf16 %v710_v43, %v708_v41  ;;  %v1811_v50 = vpack.c.bf16 %v459_v45, %v457_v44  ;;  %v479_v41 = vld [vmem:[%s2296_s22 + $0x518] sm:$0xff] }
  0x8b   : > { %2048 = vmatprep.subr.bf16.mxu0 %v2047_v54  ;;  %v2067_v54 = vpack.c.bf16 %v715_v47, %v713_v46  ;;  %v735_v43 = vld [vmem:[%s2296_s22 + $0xd18] sm:$0xff]  ;;  %v1831_v46 = vpack.c.bf16 %v479_v41, %v477_v40  ;;  %v476_v47 = vld [vmem:[%s2296_s22 + $0x500] sm:$0xff] }
  0x8d   : > { %1794 = vmatpush1.bf16.msra.mxu1 %v1793_v60  ;;  %v1813_v60 = vpack.c.bf16 %v458_v52, %v456_v51  ;;  %v734_v51 = vld [vmem:[%s2296_s22 + $0xd10] sm:$0xff]  ;;  %v481_v52 = vld [vmem:[%s2296_s22 + $0x528] sm:$0xff] }
  0x8e   : > { %2050 = vmatpush1.bf16.msra.mxu0 %v2049_v61  ;;  %1796 = vmatprep.subr.bf16.mxu1 %v1795_v62  ;;  %v2069_v61 = vpack.c.bf16 %v714_v55, %v712_v53  ;;  %v1815_v62 = vpack.c.bf16 %v463_v57, %v461_v56  ;;  %v483_v53 = vld [vmem:[%s2296_s22 + $0x538] sm:$0xff] }
  0x8f   : > { %2052 = vmatprep.subr.bf16.mxu0 %v2051_v2  ;;  %v2071_v2 = vpack.c.bf16 %v719_v59, %v717_v58  ;;  %v739_v55 = vld [vmem:[%s2296_s22 + $0xd38] sm:$0xff]  ;;  %v1835_v58 = vpack.c.bf16 %v483_v53, %v481_v52  ;;  %v480_v59 = vld [vmem:[%s2296_s22 + $0x520] sm:$0xff] }
  0x91   : > { %1798 = vmatpush1.bf16.msra.mxu1 %v1797_v8  ;;  %v1817_v8 = vpack.c.bf16 %v462_v0, %v460_v63  ;;  %v738_v63 = vld [vmem:[%s2296_s22 + $0xd30] sm:$0xff]  ;;  %v485_v0 = vld [vmem:[%s2296_s22 + $0x548] sm:$0xff] }
  0x92   : > { %2054 = vmatpush1.bf16.msra.mxu0 %v2053_v9  ;;  %1800 = vmatprep.subr.bf16.mxu1 %v1799_v10  ;;  %v2073_v9 = vpack.c.bf16 %v718_v3, %v716_v1  ;;  %v1819_v10 = vpack.c.bf16 %v467_v5, %v465_v4  ;;  %v487_v1 = vld [vmem:[%s2296_s22 + $0x558] sm:$0xff] }
  0x93   : > { %2056 = vmatprep.subr.bf16.mxu0 %v2055_v14  ;;  %v2075_v14 = vpack.c.bf16 %v723_v7, %v721_v6  ;;  %v743_v3 = vld [vmem:[%s2296_s22 + $0xd58] sm:$0xff]  ;;  %v1839_v6 = vpack.c.bf16 %v487_v1, %v485_v0  ;;  %v484_v7 = vld [vmem:[%s2296_s22 + $0x540] sm:$0xff] }
  0x94   : > { %964 = vmatmul.mubr.f32.vlgmr.msra.gmra.mrb[0].mxu1 %v302_v20  ;;  %v1821_v20 = vpack.c.bf16 %v466_v12, %v464_v11  ;;  %v742_v11 = vld [vmem:[%s2296_s22 + $0xd50] sm:$0xff]  ;;  %v489_v12 = vld [vmem:[%s2296_s22 + $0x568] sm:$0xff] }
  0x95   : > { %1802 = vmatpush1.bf16.msra.mxu1 %v1801_v21  ;;  %1248 = vmatmul.mubr.f32.vlgmr.msra.gmra.mrb[0].mxu0 %v310_v22  ;;  %v2077_v21 = vpack.c.bf16 %v722_v15, %v720_v13  ;;  %v1823_v22 = vpack.c.bf16 %v471_v17, %v469_v16  ;;  %v491_v13 = vld [vmem:[%s2296_s22 + $0x578] sm:$0xff] }
  0x96   : > { %2058 = vmatpush1.bf16.msra.mxu0 %v2057_v23  ;;  %1804 = vmatprep.subr.bf16.mxu1 %v1803_v24  ;;  %v468_v23 = vld [vmem:[%s2296_s22 + $0x4c0] sm:$0xff]  ;;  %v470_v24 = vld [vmem:[%s2296_s22 + $0x4d0] sm:$0xff]  ;;  %v747_v15 = vld [vmem:[%s2296_s22 + $0xd78] sm:$0xff]  ;;  %v1843_v18 = vpack.c.bf16 %v491_v13, %v489_v12 }
  0x97   : > { %2060 = vmatprep.subr.bf16.mxu0 %v2059_v28  ;;  %1034 = vmatprep.mubr.f32.mxu1 %v305_v34  ;;  %v473_v28 = vld [vmem:[%s2296_s22 + $0x4e8] sm:$0xff]  ;;  %v1825_v32 = vpack.c.bf16 %v470_v24, %v468_v23  ;;  %v746_v23 = vld [vmem:[%s2296_s22 + $0xd70] sm:$0xff] }
  0x98   : > { %1318 = vmatprep.mubr.f32.mxu0 %v313_v36  ;;  %v1827_v34 = vpack.c.bf16 %v475_v29, %v473_v28  ;;  %v474_v36 = vld [vmem:[%s2296_s22 + $0x4f0] sm:$0xff]  ;;  %v493_v24 = vld [vmem:[%s2296_s22 + $0x588] sm:$0xff] }
  0x99   : > { %1806 = vmatpush1.bf16.msra.mxu1 %v1805_v35  ;;  %v472_v35 = vld [vmem:[%s2296_s22 + $0x4e0] sm:$0xff] }
  0x9a   : > { %2062 = vmatpush1.bf16.msra.mxu0 %v2061_v37  ;;  %1808 = vmatprep.subr.bf16.mxu1 %v1807_v38  ;;  %v728_v37 = vld [vmem:[%s2296_s22 + $0xce0] sm:$0xff]  ;;  %v2083_v38 = vpack.c.bf16 %v731_v31, %v729_v30  ;;  %v1829_v44 = vpack.c.bf16 %v474_v36, %v472_v35  ;;  %v1847_v30 = vpack.c.bf16 %v495_v25, %v493_v24  ;;  %v750_v35 = vld [vmem:[%s2296_s22 + $0xd90] sm:$0xff]  ;;  %v497_v36 = vld [vmem:[%s2296_s22 + $0x5a8] sm:$0xff] }
  0x9b   : > { %2064 = vmatprep.subr.bf16.mxu0 %v2063_v42  ;;  %v733_v42 = vld [vmem:[%s2296_s22 + $0xd08] sm:$0xff]  ;;  %v2085_v45 = vpack.c.bf16 %v730_v39, %v728_v37  ;;  %v492_v31 = vld [vmem:[%s2296_s22 + $0x580] sm:$0xff]  ;;  %v499_v37 = vld [vmem:[%s2296_s22 + $0x5b8] sm:$0xff] }
  0x9c   : > { %v755_v39 = vld [vmem:[%s2296_s22 + $0xdb8] sm:$0xff]  ;;  %v304_v24 = vld [vmem:[%s2394_s26 + $0x20] sm:$0xff] }
  0x9d   : > { %1810 = vmatpush1.bf16.msra.mxu1 %v1809_v48  ;;  %v478_v48 = vld [vmem:[%s2296_s22 + $0x510] sm:$0xff] }
  0x9e   : > { %2066 = vmatpush1.bf16.msra.mxu0 %v2065_v49  ;;  %1812 = vmatprep.subr.bf16.mxu1 %v1811_v50  ;;  %v732_v49 = vld [vmem:[%s2296_s22 + $0xd00] sm:$0xff]  ;;  %v2087_v50 = vpack.c.bf16 %v735_v43, %v733_v42  ;;  %v1833_v56 = vpack.c.bf16 %v478_v48, %v476_v47  ;;  %v1851_v42 = vpack.c.bf16 %v499_v37, %v497_v36  ;;  %v754_v47 = vld [vmem:[%s2296_s22 + $0xdb0] sm:$0xff]  ;;  %v501_v48 = vld [vmem:[%s2296_s22 + $0x5c8] sm:$0xff] }
  0x9f   : > { %2068 = vmatprep.subr.bf16.mxu0 %v2067_v54  ;;  %v737_v54 = vld [vmem:[%s2296_s22 + $0xd28] sm:$0xff]  ;;  %v2089_v57 = vpack.c.bf16 %v734_v51, %v732_v49  ;;  %v496_v43 = vld [vmem:[%s2296_s22 + $0x5a0] sm:$0xff]  ;;  %v503_v49 = vld [vmem:[%s2296_s22 + $0x5d8] sm:$0xff] }
  0xa0   : > { %v759_v51 = vld [vmem:[%s2296_s22 + $0xdd8] sm:$0xff]  ;;  %v773_v36 = vld [vmem:[%s2296_s22 + $0xe48] sm:$0xff] }
  0xa1   : > { %1814 = vmatpush1.bf16.msra.mxu1 %v1813_v60  ;;  %v482_v60 = vld [vmem:[%s2296_s22 + $0x530] sm:$0xff]  ;;  %v775_v37 = vld [vmem:[%s2296_s22 + $0xe58] sm:$0xff] }
  0xa2   : > { %2070 = vmatpush1.bf16.msra.mxu0 %v2069_v61  ;;  %1816 = vmatprep.subr.bf16.mxu1 %v1815_v62  ;;  %v736_v61 = vld [vmem:[%s2296_s22 + $0xd20] sm:$0xff]  ;;  %v2091_v62 = vpack.c.bf16 %v739_v55, %v737_v54  ;;  %v1837_v4 = vpack.c.bf16 %v482_v60, %v480_v59  ;;  %v1855_v54 = vpack.c.bf16 %v503_v49, %v501_v48  ;;  %v758_v59 = vld [vmem:[%s2296_s22 + $0xdd0] sm:$0xff]  ;;  %v505_v60 = vld [vmem:[%s2296_s22 + $0x5e8] sm:$0xff] }
  0xa3   : > { %2072 = vmatprep.subr.bf16.mxu0 %v2071_v2  ;;  %v741_v2 = vld [vmem:[%s2296_s22 + $0xd48] sm:$0xff]  ;;  %v2093_v5 = vpack.c.bf16 %v738_v63, %v736_v61  ;;  %v500_v55 = vld [vmem:[%s2296_s22 + $0x5c0] sm:$0xff]  ;;  %v507_v61 = vld [vmem:[%s2296_s22 + $0x5f8] sm:$0xff] }
  0xa4   : > { %v763_v63 = vld [vmem:[%s2296_s22 + $0xdf8] sm:$0xff]  ;;  %v521_v48 = vld [vmem:[%s2296_s22 + $0x668] sm:$0xff] }
  0xa5   : > { %1818 = vmatpush1.bf16.msra.mxu1 %v1817_v8  ;;  %v486_v8 = vld [vmem:[%s2296_s22 + $0x550] sm:$0xff]  ;;  %v523_v49 = vld [vmem:[%s2296_s22 + $0x678] sm:$0xff] }
  0xa6   : > { %2074 = vmatpush1.bf16.msra.mxu0 %v2073_v9  ;;  %1820 = vmatprep.subr.bf16.mxu1 %v1819_v10  ;;  %v740_v9 = vld [vmem:[%s2296_s22 + $0xd40] sm:$0xff]  ;;  %v2095_v10 = vpack.c.bf16 %v743_v3, %v741_v2  ;;  %v1841_v16 = vpack.c.bf16 %v486_v8, %v484_v7  ;;  %v1859_v2 = vpack.c.bf16 %v507_v61, %v505_v60  ;;  %v762_v7 = vld [vmem:[%s2296_s22 + $0xdf0] sm:$0xff]  ;;  %v509_v8 = vld [vmem:[%s2296_s22 + $0x608] sm:$0xff] }
  0xa7   : > { %2076 = vmatprep.subr.bf16.mxu0 %v2075_v14  ;;  %v745_v14 = vld [vmem:[%s2296_s22 + $0xd68] sm:$0xff]  ;;  %v2097_v17 = vpack.c.bf16 %v742_v11, %v740_v9  ;;  %v504_v3 = vld [vmem:[%s2296_s22 + $0x5e0] sm:$0xff]  ;;  %v511_v9 = vld [vmem:[%s2296_s22 + $0x618] sm:$0xff] }
  0xa8   : > { %v767_v11 = vld [vmem:[%s2296_s22 + $0xe18] sm:$0xff]  ;;  %v525_v60 = vld [vmem:[%s2296_s22 + $0x688] sm:$0xff] }
  0xa9   : > { %1822 = vmatpush1.bf16.msra.mxu1 %v1821_v20  ;;  %v490_v20 = vld [vmem:[%s2296_s22 + $0x570] sm:$0xff]  ;;  %v527_v61 = vld [vmem:[%s2296_s22 + $0x698] sm:$0xff] }
  0xaa   : > { %2078 = vmatpush1.bf16.msra.mxu0 %v2077_v21  ;;  %1824 = vmatprep.subr.bf16.mxu1 %v1823_v22  ;;  %v744_v21 = vld [vmem:[%s2296_s22 + $0xd60] sm:$0xff]  ;;  %v2099_v22 = vpack.c.bf16 %v747_v15, %v745_v14  ;;  %v1845_v28 = vpack.c.bf16 %v490_v20, %v488_v19  ;;  %v1863_v14 = vpack.c.bf16 %v511_v9, %v509_v8  ;;  %v766_v19 = vld [vmem:[%s2296_s22 + $0xe10] sm:$0xff]  ;;  %v513_v20 = vld [vmem:[%s2296_s22 + $0x628] sm:$0xff] }
  0xab   : > { %2080 = vmatprep.subr.bf16.mxu0 %v2079_v26  ;;  %v749_v26 = vld [vmem:[%s2296_s22 + $0xd88] sm:$0xff]  ;;  %v2101_v29 = vpack.c.bf16 %v746_v23, %v744_v21  ;;  %v508_v15 = vld [vmem:[%s2296_s22 + $0x600] sm:$0xff]  ;;  %v515_v21 = vld [vmem:[%s2296_s22 + $0x638] sm:$0xff] }
  0xac   : > { %v771_v23 = vld [vmem:[%s2296_s22 + $0xe38] sm:$0xff]  ;;  %v529_v8 = vld [vmem:[%s2296_s22 + $0x6a8] sm:$0xff] }
  0xad   : > { %1826 = vmatpush1.bf16.msra.mxu1 %v1825_v32  ;;  %v494_v32 = vld [vmem:[%s2296_s22 + $0x590] sm:$0xff]  ;;  %v531_v9 = vld [vmem:[%s2296_s22 + $0x6b8] sm:$0xff] }
  0xae   : > { %2082 = vmatpush1.bf16.msra.mxu0 %v2081_v33  ;;  %1828 = vmatprep.subr.bf16.mxu1 %v1827_v34  ;;  %v748_v33 = vld [vmem:[%s2296_s22 + $0xd80] sm:$0xff]  ;;  %v2103_v34 = vpack.c.bf16 %v751_v27, %v749_v26  ;;  %v1849_v40 = vpack.c.bf16 %v494_v32, %v492_v31 }
  0xaf   : > { %2084 = vmatprep.subr.bf16.mxu0 %v2083_v38  ;;  %v753_v38 = vld [vmem:[%s2296_s22 + $0xda8] sm:$0xff]  ;;  %v2105_v41 = vpack.c.bf16 %v750_v35, %v748_v33  ;;  %v312_v26 = vld [vmem:[%s2394_s26 + $0x60] sm:$0xff]  ;;  %v770_v33 = vld [vmem:[%s2296_s22 + $0xe30] sm:$0xff] }
  0xb0   : > { %v768_v31 = vld [vmem:[%s2296_s22 + $0xe20] sm:$0xff]  ;;  %v519_v35 = vld [vmem:[%s2296_s22 + $0x658] sm:$0xff] }
  0xb1   : > { %1830 = vmatpush1.bf16.msra.mxu1 %v1829_v44  ;;  %v498_v44 = vld [vmem:[%s2296_s22 + $0x5b0] sm:$0xff] }
  0xb2   : > { %2086 = vmatpush1.bf16.msra.mxu0 %v2085_v45  ;;  %1832 = vmatprep.subr.bf16.mxu1 %v1831_v46  ;;  %v752_v45 = vld [vmem:[%s2296_s22 + $0xda0] sm:$0xff]  ;;  %v2107_v46 = vpack.c.bf16 %v755_v39, %v753_v38  ;;  %v1853_v52 = vpack.c.bf16 %v498_v44, %v496_v43  ;;  %v307_v38 = vld [vmem:[%s2394_s26 + $0x38] sm:$0xff]  ;;  %v518_v44 = vld [vmem:[%s2296_s22 + $0x650] sm:$0xff] }
  0xb3   : > { %2088 = vmatprep.subr.bf16.mxu0 %v2087_v50  ;;  %v757_v50 = vld [vmem:[%s2296_s22 + $0xdc8] sm:$0xff]  ;;  %v2109_v53 = vpack.c.bf16 %v754_v47, %v752_v45  ;;  %v516_v43 = vld [vmem:[%s2296_s22 + $0x640] sm:$0xff]  ;;  %v774_v47 = vld [vmem:[%s2296_s22 + $0xe50] sm:$0xff] }
  0xb4   : > { %v772_v45 = vld [vmem:[%s2296_s22 + $0xe40] sm:$0xff] }
  0xb5   : > { %1834 = vmatpush1.bf16.msra.mxu1 %v1833_v56  ;;  %v502_v56 = vld [vmem:[%s2296_s22 + $0x5d0] sm:$0xff] }
  0xb6   : > { %2090 = vmatpush1.bf16.msra.mxu0 %v2089_v57  ;;  %1836 = vmatprep.subr.bf16.mxu1 %v1835_v58  ;;  %v756_v57 = vld [vmem:[%s2296_s22 + $0xdc0] sm:$0xff]  ;;  %v2111_v58 = vpack.c.bf16 %v759_v51, %v757_v50  ;;  %v1857_v0 = vpack.c.bf16 %v502_v56, %v500_v55  ;;  %v777_v50 = vld [vmem:[%s2296_s22 + $0xe68] sm:$0xff]  ;;  %v779_v51 = vld [vmem:[%s2296_s22 + $0xe78] sm:$0xff] }
  0xb7   : > { %2092 = vmatprep.subr.bf16.mxu0 %v2091_v62  ;;  %v761_v62 = vld [vmem:[%s2296_s22 + $0xde8] sm:$0xff]  ;;  %v2113_v1 = vpack.c.bf16 %v758_v59, %v756_v57  ;;  %v520_v55 = vld [vmem:[%s2296_s22 + $0x660] sm:$0xff]  ;;  %v522_v56 = vld [vmem:[%s2296_s22 + $0x670] sm:$0xff] }
  0xb8   : > { %v776_v57 = vld [vmem:[%s2296_s22 + $0xe60] sm:$0xff]  ;;  %v778_v59 = vld [vmem:[%s2296_s22 + $0xe70] sm:$0xff] }
  0xb9   : > { %1838 = vmatpush1.bf16.msra.mxu1 %v1837_v4  ;;  %v506_v4 = vld [vmem:[%s2296_s22 + $0x5f0] sm:$0xff] }
  0xba   : > { %2094 = vmatpush1.bf16.msra.mxu0 %v2093_v5  ;;  %1840 = vmatprep.subr.bf16.mxu1 %v1839_v6  ;;  %v760_v5 = vld [vmem:[%s2296_s22 + $0xde0] sm:$0xff]  ;;  %v2115_v6 = vpack.c.bf16 %v763_v63, %v761_v62  ;;  %v1861_v12 = vpack.c.bf16 %v506_v4, %v504_v3  ;;  %v781_v62 = vld [vmem:[%s2296_s22 + $0xe88] sm:$0xff]  ;;  %v783_v63 = vld [vmem:[%s2296_s22 + $0xe98] sm:$0xff] }
  0xbb   : > { %2096 = vmatprep.subr.bf16.mxu0 %v2095_v10  ;;  %v765_v10 = vld [vmem:[%s2296_s22 + $0xe08] sm:$0xff]  ;;  %v2117_v13 = vpack.c.bf16 %v762_v7, %v760_v5  ;;  %v524_v3 = vld [vmem:[%s2296_s22 + $0x680] sm:$0xff]  ;;  %v526_v4 = vld [vmem:[%s2296_s22 + $0x690] sm:$0xff] }
  0xbc   : > { %v780_v5 = vld [vmem:[%s2296_s22 + $0xe80] sm:$0xff]  ;;  %v782_v7 = vld [vmem:[%s2296_s22 + $0xe90] sm:$0xff] }
  0xbd   : > { %1842 = vmatpush1.bf16.msra.mxu1 %v1841_v16  ;;  %v510_v16 = vld [vmem:[%s2296_s22 + $0x610] sm:$0xff] }
  0xbe   : > { %2098 = vmatpush1.bf16.msra.mxu0 %v2097_v17  ;;  %1844 = vmatprep.subr.bf16.mxu1 %v1843_v18  ;;  %v764_v17 = vld [vmem:[%s2296_s22 + $0xe00] sm:$0xff]  ;;  %v2119_v18 = vpack.c.bf16 %v767_v11, %v765_v10  ;;  %v1865_v25 = vpack.c.bf16 %v510_v16, %v508_v15  ;;  %v785_v10 = vld [vmem:[%s2296_s22 + $0xea8] sm:$0xff]  ;;  %v787_v11 = vld [vmem:[%s2296_s22 + $0xeb8] sm:$0xff] }
  0xbf   : > { %2100 = vmatprep.subr.bf16.mxu0 %v2099_v22  ;;  %v769_v22 = vld [vmem:[%s2296_s22 + $0xe28] sm:$0xff]  ;;  %v2121_v27 = vpack.c.bf16 %v766_v19, %v764_v17  ;;  %v528_v15 = vld [vmem:[%s2296_s22 + $0x6a0] sm:$0xff]  ;;  %v530_v16 = vld [vmem:[%s2296_s22 + $0x6b0] sm:$0xff] }
  0xc0   : > { %v2123_v32 = vpack.c.bf16 %v771_v23, %v769_v22  ;;  %v784_v17 = vld [vmem:[%s2296_s22 + $0xea0] sm:$0xff]  ;;  %v786_v19 = vld [vmem:[%s2296_s22 + $0xeb0] sm:$0xff]  ;;  %v789_v22 = vld [vmem:[%s2296_s22 + $0xec8] sm:$0xff] }
  0xc1   : > { %1846 = vmatpush1.bf16.msra.mxu1 %v1845_v28  ;;  %v1867_v28 = vpack.c.bf16 %v515_v21, %v513_v20  ;;  %v533_v20 = vld [vmem:[%s2296_s22 + $0x6c8] sm:$0xff]  ;;  %v535_v21 = vld [vmem:[%s2296_s22 + $0x6d8] sm:$0xff] }
  0xc2   : > { %2102 = vmatpush1.bf16.msra.mxu0 %v2101_v29  ;;  %1848 = vmatprep.subr.bf16.mxu1 %v1847_v30  ;;  %v512_v29 = vld [vmem:[%s2296_s22 + $0x620] sm:$0xff]  ;;  %v514_v30 = vld [vmem:[%s2296_s22 + $0x630] sm:$0xff]  ;;  %v791_v23 = vld [vmem:[%s2296_s22 + $0xed8] sm:$0xff] }
  0xc3   : > { %2104 = vmatprep.subr.bf16.mxu0 %v2103_v34  ;;  %v517_v34 = vld [vmem:[%s2296_s22 + $0x648] sm:$0xff]  ;;  %v1869_v39 = vpack.c.bf16 %v514_v30, %v512_v29  ;;  %v788_v29 = vld [vmem:[%s2296_s22 + $0xec0] sm:$0xff]  ;;  %v2143_v30 = vpack.c.bf16 %v791_v23, %v789_v22 }
  0xc4   : > { %v552_v23 = vld [vmem:[%s2296_s22 + $0x760] sm:$0xff] }
  0xc5   : > { %1850 = vmatpush1.bf16.msra.mxu1 %v1849_v40  ;;  %v315_v40 = vld [vmem:[%s2394_s26 + $0x78] sm:$0xff] }
  0xc6   : > { %2106 = vmatpush1.bf16.msra.mxu0 %v2105_v41  ;;  %1852 = vmatprep.subr.bf16.mxu1 %v1851_v42  ;;  %v2125_v41 = vpack.c.bf16 %v770_v33, %v768_v31  ;;  %v1871_v42 = vpack.c.bf16 %v519_v35, %v517_v34  ;;  %v790_v31 = vld [vmem:[%s2296_s22 + $0xed0] sm:$0xff]  ;;  %v539_v33 = vld [vmem:[%s2296_s22 + $0x6f8] sm:$0xff]  ;;  %v793_v34 = vld [vmem:[%s2296_s22 + $0xee8] sm:$0xff] }
  0xc7   : > { %2108 = vmatprep.subr.bf16.mxu0 %v2107_v46  ;;  %v2127_v46 = vpack.c.bf16 %v775_v37, %v773_v36  ;;  %v795_v35 = vld [vmem:[%s2296_s22 + $0xef8] sm:$0xff]  ;;  %v2145_v37 = vpack.c.bf16 %v790_v31, %v788_v29 }
  0xc8   : > { %v559_v29 = vld [vmem:[%s2296_s22 + $0x798] sm:$0xff] }
  0xc9   : > { %1854 = vmatpush1.bf16.msra.mxu1 %v1853_v52  ;;  %v1873_v52 = vpack.c.bf16 %v518_v44, %v516_v43  ;;  %v794_v43 = vld [vmem:[%s2296_s22 + $0xef0] sm:$0xff]  ;;  %v541_v44 = vld [vmem:[%s2296_s22 + $0x708] sm:$0xff]  ;;  %v815_v31 = vld [vmem:[%s2296_s22 + $0xf98] sm:$0xff] }
  0xca   : > { %2110 = vmatpush1.bf16.msra.mxu0 %v2109_v53  ;;  %1856 = vmatprep.subr.bf16.mxu1 %v1855_v54  ;;  %v2129_v53 = vpack.c.bf16 %v774_v47, %v772_v45  ;;  %v1875_v54 = vpack.c.bf16 %v523_v49, %v521_v48  ;;  %v543_v45 = vld [vmem:[%s2296_s22 + $0x718] sm:$0xff] }
  0xcb   : > { %2112 = vmatprep.subr.bf16.mxu0 %v2111_v58  ;;  %v2131_v58 = vpack.c.bf16 %v779_v51, %v777_v50  ;;  %v799_v47 = vld [vmem:[%s2296_s22 + $0xf18] sm:$0xff]  ;;  %v1895_v50 = vpack.c.bf16 %v543_v45, %v541_v44  ;;  %v540_v51 = vld [vmem:[%s2296_s22 + $0x700] sm:$0xff] }
  0xcd   : > { %1858 = vmatpush1.bf16.msra.mxu1 %v1857_v0  ;;  %v1877_v0 = vpack.c.bf16 %v522_v56, %v520_v55  ;;  %v798_v55 = vld [vmem:[%s2296_s22 + $0xf10] sm:$0xff]  ;;  %v545_v56 = vld [vmem:[%s2296_s22 + $0x728] sm:$0xff] }
  0xce   : > { %2114 = vmatpush1.bf16.msra.mxu0 %v2113_v1  ;;  %1860 = vmatprep.subr.bf16.mxu1 %v1859_v2  ;;  %v2133_v1 = vpack.c.bf16 %v778_v59, %v776_v57  ;;  %v1879_v2 = vpack.c.bf16 %v527_v61, %v525_v60  ;;  %v547_v57 = vld [vmem:[%s2296_s22 + $0x738] sm:$0xff] }
  0xcf   : > { %2116 = vmatprep.subr.bf16.mxu0 %v2115_v6  ;;  %v2135_v6 = vpack.c.bf16 %v783_v63, %v781_v62  ;;  %v803_v59 = vld [vmem:[%s2296_s22 + $0xf38] sm:$0xff]  ;;  %v1899_v62 = vpack.c.bf16 %v547_v57, %v545_v56  ;;  %v544_v63 = vld [vmem:[%s2296_s22 + $0x720] sm:$0xff] }
  0xd1   : > { %1862 = vmatpush1.bf16.msra.mxu1 %v1861_v12  ;;  %v1881_v12 = vpack.c.bf16 %v526_v4, %v524_v3  ;;  %v802_v3 = vld [vmem:[%s2296_s22 + $0xf30] sm:$0xff]  ;;  %v549_v4 = vld [vmem:[%s2296_s22 + $0x748] sm:$0xff] }
  0xd2   : > { %2118 = vmatpush1.bf16.msra.mxu0 %v2117_v13  ;;  %1864 = vmatprep.subr.bf16.mxu1 %v1863_v14  ;;  %v2137_v13 = vpack.c.bf16 %v782_v7, %v780_v5  ;;  %v1883_v14 = vpack.c.bf16 %v531_v9, %v529_v8  ;;  %v551_v5 = vld [vmem:[%s2296_s22 + $0x758] sm:$0xff] }
  0xd3   : > { %2120 = vmatprep.subr.bf16.mxu0 %v2119_v18  ;;  %v2139_v18 = vpack.c.bf16 %v787_v11, %v785_v10  ;;  %v807_v7 = vld [vmem:[%s2296_s22 + $0xf58] sm:$0xff]  ;;  %v1903_v10 = vpack.c.bf16 %v551_v5, %v549_v4  ;;  %v548_v11 = vld [vmem:[%s2296_s22 + $0x740] sm:$0xff] }
  0xd4   : > { %1035 = vmatmul.mubr.f32.vlgmr.msra.gmra.mrb[0].mxu1 %v304_v24  ;;  %v1885_v24 = vpack.c.bf16 %v530_v16, %v528_v15  ;;  %v806_v15 = vld [vmem:[%s2296_s22 + $0xf50] sm:$0xff]  ;;  %v553_v16 = vld [vmem:[%s2296_s22 + $0x768] sm:$0xff] }
  0xd5   : > { %1866 = vmatpush1.bf16.msra.mxu1 %v1865_v25  ;;  %1319 = vmatmul.mubr.f32.vlgmr.msra.gmra.mrb[0].mxu0 %v312_v26  ;;  %v2141_v25 = vpack.c.bf16 %v786_v19, %v784_v17  ;;  %v1887_v26 = vpack.c.bf16 %v535_v21, %v533_v20  ;;  %v555_v17 = vld [vmem:[%s2296_s22 + $0x778] sm:$0xff] }
  0xd6   : > { %2122 = vmatpush1.bf16.msra.mxu0 %v2121_v27  ;;  %1868 = vmatprep.subr.bf16.mxu1 %v1867_v28  ;;  %v532_v27 = vld [vmem:[%s2296_s22 + $0x6c0] sm:$0xff]  ;;  %v534_v28 = vld [vmem:[%s2296_s22 + $0x6d0] sm:$0xff]  ;;  %v811_v19 = vld [vmem:[%s2296_s22 + $0xf78] sm:$0xff]  ;;  %v1907_v22 = vpack.c.bf16 %v555_v17, %v553_v16 }
  0xd7   : > { %2124 = vmatprep.subr.bf16.mxu0 %v2123_v32  ;;  %1105 = vmatprep.mubr.f32.mxu1 %v307_v38  ;;  %v537_v32 = vld [vmem:[%s2296_s22 + $0x6e8] sm:$0xff]  ;;  %v1889_v36 = vpack.c.bf16 %v534_v28, %v532_v27  ;;  %v810_v27 = vld [vmem:[%s2296_s22 + $0xf70] sm:$0xff] }
  0xd8   : > { %1389 = vmatprep.mubr.f32.mxu0 %v315_v40  ;;  %v1891_v38 = vpack.c.bf16 %v539_v33, %v537_v32  ;;  %v538_v40 = vld [vmem:[%s2296_s22 + $0x6f0] sm:$0xff]  ;;  %v557_v28 = vld [vmem:[%s2296_s22 + $0x788] sm:$0xff] }
  0xd9   : > { %1870 = vmatpush1.bf16.msra.mxu1 %v1869_v39  ;;  %v536_v39 = vld [vmem:[%s2296_s22 + $0x6e0] sm:$0xff] }
  0xda   : > { %2126 = vmatpush1.bf16.msra.mxu0 %v2125_v41  ;;  %1872 = vmatprep.subr.bf16.mxu1 %v1871_v42  ;;  %v792_v41 = vld [vmem:[%s2296_s22 + $0xee0] sm:$0xff]  ;;  %v2147_v42 = vpack.c.bf16 %v795_v35, %v793_v34  ;;  %v1893_v48 = vpack.c.bf16 %v538_v40, %v536_v39  ;;  %v1911_v34 = vpack.c.bf16 %v559_v29, %v557_v28  ;;  %v814_v39 = vld [vmem:[%s2296_s22 + $0xf90] sm:$0xff]  ;;  %v561_v40 = vld [vmem:[%s2296_s22 + $0x7a8] sm:$0xff]  ;;  %v2246_v29 = vmov 1966171168  }
  0xdb   : > { %2128 = vmatprep.subr.bf16.mxu0 %v2127_v46  ;;  %v797_v46 = vld [vmem:[%s2296_s22 + $0xf08] sm:$0xff]  ;;  %v2149_v49 = vpack.c.bf16 %v794_v43, %v792_v41  ;;  %v556_v35 = vld [vmem:[%s2296_s22 + $0x780] sm:$0xff]  ;;  %v563_v41 = vld [vmem:[%s2296_s22 + $0x7b8] sm:$0xff] }
  0xdc   : > { %v819_v43 = vld [vmem:[%s2296_s22 + $0xfb8] sm:$0xff] }
  0xdd   : > { %1874 = vmatpush1.bf16.msra.mxu1 %v1873_v52  ;;  %v542_v52 = vld [vmem:[%s2296_s22 + $0x710] sm:$0xff] }
  0xde   : > { %2130 = vmatpush1.bf16.msra.mxu0 %v2129_v53  ;;  %1876 = vmatprep.subr.bf16.mxu1 %v1875_v54  ;;  %v796_v53 = vld [vmem:[%s2296_s22 + $0xf00] sm:$0xff]  ;;  %v2151_v54 = vpack.c.bf16 %v799_v47, %v797_v46  ;;  %v1897_v60 = vpack.c.bf16 %v542_v52, %v540_v51  ;;  %v1915_v46 = vpack.c.bf16 %v563_v41, %v561_v40  ;;  %v818_v51 = vld [vmem:[%s2296_s22 + $0xfb0] sm:$0xff]  ;;  %v565_v52 = vld [vmem:[%s2296_s22 + $0x7c8] sm:$0xff] }
  0xdf   : > { %2132 = vmatprep.subr.bf16.mxu0 %v2131_v58  ;;  %v801_v58 = vld [vmem:[%s2296_s22 + $0xf28] sm:$0xff]  ;;  %v2153_v61 = vpack.c.bf16 %v798_v55, %v796_v53  ;;  %v560_v47 = vld [vmem:[%s2296_s22 + $0x7a0] sm:$0xff]  ;;  %v567_v53 = vld [vmem:[%s2296_s22 + $0x7d8] sm:$0xff] }
  0xe0   : > { %v823_v55 = vld [vmem:[%s2296_s22 + $0xfd8] sm:$0xff] }
  0xe1   : > { %1878 = vmatpush1.bf16.msra.mxu1 %v1877_v0  ;;  %v546_v0 = vld [vmem:[%s2296_s22 + $0x730] sm:$0xff] }
  0xe2   : > { %2134 = vmatpush1.bf16.msra.mxu0 %v2133_v1  ;;  %1880 = vmatprep.subr.bf16.mxu1 %v1879_v2  ;;  %v800_v1 = vld [vmem:[%s2296_s22 + $0xf20] sm:$0xff]  ;;  %v2155_v2 = vpack.c.bf16 %v803_v59, %v801_v58  ;;  %v1901_v8 = vpack.c.bf16 %v546_v0, %v544_v63  ;;  %v1919_v58 = vpack.c.bf16 %v567_v53, %v565_v52  ;;  %v822_v63 = vld [vmem:[%s2296_s22 + $0xfd0] sm:$0xff]  ;;  %v569_v0 = vld [vmem:[%s2296_s22 + $0x7e8] sm:$0xff] }
  0xe3   : > { %2136 = vmatprep.subr.bf16.mxu0 %v2135_v6  ;;  %v805_v6 = vld [vmem:[%s2296_s22 + $0xf48] sm:$0xff]  ;;  %v2157_v9 = vpack.c.bf16 %v802_v3, %v800_v1  ;;  %v564_v59 = vld [vmem:[%s2296_s22 + $0x7c0] sm:$0xff]  ;;  %v571_v1 = vld [vmem:[%s2296_s22 + $0x7f8] sm:$0xff] }
  0xe4   : > { %v827_v3 = vld [vmem:[%s2296_s22 + $0xff8] sm:$0xff] }
  0xe5   : > { %1882 = vmatpush1.bf16.msra.mxu1 %v1881_v12  ;;  %v550_v12 = vld [vmem:[%s2296_s22 + $0x750] sm:$0xff] }
  0xe6   : > { %2138 = vmatpush1.bf16.msra.mxu0 %v2137_v13  ;;  %1884 = vmatprep.subr.bf16.mxu1 %v1883_v14  ;;  %v804_v13 = vld [vmem:[%s2296_s22 + $0xf40] sm:$0xff]  ;;  %v2159_v14 = vpack.c.bf16 %v807_v7, %v805_v6  ;;  %v1905_v20 = vpack.c.bf16 %v550_v12, %v548_v11  ;;  %v1923_v6 = vpack.c.bf16 %v571_v1, %v569_v0  ;;  %v826_v11 = vld [vmem:[%s2296_s22 + $0xff0] sm:$0xff] }
  0xe7   : > { %2140 = vmatprep.subr.bf16.mxu0 %v2139_v18  ;;  %v809_v18 = vld [vmem:[%s2296_s22 + $0xf68] sm:$0xff]  ;;  %v2161_v21 = vpack.c.bf16 %v806_v15, %v804_v13  ;;  %v568_v7 = vld [vmem:[%s2296_s22 + $0x7e0] sm:$0xff]  ;;  %v314_v15 = vld [vmem:[%s2394_s26 + $0x70] sm:$0xff] }
  0xe9   : > { %1886 = vmatpush1.bf16.msra.mxu1 %v1885_v24  ;;  %v554_v24 = vld [vmem:[%s2296_s22 + $0x770] sm:$0xff] }
  0xea   : > { %2142 = vmatpush1.bf16.msra.mxu0 %v2141_v25  ;;  %1888 = vmatprep.subr.bf16.mxu1 %v1887_v26  ;;  %v808_v25 = vld [vmem:[%s2296_s22 + $0xf60] sm:$0xff]  ;;  %v2163_v26 = vpack.c.bf16 %v811_v19, %v809_v18  ;;  %v1909_v32 = vpack.c.bf16 %v554_v24, %v552_v23 }
  0xeb   : > { %2144 = vmatprep.subr.bf16.mxu0 %v2143_v30  ;;  %v813_v30 = vld [vmem:[%s2296_s22 + $0xf88] sm:$0xff]  ;;  %v2165_v33 = vpack.c.bf16 %v810_v27, %v808_v25 }
  0xed   : > { %1890 = vmatpush1.bf16.msra.mxu1 %v1889_v36  ;;  %v558_v36 = vld [vmem:[%s2296_s22 + $0x790] sm:$0xff] }
  0xee   : > { %2146 = vmatpush1.bf16.msra.mxu0 %v2145_v37  ;;  %1892 = vmatprep.subr.bf16.mxu1 %v1891_v38  ;;  %v812_v37 = vld [vmem:[%s2296_s22 + $0xf80] sm:$0xff]  ;;  %v2167_v38 = vpack.c.bf16 %v815_v31, %v813_v30  ;;  %v1913_v44 = vpack.c.bf16 %v558_v36, %v556_v35  ;;  %v1414_v30 = vunpack.c.l.s4 %v2246_v29  ;;  %v1416_v31 = vlaneseq }
  0xef   : > { %2148 = vmatprep.subr.bf16.mxu0 %v2147_v42  ;;  %v817_v42 = vld [vmem:[%s2296_s22 + $0xfa8] sm:$0xff]  ;;  %v2169_v45 = vpack.c.bf16 %v814_v39, %v812_v37 }
  0xf0   : > { %v1415_v40 = vunpack.c.0.s8 %v1414_v30  ;;  %v1417_v41 = vshrl.u32 %v1416_v31, 7  ;;  %vm1430_vm0 = vcmp.lt.s32.totalorder %v1416_v31, 256 }
  0xf1   : > { %1894 = vmatpush1.bf16.msra.mxu1 %v1893_v48  ;;  %v562_v48 = vld [vmem:[%s2296_s22 + $0x7b0] sm:$0xff] }
  0xf2   : > { %2150 = vmatpush1.bf16.msra.mxu0 %v2149_v49  ;;  %1896 = vmatprep.subr.bf16.mxu1 %v1895_v50  ;;  %v816_v49 = vld [vmem:[%s2296_s22 + $0xfa0] sm:$0xff]  ;;  %v2171_v50 = vpack.c.bf16 %v819_v43, %v817_v42  ;;  %v1917_v56 = vpack.c.bf16 %v562_v48, %v560_v47 }
  0xf3   : > { %2152 = vmatprep.subr.bf16.mxu0 %v2151_v54  ;;  %v821_v54 = vld [vmem:[%s2296_s22 + $0xfc8] sm:$0xff]  ;;  %v2173_v57 = vpack.c.bf16 %v818_v51, %v816_v49 }
  0xf5   : > { %1898 = vmatpush1.bf16.msra.mxu1 %v1897_v60  ;;  %v566_v60 = vld [vmem:[%s2296_s22 + $0x7d0] sm:$0xff] }
  0xf6   : > { %2154 = vmatpush1.bf16.msra.mxu0 %v2153_v61  ;;  %1900 = vmatprep.subr.bf16.mxu1 %v1899_v62  ;;  %v820_v61 = vld [vmem:[%s2296_s22 + $0xfc0] sm:$0xff]  ;;  %v2175_v62 = vpack.c.bf16 %v823_v55, %v821_v54  ;;  %v1921_v4 = vpack.c.bf16 %v566_v60, %v564_v59 }
  0xf7   : > { %2156 = vmatprep.subr.bf16.mxu0 %v2155_v2  ;;  %v825_v2 = vld [vmem:[%s2296_s22 + $0xfe8] sm:$0xff]  ;;  %v2177_v5 = vpack.c.bf16 %v822_v63, %v820_v61 }
  0xf9   : > { %1902 = vmatpush1.bf16.msra.mxu1 %v1901_v8  ;;  %v570_v8 = vld [vmem:[%s2296_s22 + $0x7f0] sm:$0xff] }
  0xfa   : > { %2158 = vmatpush1.bf16.msra.mxu0 %v2157_v9  ;;  %1904 = vmatprep.subr.bf16.mxu1 %v1903_v10  ;;  %v2179_v9 = vpack.c.bf16 %v827_v3, %v825_v2  ;;  %v824_v10 = vld [vmem:[%s2296_s22 + $0xfe0] sm:$0xff]  ;;  %v1925_v12 = vpack.c.bf16 %v570_v8, %v568_v7 }
  0xfb   : > { %2160 = vmatprep.subr.bf16.mxu0 %v2159_v14  ;;  %v2181_v13 = vpack.c.bf16 %v826_v11, %v824_v10  ;;  %v306_v14 = vld [vmem:[%s2394_s26 + $0x30] sm:$0xff] }
  0xfd   : > { %1906 = vmatpush1.bf16.msra.mxu1 %v1905_v20 }
  0xfe   : > { %2162 = vmatpush1.bf16.msra.mxu0 %v2161_v21  ;;  %1908 = vmatprep.subr.bf16.mxu1 %v1907_v22 }
  0xff   : > { %2164 = vmatprep.subr.bf16.mxu0 %v2163_v26 }
 0x101   : > { %1910 = vmatpush1.bf16.msra.mxu1 %v1909_v32 }
 0x102   : > { %2166 = vmatpush1.bf16.msra.mxu0 %v2165_v33  ;;  %1912 = vmatprep.subr.bf16.mxu1 %v1911_v34 }
 0x103   : > { %2168 = vmatprep.subr.bf16.mxu0 %v2167_v38 }
 0x105   : > { %1914 = vmatpush1.bf16.msra.mxu1 %v1913_v44 }
 0x106   : > { %2170 = vmatpush1.bf16.msra.mxu0 %v2169_v45  ;;  %1916 = vmatprep.subr.bf16.mxu1 %v1915_v46 }
 0x107   : > { %2172 = vmatprep.subr.bf16.mxu0 %v2171_v50  ;;  %v1418_v50 = vsub.s32 %v1415_v40, %v1417_v41 }
 0x109   : > { %1918 = vmatpush1.bf16.msra.mxu1 %v1917_v56 }
 0x10a   : > { %2174 = vmatpush1.bf16.msra.mxu0 %v2173_v57  ;;  %1920 = vmatprep.subr.bf16.mxu1 %v1919_v58 }
 0x10b   : > { %2176 = vmatprep.subr.bf16.mxu0 %v2175_v62 }
 0x10d   : > { %1922 = vmatpush1.bf16.msra.mxu1 %v1921_v4 }
 0x10e   : > { %2178 = vmatpush1.bf16.msra.mxu0 %v2177_v5  ;;  %1924 = vmatprep.subr.bf16.mxu1 %v1923_v6 }
 0x10f   : > { %2180 = vmatprep.subr.bf16.mxu0 %v2179_v9 }
 0x111   : > { %1926 = vmatpush1.bf16.msra.mxu1 %v1925_v12 }
 0x112   : > { %2182 = vmatpush1.bf16.msra.mxu0 %v2181_v13 }
 0x114   : > { %1106 = vmatmul.mubr.f32.vlgmr.msra.gmra.mrb[0].mxu1 %v306_v14 }
 0x115   : > { %1390 = vmatmul.mubr.f32.vlgmr.msra.gmra.mrb[0].mxu0 %v314_v15 }
 0x1e7   : > { %v1107_v16 = vpop.f32.mrb[0].mxu1 }
 0x1e8   : > { %v1391_v17 = vpop.f32.mrb[0].mxu0  ;;  %v1109_v18 = vpop.f32.mrb[1].mxu1 }
 0x1e9   : > { %v2183_v19 = vadd.f32 %v1391_v17, %v1107_v16  ;;  %v1393_v20 = vpop.f32.mrb[1].mxu0 }
 0x1ea   : > { %v2184_v21 = vadd.f32 %v1393_v20, %v1109_v18 }
 0x1eb   : > { %1396 = vst [vmem:[%s280_s30] sm:$0xff] %v2183_v19  ;;  %v1398_v22 = vrot.slane %v2183_v19, 4  ;;  %v1433_v23 = vmul.f32 %v2183_v19, %v2183_v19 }
 0x1ec   : > { %1397 = vst [vmem:[%s280_s30 + $0x8] sm:$0xff] %v2184_v21  ;;  %v1404_v24 = vrot.slane %v2184_v21, 4  ;;  %v1434_v25 = vmul.f32 %v2184_v21, %v2184_v21 }
 0x1ed   : > { %v1399_v26 = vadd.f32 %v2183_v19, %v1398_v22  ;;  %v1435_v27 = vrot.slane %v1433_v23, 4 }
 0x1ee   : > { %v1405_v28 = vadd.f32 %v2184_v21, %v1404_v24  ;;  %v1441_v32 = vrot.slane %v1434_v25, 4 }
 0x1ef   : > { %v1400_v33 = vrot.slane %v1399_v26, 2  ;;  %v1436_v34 = vadd.f32 %v1435_v27, %v1433_v23 }
 0x1f0   : > { %v1406_v35 = vrot.slane %v1405_v28, 2  ;;  %v1442_v36 = vadd.f32 %v1441_v32, %v1434_v25 }
 0x1f1   : > { %v1401_v37 = vadd.f32 %v1400_v33, %v1399_v26  ;;  %v1437_v38 = vrot.slane %v1436_v34, 2 }
 0x1f2   : > { %v1407_v39 = vadd.f32 %v1406_v35, %v1405_v28  ;;  %v1443_v42 = vrot.slane %v1442_v36, 2 }
 0x1f3   : > { %v1402_v43 = vrot.slane %v1401_v37, 1  ;;  %v1438_v44 = vadd.f32 %v1437_v38, %v1436_v34 }
 0x1f4   : > { %v1408_v45 = vrot.slane %v1407_v39, 1  ;;  %v1444_v46 = vadd.f32 %v1443_v42, %v1442_v36 }
 0x1f5   : > { %v1403_v47 = vadd.f32 %v1402_v43, %v1401_v37  ;;  %v1439_v48 = vrot.slane %v1438_v44, 1 }
 0x1f6   : > { %v1409_v49 = vadd.f32 %v1408_v45, %v1407_v39  ;;  %v1445_v51 = vrot.slane %v1444_v46, 1 }
 0x1f7   : > { %v1440_v52 = vadd.f32 %v1439_v48, %v1438_v44 }
 0x1f8   : > { %v1412_v53 = vcombine.low %v1403_v47, %v1409_v49  ;;  %v1446_v54 = vadd.f32 %v1445_v51, %v1444_v46 }
 0x1fa   : > { %v1419_v55 = vrot.slane %v1412_v53, %v1418_v50  ;;  %v1449_v56 = vcombine.low %v1440_v52, %v1446_v54 }
 0x1fc   : > { %v1426_v57 = vrot.slane %v1419_v55, %v1418_v50  ;;  %v1456_v58 = vrot.slane %v1449_v56, %v1418_v50 }
 0x1fe   : > { %1432 = vst.msk [vmem:[%s289_s8] sm:$0x3] %vm1430_vm0, %v1426_v57  ;;  %v1463_v59 = vrot.slane %v1456_v58, %v1418_v50 }
 0x200   : > { %1465 = vst.msk [vmem:[%s298_s11] sm:$0x3] %vm1430_vm0, %v1463_v59 }
 0x201 PF: > { %s15_s17 = sadd.s32 1, %s2244_s17   ;;  %s2857_s15 = smov %s2240_s16 }
 0x202   : > { %p12_p5 = scmp.ge.s32.totalorder %s15_s17, 6   ;;  %s2858_s16 = smov %s2860_s18 }
 0x204   :  { %14 = sbr.rel (!%p12_p5) target bundleno = 2 (0x2), region = 85 }

// kernel: generator_forward.12
= control target key start
LH: loop header
LB: loop body
LE: loop exit
PB: predicated region body
PF: predicated region fallthrough
CT: control target
= control target key end

     0   :  { %v24_v0 = vlaneseq  ;;  %s156_s1 = inlined_call_operand.vmem [shape: f32[1,256], index: 1, kind: input, shape index: {}]   ;;  %s157_s2 = inlined_call_operand.vmem [shape: f32[1,256], index: 2, kind: input, shape index: {}]   ;;  %s158_s0 = inlined_call_operand.vmem [shape: f32[32,256], index: 0, kind: input, shape index: {}]   ;;  %s159_s3 = inlined_call_operand.vmem [shape: f32[32,256], index: 3, kind: output, shape index: {}]  }
   0x1   :  { %v22_v2 = vld [vmem:[%s156_s1] sm:$0x3]  ;;  %v15_v6 = vld [vmem:[%s158_s0 + $0x8] sm:$0xff]  ;;  %v16_v8 = vld [vmem:[%s158_s0 + $0x10] sm:$0xff] }
   0x2   :  { %v25_v1 = vshrl.u32 %v24_v0, 7  ;;  %v42_v3 = vld [vmem:[%s157_s2] sm:$0x3]  ;;  %v17_v9 = vld [vmem:[%s158_s0 + $0x18] sm:$0xff]  ;;  %v19_v15 = vld [vmem:[%s158_s0 + $0x28] sm:$0xff] }
   0x3   :  { %v14_v4 = vld [vmem:[%s158_s0] sm:$0xff]  ;;  %v20_v16 = vld [vmem:[%s158_s0 + $0x30] sm:$0xff]  ;;  %v21_v17 = vld [vmem:[%s158_s0 + $0x38] sm:$0xff] }
   0x4   :  { %v26_v5 = vsub.s32 0, %v25_v1  ;;  %v30_v7 = vsub.s32 1, %v25_v1  ;;  %v18_v10 = vld [vmem:[%s158_s0 + $0x20] sm:$0xff] }
   0x6   :  { %v27_v11 = vrot.slane %v22_v2, %v26_v5  ;;  %v47_v12 = vrot.slane %v42_v3, %v26_v5  ;;  %v31_v13 = vrot.slane %v22_v2, %v30_v7  ;;  %v51_v14 = vrot.slane %v42_v3, %v30_v7 }
   0x8   :  { %v34_v18 = vmul.f32 %v27_v11, %v14_v4  ;;  %v35_v19 = vmul.f32 %v31_v13, %v15_v6  ;;  %v36_v20 = vmul.f32 %v27_v11, %v16_v8  ;;  %v37_v21 = vmul.f32 %v31_v13, %v17_v9 }
   0x9   :  { %v38_v22 = vmul.f32 %v27_v11, %v18_v10  ;;  %v39_v23 = vmul.f32 %v31_v13, %v19_v15  ;;  %v40_v24 = vmul.f32 %v27_v11, %v20_v16  ;;  %v41_v25 = vmul.f32 %v31_v13, %v21_v17 }
   0xa   :  { %v54_v26 = vadd.f32 %v47_v12, %v34_v18  ;;  %v55_v27 = vadd.f32 %v51_v14, %v35_v19  ;;  %v56_v28 = vadd.f32 %v47_v12, %v36_v20  ;;  %v57_v29 = vadd.f32 %v51_v14, %v37_v21 }
   0xb   :  { %v58_v30 = vadd.f32 %v47_v12, %v38_v22  ;;  %v59_v31 = vadd.f32 %v51_v14, %v39_v23  ;;  %v60_v32 = vadd.f32 %v47_v12, %v40_v24  ;;  %v61_v33 = vadd.f32 %v51_v14, %v41_v25 }
   0xc   :  { %v62_v34 = vmax.f32 %v54_v26, 0.0  ;;  %v63_v35 = vmax.f32 %v55_v27, 0.0  ;;  %v64_v36 = vmax.f32 %v56_v28, 0.0  ;;  %v65_v37 = vmax.f32 %v57_v29, 0.0 }
   0xd   :  { %v66_v38 = vmax.f32 %v58_v30, 0.0  ;;  %v67_v39 = vmax.f32 %v59_v31, 0.0  ;;  %v68_v40 = vmax.f32 %v60_v32, 0.0  ;;  %v69_v41 = vmax.f32 %v61_v33, 0.0 }
   0xe   :  { %70 = vst [vmem:[%s159_s3] sm:$0xff] %v62_v34  ;;  %71 = vst [vmem:[%s159_s3 + $0x8] sm:$0xff] %v63_v35 }
   0xf   :  { %72 = vst [vmem:[%s159_s3 + $0x10] sm:$0xff] %v64_v36  ;;  %73 = vst [vmem:[%s159_s3 + $0x18] sm:$0xff] %v65_v37 }
  0x10   :  { %74 = vst [vmem:[%s159_s3 + $0x20] sm:$0xff] %v66_v38  ;;  %75 = vst [vmem:[%s159_s3 + $0x28] sm:$0xff] %v67_v39 }
  0x11   :  { %76 = vst [vmem:[%s159_s3 + $0x30] sm:$0xff] %v68_v40  ;;  %77 = vst [vmem:[%s159_s3 + $0x38] sm:$0xff] %v69_v41 }

// kernel: generator_forward.13
= control target key start
LH: loop header
LB: loop body
LE: loop exit
PB: predicated region body
PF: predicated region fallthrough
CT: control target
= control target key end

     0   :  { %s1368_s15 = smov 0   ;;  %s1370_s16 = smov 0   ;;  %s1587_s0 = inlined_call_operand.vmem [shape: f32[4,32,1024], index: 0, kind: input, shape index: {}]   ;;  %s1588_s1 = inlined_call_operand.vmem [shape: f32[4,1024,128], index: 1, kind: input, shape index: {}]   ;;  %s1589_s2 = inlined_call_operand.vmem [shape: f32[4,32,128], index: 2, kind: output, shape index: {0}]   ;;  %s1590_s3 = inlined_call_operand.vmem [shape: f32[4,1,128], index: 3, kind: output, shape index: {1}]   ;;  %s1591_s4 = inlined_call_operand.vmem [shape: f32[4,1,128], index: 4, kind: output, shape index: {2}]  }
   0x1   :  { %s1372_s17 = smov 0  }
   0x2 LB: > { %s27_s18 = sadd.s32 1, %s1337_s16  ;;  %p979_p0 = scmp.ge.s32.totalorder %s1341_s17, 1  ;;  %s1341_s17 = sphi %s1372_s17, %s15_s17   ;;  %s1337_s16 = sphi %s1370_s16, %s1593_s16   ;;  %s1333_s15 = sphi %s1368_s15, %s1592_s15  }
   0x3   : > { %p29_p1 = scmp.ge.s32.totalorder %s27_s18, 4  ;;  %p200_p2 = scmp.lt.s32.totalorder %s1341_s17, 5 }
   0x5   : > { %s1595_s18 = smov (%p29_p1, %s27_s18), 0  ;;  %p201_p3 = pnand %p979_p0, %p200_p2 }
   0x6   : > { %p249_p4 = scmp.lt.s32.totalorder (!%p201_p3), %s1333_s15, 3 }
   0x7   : > { %204 = sbr.rel (%p201_p3) target bundleno = 333 (0x14d), region = 28 }
   0xe   : > { %s1597_s15 = smov (!%p249_p4, %s1333_s15), 3 }
   0xf   : > { %s989_s19 = sshll.u32 %s1597_s15, 10  ;;  %s988_s23 = sshll.u32 %s1597_s15, 8 }
  0x10   : > { %s1392_s22 = scalar_lea.vmem %s1588_s1, %s989_s19  ;;  %s1448_s26 = scalar_lea.vmem %s1587_s0, %s988_s23 }
  0x11   : > { %v330_v0 = vld [vmem:[%s1392_s22 + $0x80] sm:$0xff]  ;;  %v331_v1 = vld [vmem:[%s1392_s22 + $0x88] sm:$0xff]  ;;  %v332_v11 = vld [vmem:[%s1392_s22 + $0x90] sm:$0xff]  ;;  %s990_s27 = sshll.u32 %s1597_s15, 5  ;;  %s275_s7 = scalar_lea.vmem %s1590_s3, %s1597_s15 }
  0x12   : > { %v362_v2 = vld [vmem:[%s1392_s22 + $0x180] sm:$0xff]  ;;  %v1167_v3 = vpack.c.bf16 %v331_v1, %v330_v0  ;;  %v363_v4 = vld [vmem:[%s1392_s22 + $0x188] sm:$0xff]  ;;  %v333_v13 = vld [vmem:[%s1392_s22 + $0x98] sm:$0xff]  ;;  %s1564_s30 = scalar_lea.vmem %s1589_s2, %s990_s27  ;;  %s281_s10 = scalar_lea.vmem %s1591_s4, %s1597_s15 }
  0x13   : > { %v314_v5 = vld [vmem:[%s1392_s22] sm:$0xff]  ;;  %v315_v6 = vld [vmem:[%s1392_s22 + $0x8] sm:$0xff]  ;;  %v1199_v7 = vpack.c.bf16 %v363_v4, %v362_v2  ;;  %v364_v14 = vld [vmem:[%s1392_s22 + $0x190] sm:$0xff]  ;;  %v1171_v16 = vpack.c.bf16 %v333_v13, %v332_v11 }
  0x14   : > { %v1169_v8 = vpack.c.bf16 %v315_v6, %v314_v5  ;;  %v346_v9 = vld [vmem:[%s1392_s22 + $0x100] sm:$0xff]  ;;  %v347_v10 = vld [vmem:[%s1392_s22 + $0x108] sm:$0xff]  ;;  %1168 = vmatprep.subr.bf16.mxu0 %v1167_v3  ;;  %v365_v15 = vld [vmem:[%s1392_s22 + $0x198] sm:$0xff] }
  0x15   : > { %v1201_v12 = vpack.c.bf16 %v347_v10, %v346_v9  ;;  %1200 = vmatprep.subr.bf16.mxu1 %v1199_v7  ;;  %v1203_v17 = vpack.c.bf16 %v365_v15, %v364_v14  ;;  %v316_v18 = vld [vmem:[%s1392_s22 + $0x10] sm:$0xff]  ;;  %v317_v19 = vld [vmem:[%s1392_s22 + $0x18] sm:$0xff]  ;;  %v334_v23 = vld [vmem:[%s1392_s22 + $0xa0] sm:$0xff] }
  0x16   : > { %1170 = vmatpush3.bf16.msra.mxu0 %v1169_v8  ;;  %v348_v20 = vld [vmem:[%s1392_s22 + $0x110] sm:$0xff]  ;;  %v1173_v21 = vpack.c.bf16 %v317_v19, %v316_v18  ;;  %v349_v22 = vld [vmem:[%s1392_s22 + $0x118] sm:$0xff]  ;;  %v335_v24 = vld [vmem:[%s1392_s22 + $0xa8] sm:$0xff] }
  0x17   : > { %1202 = vmatpush3.bf16.msra.mxu1 %v1201_v12  ;;  %1172 = vmatprep.subr.bf16.mxu0 %v1171_v16  ;;  %v1205_v25 = vpack.c.bf16 %v349_v22, %v348_v20  ;;  %v1175_v26 = vpack.c.bf16 %v335_v24, %v334_v23  ;;  %v366_v27 = vld [vmem:[%s1392_s22 + $0x1a0] sm:$0xff]  ;;  %v367_v28 = vld [vmem:[%s1392_s22 + $0x1a8] sm:$0xff]  ;;  %v336_v35 = vld [vmem:[%s1392_s22 + $0xb0] sm:$0xff] }
  0x18   : > { %1204 = vmatprep.subr.bf16.mxu1 %v1203_v17  ;;  %v318_v29 = vld [vmem:[%s1392_s22 + $0x20] sm:$0xff]  ;;  %v1207_v30 = vpack.c.bf16 %v367_v28, %v366_v27  ;;  %v319_v31 = vld [vmem:[%s1392_s22 + $0x28] sm:$0xff]  ;;  %v337_v36 = vld [vmem:[%s1392_s22 + $0xb8] sm:$0xff] }
  0x19   : > { %v350_v32 = vld [vmem:[%s1392_s22 + $0x120] sm:$0xff]  ;;  %v351_v33 = vld [vmem:[%s1392_s22 + $0x128] sm:$0xff]  ;;  %v1177_v34 = vpack.c.bf16 %v319_v31, %v318_v29  ;;  %v368_v37 = vld [vmem:[%s1392_s22 + $0x1b0] sm:$0xff]  ;;  %v1179_v39 = vpack.c.bf16 %v337_v36, %v336_v35 }
  0x1a   : > { %1174 = vmatpush3.bf16.msra.mxu0 %v1173_v21  ;;  %v1209_v38 = vpack.c.bf16 %v351_v33, %v350_v32  ;;  %v369_v40 = vld [vmem:[%s1392_s22 + $0x1b8] sm:$0xff]  ;;  %v320_v41 = vld [vmem:[%s1392_s22 + $0x30] sm:$0xff]  ;;  %v338_v46 = vld [vmem:[%s1392_s22 + $0xc0] sm:$0xff] }
  0x1b   : > { %1206 = vmatpush3.bf16.msra.mxu1 %v1205_v25  ;;  %1176 = vmatprep.subr.bf16.mxu0 %v1175_v26  ;;  %v321_v42 = vld [vmem:[%s1392_s22 + $0x38] sm:$0xff]  ;;  %v1211_v43 = vpack.c.bf16 %v369_v40, %v368_v37  ;;  %v352_v44 = vld [vmem:[%s1392_s22 + $0x130] sm:$0xff]  ;;  %v339_v47 = vld [vmem:[%s1392_s22 + $0xc8] sm:$0xff] }
  0x1c   : > { %1208 = vmatprep.subr.bf16.mxu1 %v1207_v30  ;;  %v353_v45 = vld [vmem:[%s1392_s22 + $0x138] sm:$0xff]  ;;  %v370_v48 = vld [vmem:[%s1392_s22 + $0x1c0] sm:$0xff]  ;;  %v371_v49 = vld [vmem:[%s1392_s22 + $0x1c8] sm:$0xff]  ;;  %v1181_v50 = vpack.c.bf16 %v321_v42, %v320_v41  ;;  %v1183_v52 = vpack.c.bf16 %v339_v47, %v338_v46 }
  0x1d   : > { %v1213_v51 = vpack.c.bf16 %v353_v45, %v352_v44  ;;  %v322_v53 = vld [vmem:[%s1392_s22 + $0x40] sm:$0xff]  ;;  %v323_v54 = vld [vmem:[%s1392_s22 + $0x48] sm:$0xff]  ;;  %v1215_v56 = vpack.c.bf16 %v371_v49, %v370_v48  ;;  %v340_v58 = vld [vmem:[%s1392_s22 + $0xd0] sm:$0xff] }
  0x1e   : > { %1178 = vmatpush3.bf16.msra.mxu0 %v1177_v34  ;;  %v354_v55 = vld [vmem:[%s1392_s22 + $0x140] sm:$0xff]  ;;  %v355_v57 = vld [vmem:[%s1392_s22 + $0x148] sm:$0xff]  ;;  %v341_v59 = vld [vmem:[%s1392_s22 + $0xd8] sm:$0xff]  ;;  %v1185_v62 = vpack.c.bf16 %v323_v54, %v322_v53 }
  0x1f   : > { %1210 = vmatpush3.bf16.msra.mxu1 %v1209_v38  ;;  %1180 = vmatprep.subr.bf16.mxu0 %v1179_v39  ;;  %v372_v60 = vld [vmem:[%s1392_s22 + $0x1d0] sm:$0xff]  ;;  %v373_v61 = vld [vmem:[%s1392_s22 + $0x1d8] sm:$0xff]  ;;  %v1217_v63 = vpack.c.bf16 %v355_v57, %v354_v55  ;;  %v1187_v0 = vpack.c.bf16 %v341_v59, %v340_v58  ;;  %v342_v6 = vld [vmem:[%s1392_s22 + $0xe0] sm:$0xff] }
  0x20   : > { %1212 = vmatprep.subr.bf16.mxu1 %v1211_v43  ;;  %v324_v1 = vld [vmem:[%s1392_s22 + $0x50] sm:$0xff]  ;;  %v325_v2 = vld [vmem:[%s1392_s22 + $0x58] sm:$0xff]  ;;  %v1219_v4 = vpack.c.bf16 %v373_v61, %v372_v60  ;;  %v343_v7 = vld [vmem:[%s1392_s22 + $0xe8] sm:$0xff] }
  0x21   : > { %v356_v3 = vld [vmem:[%s1392_s22 + $0x150] sm:$0xff]  ;;  %v357_v5 = vld [vmem:[%s1392_s22 + $0x158] sm:$0xff]  ;;  %v374_v8 = vld [vmem:[%s1392_s22 + $0x1e0] sm:$0xff]  ;;  %v1189_v10 = vpack.c.bf16 %v325_v2, %v324_v1  ;;  %v1191_v14 = vpack.c.bf16 %v343_v7, %v342_v6 }
  0x22   : > { %1182 = vmatpush3.bf16.msra.mxu0 %v1181_v50  ;;  %v375_v9 = vld [vmem:[%s1392_s22 + $0x1e8] sm:$0xff]  ;;  %v326_v11 = vld [vmem:[%s1392_s22 + $0x60] sm:$0xff]  ;;  %v1221_v13 = vpack.c.bf16 %v357_v5, %v356_v3  ;;  %v285_v17 = vld [vmem:[%s1448_s26 + $0x18] sm:$0xff] }
  0x23   : > { %1214 = vmatpush3.bf16.msra.mxu1 %v1213_v51  ;;  %1184 = vmatprep.subr.bf16.mxu0 %v1183_v52  ;;  %v327_v12 = vld [vmem:[%s1392_s22 + $0x68] sm:$0xff]  ;;  %v358_v15 = vld [vmem:[%s1392_s22 + $0x160] sm:$0xff]  ;;  %v1223_v18 = vpack.c.bf16 %v375_v9, %v374_v8  ;;  %v344_v20 = vld [vmem:[%s1392_s22 + $0xf0] sm:$0xff] }
  0x24   : > { %1216 = vmatprep.subr.bf16.mxu1 %v1215_v56  ;;  %v283_v16 = vld [vmem:[%s1448_s26 + $0x8] sm:$0xff]  ;;  %v345_v21 = vld [vmem:[%s1392_s22 + $0xf8] sm:$0xff]  ;;  %v376_v22 = vld [vmem:[%s1392_s22 + $0x1f0] sm:$0xff]  ;;  %591 = vmatprep.mubr.f32.mxu1 %v285_v17  ;;  %v1193_v24 = vpack.c.bf16 %v327_v12, %v326_v11 }
  0x25   : > { %v359_v19 = vld [vmem:[%s1392_s22 + $0x168] sm:$0xff]  ;;  %506 = vmatprep.mubr.f32.mxu0 %v283_v16  ;;  %v377_v23 = vld [vmem:[%s1392_s22 + $0x1f8] sm:$0xff]  ;;  %v1195_v26 = vpack.c.bf16 %v345_v21, %v344_v20  ;;  %v328_v27 = vld [vmem:[%s1392_s22 + $0x70] sm:$0xff] }
  0x26   : > { %1186 = vmatpush3.bf16.msra.mxu0 %v1185_v62  ;;  %v1225_v25 = vpack.c.bf16 %v359_v19, %v358_v15  ;;  %v329_v28 = vld [vmem:[%s1392_s22 + $0x78] sm:$0xff]  ;;  %v360_v29 = vld [vmem:[%s1392_s22 + $0x170] sm:$0xff]  ;;  %v1227_v30 = vpack.c.bf16 %v377_v23, %v376_v22  ;;  %v394_v32 = vld [vmem:[%s1392_s22 + $0x280] sm:$0xff] }
  0x27   : > { %1218 = vmatpush3.bf16.msra.mxu1 %v1217_v63  ;;  %1188 = vmatprep.subr.bf16.mxu0 %v1187_v0  ;;  %v361_v31 = vld [vmem:[%s1392_s22 + $0x178] sm:$0xff]  ;;  %v395_v33 = vld [vmem:[%s1392_s22 + $0x288] sm:$0xff]  ;;  %v426_v34 = vld [vmem:[%s1392_s22 + $0x380] sm:$0xff]  ;;  %v1197_v36 = vpack.c.bf16 %v329_v28, %v328_v27 }
  0x28   : > { %1220 = vmatprep.subr.bf16.mxu1 %v1219_v4  ;;  %v427_v35 = vld [vmem:[%s1392_s22 + $0x388] sm:$0xff]  ;;  %v1229_v37 = vpack.c.bf16 %v361_v31, %v360_v29  ;;  %v1231_v38 = vpack.c.bf16 %v395_v33, %v394_v32  ;;  %v378_v39 = vld [vmem:[%s1392_s22 + $0x200] sm:$0xff]  ;;  %v396_v44 = vld [vmem:[%s1392_s22 + $0x290] sm:$0xff] }
  0x29   : > { %v379_v40 = vld [vmem:[%s1392_s22 + $0x208] sm:$0xff]  ;;  %v410_v41 = vld [vmem:[%s1392_s22 + $0x300] sm:$0xff]  ;;  %v1263_v42 = vpack.c.bf16 %v427_v35, %v426_v34  ;;  %v397_v45 = vld [vmem:[%s1392_s22 + $0x298] sm:$0xff] }
  0x2a   : > { %1190 = vmatpush3.bf16.msra.mxu0 %v1189_v10  ;;  %v411_v43 = vld [vmem:[%s1392_s22 + $0x308] sm:$0xff]  ;;  %v428_v46 = vld [vmem:[%s1392_s22 + $0x390] sm:$0xff]  ;;  %v429_v47 = vld [vmem:[%s1392_s22 + $0x398] sm:$0xff]  ;;  %v1233_v50 = vpack.c.bf16 %v379_v40, %v378_v39  ;;  %v1235_v52 = vpack.c.bf16 %v397_v45, %v396_v44 }
  0x2b   : > { %1222 = vmatpush3.bf16.msra.mxu1 %v1221_v13  ;;  %1192 = vmatprep.subr.bf16.mxu0 %v1191_v14  ;;  %v282_v48 = vld [vmem:[%s1448_s26] sm:$0xff]  ;;  %v284_v49 = vld [vmem:[%s1448_s26 + $0x10] sm:$0xff]  ;;  %v1265_v51 = vpack.c.bf16 %v411_v43, %v410_v41  ;;  %v381_v54 = vld [vmem:[%s1392_s22 + $0x218] sm:$0xff]  ;;  %v1267_v56 = vpack.c.bf16 %v429_v47, %v428_v46 }
  0x2c   : > { %1224 = vmatprep.subr.bf16.mxu1 %v1223_v18  ;;  %v380_v53 = vld [vmem:[%s1392_s22 + $0x210] sm:$0xff]  ;;  %v413_v57 = vld [vmem:[%s1392_s22 + $0x318] sm:$0xff]  ;;  %v398_v58 = vld [vmem:[%s1392_s22 + $0x2a0] sm:$0xff] }
  0x2d   : > { %v412_v55 = vld [vmem:[%s1392_s22 + $0x310] sm:$0xff]  ;;  %v399_v59 = vld [vmem:[%s1392_s22 + $0x2a8] sm:$0xff]  ;;  %v430_v60 = vld [vmem:[%s1392_s22 + $0x3a0] sm:$0xff]  ;;  %v1237_v63 = vpack.c.bf16 %v381_v54, %v380_v53 }
  0x2e   : > { %1194 = vmatpush3.bf16.msra.mxu0 %v1193_v24  ;;  %v431_v61 = vld [vmem:[%s1392_s22 + $0x3a8] sm:$0xff]  ;;  %v382_v0 = vld [vmem:[%s1392_s22 + $0x220] sm:$0xff]  ;;  %v293_v1 = vld [vmem:[%s1448_s26 + $0x58] sm:$0xff]  ;;  %v1269_v3 = vpack.c.bf16 %v413_v57, %v412_v55  ;;  %v1239_v4 = vpack.c.bf16 %v399_v59, %v398_v58 }
  0x2f   : > { %1226 = vmatpush3.bf16.msra.mxu1 %v1225_v25  ;;  %1196 = vmatprep.subr.bf16.mxu0 %v1195_v26  ;;  %v291_v62 = vld [vmem:[%s1448_s26 + $0x48] sm:$0xff]  ;;  %v290_v2 = vld [vmem:[%s1448_s26 + $0x40] sm:$0xff]  ;;  %v292_v7 = vld [vmem:[%s1448_s26 + $0x50] sm:$0xff]  ;;  %v1271_v8 = vpack.c.bf16 %v431_v61, %v430_v60 }
  0x30   : > { %1228 = vmatprep.subr.bf16.mxu1 %v1227_v30  ;;  %v383_v5 = vld [vmem:[%s1392_s22 + $0x228] sm:$0xff]  ;;  %v414_v6 = vld [vmem:[%s1392_s22 + $0x320] sm:$0xff]  ;;  %v400_v10 = vld [vmem:[%s1392_s22 + $0x2b0] sm:$0xff] }
  0x31   : > { %v415_v9 = vld [vmem:[%s1392_s22 + $0x328] sm:$0xff]  ;;  %v401_v11 = vld [vmem:[%s1392_s22 + $0x2b8] sm:$0xff]  ;;  %v432_v12 = vld [vmem:[%s1392_s22 + $0x3b0] sm:$0xff]  ;;  %v1241_v15 = vpack.c.bf16 %v383_v5, %v382_v0 }
  0x32   : > { %1198 = vmatpush3.bf16.msra.mxu0 %v1197_v36  ;;  %v433_v13 = vld [vmem:[%s1392_s22 + $0x3b8] sm:$0xff]  ;;  %v299_v14 = vld [vmem:[%s1448_s26 + $0x88] sm:$0xff]  ;;  %v384_v16 = vld [vmem:[%s1392_s22 + $0x230] sm:$0xff]  ;;  %v1273_v19 = vpack.c.bf16 %v415_v9, %v414_v6  ;;  %v1243_v20 = vpack.c.bf16 %v401_v11, %v400_v10 }
  0x33   : > { %1230 = vmatpush3.bf16.msra.mxu1 %v1229_v37  ;;  %1232 = vmatprep.subr.bf16.mxu0 %v1231_v38  ;;  %v301_v17 = vld [vmem:[%s1448_s26 + $0x98] sm:$0xff]  ;;  %v298_v18 = vld [vmem:[%s1448_s26 + $0x80] sm:$0xff]  ;;  %v416_v22 = vld [vmem:[%s1392_s22 + $0x330] sm:$0xff]  ;;  %v1275_v24 = vpack.c.bf16 %v433_v13, %v432_v12 }
  0x34   : > { %1264 = vmatprep.subr.bf16.mxu1 %v1263_v42  ;;  %v385_v21 = vld [vmem:[%s1392_s22 + $0x238] sm:$0xff]  ;;  %v300_v23 = vld [vmem:[%s1448_s26 + $0x90] sm:$0xff]  ;;  %v402_v26 = vld [vmem:[%s1392_s22 + $0x2c0] sm:$0xff] }
  0x35   : > { %507 = vmatmul.mubr.f32.vlgmr.msra.gmra.mrb[0].mxu0 %v282_v48  ;;  %v417_v25 = vld [vmem:[%s1392_s22 + $0x338] sm:$0xff]  ;;  %v403_v27 = vld [vmem:[%s1392_s22 + $0x2c8] sm:$0xff]  ;;  %v434_v28 = vld [vmem:[%s1392_s22 + $0x3c0] sm:$0xff]  ;;  %v1245_v31 = vpack.c.bf16 %v385_v21, %v384_v16 }
  0x36   : > { %592 = vmatmul.mubr.f32.vlgmr.msra.gmra.mrb[0].mxu1 %v284_v49  ;;  %1234 = vmatpush3.bf16.msra.mxu0 %v1233_v50  ;;  %v435_v29 = vld [vmem:[%s1392_s22 + $0x3c8] sm:$0xff]  ;;  %v386_v32 = vld [vmem:[%s1392_s22 + $0x240] sm:$0xff]  ;;  %v309_v33 = vld [vmem:[%s1448_s26 + $0xd8] sm:$0xff]  ;;  %v1277_v35 = vpack.c.bf16 %v417_v25, %v416_v22  ;;  %v1247_v36 = vpack.c.bf16 %v403_v27, %v402_v26 }
  0x37   : > { %1266 = vmatpush3.bf16.msra.mxu1 %v1265_v51  ;;  %1236 = vmatprep.subr.bf16.mxu0 %v1235_v52  ;;  %v307_v30 = vld [vmem:[%s1448_s26 + $0xc8] sm:$0xff]  ;;  %v306_v34 = vld [vmem:[%s1448_s26 + $0xc0] sm:$0xff]  ;;  %v308_v39 = vld [vmem:[%s1448_s26 + $0xd0] sm:$0xff]  ;;  %v1279_v40 = vpack.c.bf16 %v435_v29, %v434_v28 }
  0x38   : > { %1268 = vmatprep.subr.bf16.mxu1 %v1267_v56  ;;  %511 = vmatprep.mubr.f32.mxu0 %v291_v62  ;;  %v387_v37 = vld [vmem:[%s1392_s22 + $0x248] sm:$0xff]  ;;  %v418_v38 = vld [vmem:[%s1392_s22 + $0x340] sm:$0xff]  ;;  %v404_v42 = vld [vmem:[%s1392_s22 + $0x2d0] sm:$0xff] }
  0x39   : > { %596 = vmatprep.mubr.f32.mxu1 %v293_v1  ;;  %512 = vmatmul.mubr.f32.gmra.mrb[2].mxu0 %v290_v2  ;;  %v419_v41 = vld [vmem:[%s1392_s22 + $0x348] sm:$0xff]  ;;  %v405_v43 = vld [vmem:[%s1392_s22 + $0x2d8] sm:$0xff]  ;;  %v436_v44 = vld [vmem:[%s1392_s22 + $0x3d0] sm:$0xff]  ;;  %v1249_v46 = vpack.c.bf16 %v387_v37, %v386_v32 }
  0x3a   : > { %1238 = vmatpush3.bf16.msra.mxu0 %v1237_v63  ;;  %597 = vmatmul.mubr.f32.gmra.mrb[2].mxu1 %v292_v7  ;;  %v437_v45 = vld [vmem:[%s1392_s22 + $0x3d8] sm:$0xff]  ;;  %v287_v47 = vld [vmem:[%s1448_s26 + $0x28] sm:$0xff]  ;;  %v1281_v49 = vpack.c.bf16 %v419_v41, %v418_v38  ;;  %v1251_v50 = vpack.c.bf16 %v405_v43, %v404_v42  ;;  %v388_v51 = vld [vmem:[%s1392_s22 + $0x250] sm:$0xff] }
  0x3b   : > { %1270 = vmatpush3.bf16.msra.mxu1 %v1269_v3  ;;  %1240 = vmatprep.subr.bf16.mxu0 %v1239_v4  ;;  %v289_v48 = vld [vmem:[%s1448_s26 + $0x38] sm:$0xff]  ;;  %v420_v53 = vld [vmem:[%s1392_s22 + $0x350] sm:$0xff]  ;;  %v1283_v54 = vpack.c.bf16 %v437_v45, %v436_v44  ;;  %v406_v56 = vld [vmem:[%s1392_s22 + $0x2e0] sm:$0xff] }
  0x3c   : > { %1272 = vmatprep.subr.bf16.mxu1 %v1271_v8  ;;  %516 = vmatprep.mubr.f32.mxu0 %v299_v14  ;;  %v389_v52 = vld [vmem:[%s1392_s22 + $0x258] sm:$0xff]  ;;  %v407_v57 = vld [vmem:[%s1392_s22 + $0x2e8] sm:$0xff]  ;;  %v438_v58 = vld [vmem:[%s1392_s22 + $0x3e0] sm:$0xff] }
  0x3d   : > { %601 = vmatprep.mubr.f32.mxu1 %v301_v17  ;;  %517 = vmatmul.mubr.f32.gmra.mrb[4].mxu0 %v298_v18  ;;  %v421_v55 = vld [vmem:[%s1392_s22 + $0x358] sm:$0xff]  ;;  %v439_v59 = vld [vmem:[%s1392_s22 + $0x3e8] sm:$0xff]  ;;  %v1253_v60 = vpack.c.bf16 %v389_v52, %v388_v51  ;;  %v1255_v62 = vpack.c.bf16 %v407_v57, %v406_v56  ;;  %v390_v63 = vld [vmem:[%s1392_s22 + $0x260] sm:$0xff] }
  0x3e   : > { %1242 = vmatpush3.bf16.msra.mxu0 %v1241_v15  ;;  %602 = vmatmul.mubr.f32.gmra.mrb[4].mxu1 %v300_v23  ;;  %v1285_v61 = vpack.c.bf16 %v421_v55, %v420_v53  ;;  %v391_v0 = vld [vmem:[%s1392_s22 + $0x268] sm:$0xff]  ;;  %v422_v1 = vld [vmem:[%s1392_s22 + $0x360] sm:$0xff]  ;;  %v1287_v2 = vpack.c.bf16 %v439_v59, %v438_v58  ;;  %v408_v4 = vld [vmem:[%s1392_s22 + $0x2f0] sm:$0xff] }
  0x3f   : > { %1274 = vmatpush3.bf16.msra.mxu1 %v1273_v19  ;;  %1244 = vmatprep.subr.bf16.mxu0 %v1243_v20  ;;  %v423_v3 = vld [vmem:[%s1392_s22 + $0x368] sm:$0xff]  ;;  %v409_v5 = vld [vmem:[%s1392_s22 + $0x2f8] sm:$0xff]  ;;  %v440_v6 = vld [vmem:[%s1392_s22 + $0x3f0] sm:$0xff]  ;;  %v1257_v8 = vpack.c.bf16 %v391_v0, %v390_v63 }
  0x40   : > { %1276 = vmatprep.subr.bf16.mxu1 %v1275_v24  ;;  %521 = vmatprep.mubr.f32.mxu0 %v307_v30  ;;  %v441_v7 = vld [vmem:[%s1392_s22 + $0x3f8] sm:$0xff]  ;;  %v1289_v9 = vpack.c.bf16 %v423_v3, %v422_v1  ;;  %v1259_v10 = vpack.c.bf16 %v409_v5, %v408_v4  ;;  %v392_v11 = vld [vmem:[%s1392_s22 + $0x270] sm:$0xff]  ;;  %v286_v18 = vld [vmem:[%s1448_s26 + $0x20] sm:$0xff] }
  0x41   : > { %606 = vmatprep.mubr.f32.mxu1 %v309_v33  ;;  %522 = vmatmul.mubr.f32.gmra.mrb[6].mxu0 %v306_v34  ;;  %v393_v12 = vld [vmem:[%s1392_s22 + $0x278] sm:$0xff]  ;;  %v1291_v13 = vpack.c.bf16 %v441_v7, %v440_v6  ;;  %v424_v14 = vld [vmem:[%s1392_s22 + $0x370] sm:$0xff]  ;;  %v295_v20 = vld [vmem:[%s1448_s26 + $0x68] sm:$0xff] }
  0x42   : > { %1246 = vmatpush3.bf16.msra.mxu0 %v1245_v31  ;;  %607 = vmatmul.mubr.f32.gmra.mrb[6].mxu1 %v308_v39  ;;  %v425_v15 = vld [vmem:[%s1392_s22 + $0x378] sm:$0xff]  ;;  %v1261_v16 = vpack.c.bf16 %v393_v12, %v392_v11  ;;  %v288_v19 = vld [vmem:[%s1448_s26 + $0x30] sm:$0xff]  ;;  %v294_v22 = vld [vmem:[%s1448_s26 + $0x60] sm:$0xff] }
  0x43   : > { %1278 = vmatpush3.bf16.msra.mxu1 %v1277_v35  ;;  %1248 = vmatprep.subr.bf16.mxu0 %v1247_v36  ;;  %v1293_v17 = vpack.c.bf16 %v425_v15, %v424_v14  ;;  %v297_v21 = vld [vmem:[%s1448_s26 + $0x78] sm:$0xff]  ;;  %v296_v23 = vld [vmem:[%s1448_s26 + $0x70] sm:$0xff]  ;;  %v303_v24 = vld [vmem:[%s1448_s26 + $0xa8] sm:$0xff] }
  0x44   : > { %1280 = vmatprep.subr.bf16.mxu1 %v1279_v40  ;;  %676 = vmatprep.mubr.f32.mxu0 %v287_v47  ;;  %v305_v25 = vld [vmem:[%s1448_s26 + $0xb8] sm:$0xff]  ;;  %v302_v26 = vld [vmem:[%s1448_s26 + $0xa0] sm:$0xff]  ;;  %v304_v27 = vld [vmem:[%s1448_s26 + $0xb0] sm:$0xff] }
  0x45   : > { %761 = vmatprep.mubr.f32.mxu1 %v289_v48  ;;  %v311_v28 = vld [vmem:[%s1448_s26 + $0xe8] sm:$0xff]  ;;  %v313_v29 = vld [vmem:[%s1448_s26 + $0xf8] sm:$0xff]  ;;  %v310_v30 = vld [vmem:[%s1448_s26 + $0xe0] sm:$0xff] }
  0x46   : > { %1250 = vmatpush3.bf16.msra.mxu0 %v1249_v46  ;;  %v312_v31 = vld [vmem:[%s1448_s26 + $0xf0] sm:$0xff] }
  0x47   : > { %1282 = vmatpush3.bf16.msra.mxu1 %v1281_v49  ;;  %1252 = vmatprep.subr.bf16.mxu0 %v1251_v50 }
  0x48   : > { %1284 = vmatprep.subr.bf16.mxu1 %v1283_v54 }
  0x4a   : > { %1254 = vmatpush3.bf16.msra.mxu0 %v1253_v60 }
  0x4b   : > { %1286 = vmatpush3.bf16.msra.mxu1 %v1285_v61  ;;  %1256 = vmatprep.subr.bf16.mxu0 %v1255_v62 }
  0x4c   : > { %1288 = vmatprep.subr.bf16.mxu1 %v1287_v2 }
  0x4e   : > { %1258 = vmatpush3.bf16.msra.mxu0 %v1257_v8 }
  0x4f   : > { %1290 = vmatpush3.bf16.msra.mxu1 %v1289_v9  ;;  %1260 = vmatprep.subr.bf16.mxu0 %v1259_v10 }
  0x50   : > { %1292 = vmatprep.subr.bf16.mxu1 %v1291_v13 }
  0x52   : > { %1262 = vmatpush3.bf16.msra.mxu0 %v1261_v16 }
  0x53   : > { %1294 = vmatpush3.bf16.msra.mxu1 %v1293_v17 }
  0x55   : > { %677 = vmatmul.mubr.f32.vlgmr.msra.gmra.mrb[8].mxu0 %v286_v18 }
  0x56   : > { %762 = vmatmul.mubr.f32.vlgmr.msra.gmra.mrb[8].mxu1 %v288_v19  ;;  %681 = vmatprep.mubr.f32.mxu0 %v295_v20 }
  0x57   : > { %766 = vmatprep.mubr.f32.mxu1 %v297_v21 }
  0x59   : > { %682 = vmatmul.mubr.f32.gmra.mrb[10].mxu0 %v294_v22 }
  0x5a   : > { %767 = vmatmul.mubr.f32.gmra.mrb[10].mxu1 %v296_v23  ;;  %686 = vmatprep.mubr.f32.mxu0 %v303_v24 }
  0x5b   : > { %771 = vmatprep.mubr.f32.mxu1 %v305_v25 }
  0x5d   : > { %687 = vmatmul.mubr.f32.gmra.mrb[12].mxu0 %v302_v26 }
  0x5e   : > { %772 = vmatmul.mubr.f32.gmra.mrb[12].mxu1 %v304_v27  ;;  %691 = vmatprep.mubr.f32.mxu0 %v311_v28 }
  0x5f   : > { %776 = vmatprep.mubr.f32.mxu1 %v313_v29 }
  0x61   : > { %692 = vmatmul.mubr.f32.gmra.mrb[14].mxu0 %v310_v30 }
  0x62   : > { %777 = vmatmul.mubr.f32.gmra.mrb[14].mxu1 %v312_v31 }
 0x108   : > { %v1023_v32 = vpop.f32.mrb[0].mxu0 }
 0x109   : > { %v1067_v33 = vpop.f32.mrb[0].mxu1  ;;  %v1024_v34 = vpop.f32.mrb[1].mxu0 }
 0x10a   : > { %v1025_v35 = vadd.f32 %v1024_v34, %v1023_v32  ;;  %v1068_v36 = vpop.f32.mrb[1].mxu1 }
 0x10b   : > { %v1069_v37 = vadd.f32 %v1068_v36, %v1067_v33 }
 0x10c   : > { %v1026_v38 = vpop.f32.mrb[2].mxu0 }
 0x10d   : > { %v594_v39 = vadd.f32 %v1069_v37, %v1025_v35  ;;  %v1070_v40 = vpop.f32.mrb[2].mxu1  ;;  %v1027_v41 = vpop.f32.mrb[3].mxu0 }
 0x10e   : > { %v1028_v42 = vadd.f32 %v1027_v41, %v1026_v38  ;;  %v1071_v43 = vpop.f32.mrb[3].mxu1 }
 0x10f   : > { %v1072_v44 = vadd.f32 %v1071_v43, %v1070_v40 }
 0x110   : > { %v1029_v45 = vpop.f32.mrb[4].mxu0 }
 0x111   : > { %v599_v46 = vadd.f32 %v1072_v44, %v1028_v42  ;;  %v1073_v47 = vpop.f32.mrb[4].mxu1  ;;  %v1030_v48 = vpop.f32.mrb[5].mxu0 }
 0x112   : > { %v1031_v49 = vadd.f32 %v1030_v48, %v1029_v45  ;;  %v1074_v50 = vpop.f32.mrb[5].mxu1 }
 0x113   : > { %v1075_v51 = vadd.f32 %v1074_v50, %v1073_v47 }
 0x114   : > { %v1032_v52 = vpop.f32.mrb[6].mxu0 }
 0x115   : > { %v604_v53 = vadd.f32 %v1075_v51, %v1031_v49  ;;  %v1076_v54 = vpop.f32.mrb[6].mxu1  ;;  %v1033_v55 = vpop.f32.mrb[7].mxu0 }
 0x116   : > { %v1034_v56 = vadd.f32 %v1033_v55, %v1032_v52  ;;  %v1077_v57 = vpop.f32.mrb[7].mxu1 }
 0x117   : > { %v1078_v58 = vadd.f32 %v1077_v57, %v1076_v54 }
 0x119   : > { %v609_v59 = vadd.f32 %v1078_v58, %v1034_v56 }
 0x128   : > { %v1111_v60 = vpop.f32.mrb[8].mxu0 }
 0x129   : > { %v1112_v61 = vpop.f32.mrb[9].mxu0  ;;  %v1155_v62 = vpop.f32.mrb[8].mxu1 }
 0x12a   : > { %v1113_v63 = vadd.f32 %v1112_v61, %v1111_v60  ;;  %v1156_v0 = vpop.f32.mrb[9].mxu1 }
 0x12b   : > { %v1157_v1 = vadd.f32 %v1156_v0, %v1155_v62 }
 0x12c   : > { %v679_v2 = vadd.f32 %v1113_v63, %v594_v39  ;;  %v1114_v3 = vpop.f32.mrb[10].mxu0 }
 0x12d   : > { %v1115_v4 = vpop.f32.mrb[11].mxu0  ;;  %v1158_v5 = vpop.f32.mrb[10].mxu1 }
 0x12e   : > { %v764_v6 = vadd.f32 %v1157_v1, %v679_v2  ;;  %v1116_v7 = vadd.f32 %v1115_v4, %v1114_v3  ;;  %v1159_v8 = vpop.f32.mrb[11].mxu1 }
 0x12f   : > { %v1160_v9 = vadd.f32 %v1159_v8, %v1158_v5 }
 0x130   : > { %782 = vst [vmem:[%s1564_s30] sm:$0xff] %v764_v6  ;;  %v684_v10 = vadd.f32 %v1116_v7, %v599_v46  ;;  %v1117_v11 = vpop.f32.mrb[12].mxu0  ;;  %v796_v18 = vmul.f32 %v764_v6, %v764_v6 }
 0x131   : > { %v1118_v12 = vpop.f32.mrb[13].mxu0  ;;  %v1161_v13 = vpop.f32.mrb[12].mxu1 }
 0x132   : > { %v769_v14 = vadd.f32 %v1160_v9, %v684_v10  ;;  %v1119_v15 = vadd.f32 %v1118_v12, %v1117_v11  ;;  %v1162_v16 = vpop.f32.mrb[13].mxu1 }
 0x133   : > { %v1163_v17 = vadd.f32 %v1162_v16, %v1161_v13 }
 0x134   : > { %783 = vst [vmem:[%s1564_s30 + $0x8] sm:$0xff] %v769_v14  ;;  %v786_v19 = vadd.f32 %v769_v14, %v764_v6  ;;  %v797_v20 = vmul.f32 %v769_v14, %v769_v14  ;;  %v689_v21 = vadd.f32 %v1119_v15, %v604_v53  ;;  %v1120_v22 = vpop.f32.mrb[14].mxu0 }
 0x135   : > { %v1121_v23 = vpop.f32.mrb[15].mxu0  ;;  %v1164_v24 = vpop.f32.mrb[14].mxu1 }
 0x136   : > { %v800_v25 = vadd.f32 %v797_v20, %v796_v18  ;;  %v774_v26 = vadd.f32 %v1163_v17, %v689_v21  ;;  %v1122_v27 = vadd.f32 %v1121_v23, %v1120_v22  ;;  %v1165_v28 = vpop.f32.mrb[15].mxu1 }
 0x137   : > { %v1166_v29 = vadd.f32 %v1165_v28, %v1164_v24 }
 0x138   : > { %784 = vst [vmem:[%s1564_s30 + $0x10] sm:$0xff] %v774_v26  ;;  %v787_v30 = vadd.f32 %v786_v19, %v774_v26  ;;  %v798_v31 = vmul.f32 %v774_v26, %v774_v26  ;;  %v694_v32 = vadd.f32 %v1122_v27, %v609_v59 }
 0x13a   : > { %v801_v33 = vadd.f32 %v800_v25, %v798_v31  ;;  %v779_v34 = vadd.f32 %v1166_v29, %v694_v32 }
 0x13c   : > { %785 = vst [vmem:[%s1564_s30 + $0x18] sm:$0xff] %v779_v34  ;;  %v788_v35 = vadd.f32 %v787_v30, %v779_v34  ;;  %v799_v36 = vmul.f32 %v779_v34, %v779_v34 }
 0x13e   : > { %v789_v37 = vrot.slane %v788_v35, 4  ;;  %v802_v38 = vadd.f32 %v801_v33, %v799_v36 }
 0x140   : > { %v790_v39 = vadd.f32 %v789_v37, %v788_v35  ;;  %v803_v40 = vrot.slane %v802_v38, 4 }
 0x142   : > { %v791_v41 = vrot.slane %v790_v39, 2  ;;  %v804_v42 = vadd.f32 %v803_v40, %v802_v38 }
 0x144   : > { %v792_v43 = vadd.f32 %v791_v41, %v790_v39  ;;  %v805_v44 = vrot.slane %v804_v42, 2 }
 0x146   : > { %v793_v45 = vrot.slane %v792_v43, 1  ;;  %v806_v46 = vadd.f32 %v805_v44, %v804_v42 }
 0x148   : > { %v794_v47 = vadd.f32 %v793_v45, %v792_v43  ;;  %v807_v48 = vrot.slane %v806_v46, 1 }
 0x14a   : > { %795 = vst [vmem:[%s275_s7] sm:$0x1] %v794_v47  ;;  %v808_v49 = vadd.f32 %v807_v48, %v806_v46 }
 0x14c   : > { %809 = vst [vmem:[%s281_s10] sm:$0x1] %v808_v49 }
 0x14d PF: > { %s15_s17 = sadd.s32 1, %s1341_s17   ;;  %s1592_s15 = smov %s1337_s16 }
 0x14e   : > { %p12_p5 = scmp.ge.s32.totalorder %s15_s17, 6   ;;  %s1593_s16 = smov %s1595_s18 }
 0x150   :  { %14 = sbr.rel (!%p12_p5) target bundleno = 2 (0x2), region = 85 }

// kernel: generator_forward.14
= control target key start
LH: loop header
LB: loop body
LE: loop exit
PB: predicated region body
PF: predicated region fallthrough
CT: control target
= control target key end

     0   :  { %s254_s0 = inlined_call_operand.vmem [shape: f32[128,128], index: 0, kind: input, shape index: {}]   ;;  %s255_s1 = inlined_call_operand.vmem [shape: f32[1,128], index: 1, kind: input, shape index: {}]   ;;  %s256_s2 = inlined_call_operand.vmem [shape: f32[1,128], index: 2, kind: input, shape index: {}]   ;;  %s257_s3 = inlined_call_operand.vmem [shape: f32[128,128], index: 3, kind: output, shape index: {}]  }
   0x1   :  { %v14_v0 = vld [vmem:[%s254_s0] sm:$0xff]  ;;  %v15_v4 = vld [vmem:[%s254_s0 + $0x8] sm:$0xff]  ;;  %v16_v5 = vld [vmem:[%s254_s0 + $0x10] sm:$0xff] }
   0x2   :  { %v112_v1 = vld [vmem:[%s255_s1] ss:$0 sm:$0xff]  ;;  %v17_v6 = vld [vmem:[%s254_s0 + $0x18] sm:$0xff]  ;;  %v19_v11 = vld [vmem:[%s254_s0 + $0x28] sm:$0xff] }
   0x3   :  { %v143_v2 = vld [vmem:[%s256_s2] ss:$0 sm:$0xff]  ;;  %v37_v3 = vmul.f32 %v112_v1, %v14_v0  ;;  %v38_v7 = vmul.f32 %v112_v1, %v15_v4  ;;  %v39_v8 = vmul.f32 %v112_v1, %v16_v5  ;;  %v40_v9 = vmul.f32 %v112_v1, %v17_v6  ;;  %v20_v12 = vld [vmem:[%s254_s0 + $0x30] sm:$0xff]  ;;  %v21_v17 = vld [vmem:[%s254_s0 + $0x38] sm:$0xff] }
   0x4   :  { %v18_v10 = vld [vmem:[%s254_s0 + $0x20] sm:$0xff]  ;;  %v42_v15 = vmul.f32 %v112_v1, %v19_v11  ;;  %v43_v16 = vmul.f32 %v112_v1, %v20_v12  ;;  %v44_v21 = vmul.f32 %v112_v1, %v21_v17  ;;  %v23_v27 = vld [vmem:[%s254_s0 + $0x48] sm:$0xff]  ;;  %v24_v28 = vld [vmem:[%s254_s0 + $0x50] sm:$0xff] }
   0x5   :  { %v60_v13 = vadd.f32 %v143_v2, %v37_v3  ;;  %v41_v14 = vmul.f32 %v112_v1, %v18_v10  ;;  %v61_v18 = vadd.f32 %v143_v2, %v38_v7  ;;  %v62_v19 = vadd.f32 %v143_v2, %v39_v8  ;;  %v22_v22 = vld [vmem:[%s254_s0 + $0x40] sm:$0xff]  ;;  %v25_v29 = vld [vmem:[%s254_s0 + $0x58] sm:$0xff]  ;;  %v27_v35 = vld [vmem:[%s254_s0 + $0x68] sm:$0xff] }
   0x6   :  { %v63_v20 = vadd.f32 %v143_v2, %v40_v9  ;;  %v65_v25 = vadd.f32 %v143_v2, %v42_v15  ;;  %v66_v26 = vadd.f32 %v143_v2, %v43_v16  ;;  %v67_v33 = vadd.f32 %v143_v2, %v44_v21  ;;  %v26_v34 = vld [vmem:[%s254_s0 + $0x60] sm:$0xff]  ;;  %v28_v36 = vld [vmem:[%s254_s0 + $0x70] sm:$0xff]  ;;  %v29_v41 = vld [vmem:[%s254_s0 + $0x78] sm:$0xff] }
   0x7   :  { %v76_v23 = vmax.f32 %v60_v13, 0.0  ;;  %v64_v24 = vadd.f32 %v143_v2, %v41_v14  ;;  %v77_v30 = vmax.f32 %v61_v18, 0.0  ;;  %v78_v31 = vmax.f32 %v62_v19, 0.0 }
   0x8   :  { %v79_v32 = vmax.f32 %v63_v20, 0.0  ;;  %v81_v38 = vmax.f32 %v65_v25, 0.0  ;;  %v82_v39 = vmax.f32 %v66_v26, 0.0  ;;  %v45_v40 = vmul.f32 %v112_v1, %v22_v22 }
   0x9   :  { %92 = vst [vmem:[%s257_s3] sm:$0xff] %v76_v23  ;;  %v80_v37 = vmax.f32 %v64_v24, 0.0  ;;  %93 = vst [vmem:[%s257_s3 + $0x8] sm:$0xff] %v77_v30  ;;  %v83_v42 = vmax.f32 %v67_v33, 0.0  ;;  %v46_v43 = vmul.f32 %v112_v1, %v23_v27  ;;  %v47_v44 = vmul.f32 %v112_v1, %v24_v28 }
   0xa   :  { %94 = vst [vmem:[%s257_s3 + $0x10] sm:$0xff] %v78_v31  ;;  %95 = vst [vmem:[%s257_s3 + $0x18] sm:$0xff] %v79_v32  ;;  %v48_v45 = vmul.f32 %v112_v1, %v25_v29  ;;  %v68_v46 = vadd.f32 %v143_v2, %v45_v40  ;;  %v49_v47 = vmul.f32 %v112_v1, %v26_v34 }
   0xb   :  { %96 = vst [vmem:[%s257_s3 + $0x20] sm:$0xff] %v80_v37  ;;  %97 = vst [vmem:[%s257_s3 + $0x28] sm:$0xff] %v81_v38  ;;  %v50_v48 = vmul.f32 %v112_v1, %v27_v35  ;;  %v51_v49 = vmul.f32 %v112_v1, %v28_v36  ;;  %v69_v50 = vadd.f32 %v143_v2, %v46_v43 }
   0xc   :  { %98 = vst [vmem:[%s257_s3 + $0x30] sm:$0xff] %v82_v39  ;;  %99 = vst [vmem:[%s257_s3 + $0x38] sm:$0xff] %v83_v42  ;;  %v70_v51 = vadd.f32 %v143_v2, %v47_v44  ;;  %v71_v52 = vadd.f32 %v143_v2, %v48_v45  ;;  %v52_v53 = vmul.f32 %v112_v1, %v29_v41  ;;  %v84_v54 = vmax.f32 %v68_v46, 0.0 }
   0xd   :  { %v72_v55 = vadd.f32 %v143_v2, %v49_v47  ;;  %v73_v56 = vadd.f32 %v143_v2, %v50_v48  ;;  %v74_v57 = vadd.f32 %v143_v2, %v51_v49  ;;  %v85_v58 = vmax.f32 %v69_v50, 0.0 }
   0xe   :  { %v86_v59 = vmax.f32 %v70_v51, 0.0  ;;  %v87_v60 = vmax.f32 %v71_v52, 0.0  ;;  %v75_v61 = vadd.f32 %v143_v2, %v52_v53  ;;  %100 = vst [vmem:[%s257_s3 + $0x40] sm:$0xff] %v84_v54 }
   0xf   :  { %v88_v62 = vmax.f32 %v72_v55, 0.0  ;;  %v89_v63 = vmax.f32 %v73_v56, 0.0  ;;  %v90_v0 = vmax.f32 %v74_v57, 0.0  ;;  %101 = vst [vmem:[%s257_s3 + $0x48] sm:$0xff] %v85_v58 }
  0x10   :  { %102 = vst [vmem:[%s257_s3 + $0x50] sm:$0xff] %v86_v59  ;;  %103 = vst [vmem:[%s257_s3 + $0x58] sm:$0xff] %v87_v60  ;;  %v91_v1 = vmax.f32 %v75_v61, 0.0 }
  0x11   :  { %104 = vst [vmem:[%s257_s3 + $0x60] sm:$0xff] %v88_v62  ;;  %105 = vst [vmem:[%s257_s3 + $0x68] sm:$0xff] %v89_v63 }
  0x12   :  { %106 = vst [vmem:[%s257_s3 + $0x70] sm:$0xff] %v90_v0  ;;  %107 = vst [vmem:[%s257_s3 + $0x78] sm:$0xff] %v91_v1 }

// kernel: generator_forward.15
= control target key start
LH: loop header
LB: loop body
LE: loop exit
PB: predicated region body
PF: predicated region fallthrough
CT: control target
= control target key end

     0   :  { %s1254_s15 = smov 0   ;;  %s1256_s16 = smov 0   ;;  %s1456_s0 = inlined_call_operand.vmem [shape: f32[4,128,512], index: 0, kind: input, shape index: {}]   ;;  %s1457_s1 = inlined_call_operand.vmem [shape: f32[4,512,128], index: 1, kind: input, shape index: {}]   ;;  %s1458_s2 = inlined_call_operand.vmem [shape: f32[4,128,128], index: 2, kind: output, shape index: {0}]   ;;  %s1459_s3 = inlined_call_operand.vmem [shape: f32[4,1,128], index: 3, kind: output, shape index: {1}]   ;;  %s1460_s4 = inlined_call_operand.vmem [shape: f32[4,1,128], index: 4, kind: output, shape index: {2}]  }
   0x1   :  { %s1258_s17 = smov 0  }
   0x2 LB: > { %s27_s18 = sadd.s32 1, %s1223_s16  ;;  %p945_p0 = scmp.ge.s32.totalorder %s1227_s17, 1  ;;  %s1227_s17 = sphi %s1258_s17, %s15_s17   ;;  %s1223_s16 = sphi %s1256_s16, %s1462_s16   ;;  %s1219_s15 = sphi %s1254_s15, %s1461_s15  }
   0x3   : > { %p29_p1 = scmp.ge.s32.totalorder %s27_s18, 4  ;;  %p200_p2 = scmp.lt.s32.totalorder %s1227_s17, 5 }
   0x5   : > { %s1464_s18 = smov (%p29_p1, %s27_s18), 0  ;;  %p201_p3 = pnand %p945_p0, %p200_p2 }
   0x6   : > { %p249_p4 = scmp.lt.s32.totalorder (!%p201_p3), %s1219_s15, 3 }
   0x7   : > { %204 = sbr.rel (%p201_p3) target bundleno = 348 (0x15c), region = 28 }
   0xe   : > { %s1466_s15 = smov (!%p249_p4, %s1219_s15), 3 }
   0xf   : > { %s954_s19 = sshll.u32 %s1466_s15, 9  ;;  %s956_s26 = sshll.u32 %s1466_s15, 7 }
  0x10   : > { %s1280_s22 = scalar_lea.vmem %s1457_s1, %s954_s19  ;;  %s1337_s25 = scalar_lea.vmem %s1456_s0, %s954_s19 }
  0x11   : > { %v362_v0 = vld [vmem:[%s1280_s22 + $0x80] sm:$0xff]  ;;  %v363_v1 = vld [vmem:[%s1280_s22 + $0x88] sm:$0xff]  ;;  %v364_v11 = vld [vmem:[%s1280_s22 + $0x90] sm:$0xff]  ;;  %s1421_s29 = scalar_lea.vmem %s1458_s2, %s956_s26  ;;  %s275_s6 = scalar_lea.vmem %s1459_s3, %s1466_s15 }
  0x12   : > { %v394_v2 = vld [vmem:[%s1280_s22 + $0x180] sm:$0xff]  ;;  %v1117_v3 = vpack.c.bf16 %v363_v1, %v362_v0  ;;  %v395_v4 = vld [vmem:[%s1280_s22 + $0x188] sm:$0xff]  ;;  %v365_v13 = vld [vmem:[%s1280_s22 + $0x98] sm:$0xff]  ;;  %s281_s9 = scalar_lea.vmem %s1460_s4, %s1466_s15 }
  0x13   : > { %v346_v5 = vld [vmem:[%s1280_s22] sm:$0xff]  ;;  %v347_v6 = vld [vmem:[%s1280_s22 + $0x8] sm:$0xff]  ;;  %v1149_v7 = vpack.c.bf16 %v395_v4, %v394_v2  ;;  %v396_v14 = vld [vmem:[%s1280_s22 + $0x190] sm:$0xff]  ;;  %v1121_v16 = vpack.c.bf16 %v365_v13, %v364_v11 }
  0x14   : > { %v1119_v8 = vpack.c.bf16 %v347_v6, %v346_v5  ;;  %v378_v9 = vld [vmem:[%s1280_s22 + $0x100] sm:$0xff]  ;;  %v379_v10 = vld [vmem:[%s1280_s22 + $0x108] sm:$0xff]  ;;  %1118 = vmatprep.subr.bf16.mxu0 %v1117_v3  ;;  %v397_v15 = vld [vmem:[%s1280_s22 + $0x198] sm:$0xff] }
  0x15   : > { %v1151_v12 = vpack.c.bf16 %v379_v10, %v378_v9  ;;  %1150 = vmatprep.subr.bf16.mxu1 %v1149_v7  ;;  %v1153_v17 = vpack.c.bf16 %v397_v15, %v396_v14  ;;  %v348_v18 = vld [vmem:[%s1280_s22 + $0x10] sm:$0xff]  ;;  %v349_v19 = vld [vmem:[%s1280_s22 + $0x18] sm:$0xff]  ;;  %v366_v23 = vld [vmem:[%s1280_s22 + $0xa0] sm:$0xff] }
  0x16   : > { %1120 = vmatpush3.bf16.msra.mxu0 %v1119_v8  ;;  %v380_v20 = vld [vmem:[%s1280_s22 + $0x110] sm:$0xff]  ;;  %v1123_v21 = vpack.c.bf16 %v349_v19, %v348_v18  ;;  %v381_v22 = vld [vmem:[%s1280_s22 + $0x118] sm:$0xff]  ;;  %v367_v24 = vld [vmem:[%s1280_s22 + $0xa8] sm:$0xff] }
  0x17   : > { %1152 = vmatpush3.bf16.msra.mxu1 %v1151_v12  ;;  %1122 = vmatprep.subr.bf16.mxu0 %v1121_v16  ;;  %v1155_v25 = vpack.c.bf16 %v381_v22, %v380_v20  ;;  %v1125_v26 = vpack.c.bf16 %v367_v24, %v366_v23  ;;  %v398_v27 = vld [vmem:[%s1280_s22 + $0x1a0] sm:$0xff]  ;;  %v399_v28 = vld [vmem:[%s1280_s22 + $0x1a8] sm:$0xff]  ;;  %v368_v35 = vld [vmem:[%s1280_s22 + $0xb0] sm:$0xff] }
  0x18   : > { %1154 = vmatprep.subr.bf16.mxu1 %v1153_v17  ;;  %v350_v29 = vld [vmem:[%s1280_s22 + $0x20] sm:$0xff]  ;;  %v1157_v30 = vpack.c.bf16 %v399_v28, %v398_v27  ;;  %v351_v31 = vld [vmem:[%s1280_s22 + $0x28] sm:$0xff]  ;;  %v369_v36 = vld [vmem:[%s1280_s22 + $0xb8] sm:$0xff] }
  0x19   : > { %v382_v32 = vld [vmem:[%s1280_s22 + $0x120] sm:$0xff]  ;;  %v383_v33 = vld [vmem:[%s1280_s22 + $0x128] sm:$0xff]  ;;  %v1127_v34 = vpack.c.bf16 %v351_v31, %v350_v29  ;;  %v400_v37 = vld [vmem:[%s1280_s22 + $0x1b0] sm:$0xff]  ;;  %v1129_v39 = vpack.c.bf16 %v369_v36, %v368_v35 }
  0x1a   : > { %1124 = vmatpush3.bf16.msra.mxu0 %v1123_v21  ;;  %v1159_v38 = vpack.c.bf16 %v383_v33, %v382_v32  ;;  %v401_v40 = vld [vmem:[%s1280_s22 + $0x1b8] sm:$0xff]  ;;  %v352_v41 = vld [vmem:[%s1280_s22 + $0x30] sm:$0xff]  ;;  %v370_v46 = vld [vmem:[%s1280_s22 + $0xc0] sm:$0xff] }
  0x1b   : > { %1156 = vmatpush3.bf16.msra.mxu1 %v1155_v25  ;;  %1126 = vmatprep.subr.bf16.mxu0 %v1125_v26  ;;  %v353_v42 = vld [vmem:[%s1280_s22 + $0x38] sm:$0xff]  ;;  %v1161_v43 = vpack.c.bf16 %v401_v40, %v400_v37  ;;  %v384_v44 = vld [vmem:[%s1280_s22 + $0x130] sm:$0xff]  ;;  %v371_v47 = vld [vmem:[%s1280_s22 + $0xc8] sm:$0xff] }
  0x1c   : > { %1158 = vmatprep.subr.bf16.mxu1 %v1157_v30  ;;  %v385_v45 = vld [vmem:[%s1280_s22 + $0x138] sm:$0xff]  ;;  %v402_v48 = vld [vmem:[%s1280_s22 + $0x1c0] sm:$0xff]  ;;  %v403_v49 = vld [vmem:[%s1280_s22 + $0x1c8] sm:$0xff]  ;;  %v1131_v50 = vpack.c.bf16 %v353_v42, %v352_v41  ;;  %v1133_v52 = vpack.c.bf16 %v371_v47, %v370_v46 }
  0x1d   : > { %v1163_v51 = vpack.c.bf16 %v385_v45, %v384_v44  ;;  %v354_v53 = vld [vmem:[%s1280_s22 + $0x40] sm:$0xff]  ;;  %v355_v54 = vld [vmem:[%s1280_s22 + $0x48] sm:$0xff]  ;;  %v1165_v56 = vpack.c.bf16 %v403_v49, %v402_v48  ;;  %v372_v58 = vld [vmem:[%s1280_s22 + $0xd0] sm:$0xff] }
  0x1e   : > { %1128 = vmatpush3.bf16.msra.mxu0 %v1127_v34  ;;  %v386_v55 = vld [vmem:[%s1280_s22 + $0x140] sm:$0xff]  ;;  %v387_v57 = vld [vmem:[%s1280_s22 + $0x148] sm:$0xff]  ;;  %v373_v59 = vld [vmem:[%s1280_s22 + $0xd8] sm:$0xff]  ;;  %v1135_v62 = vpack.c.bf16 %v355_v54, %v354_v53 }
  0x1f   : > { %1160 = vmatpush3.bf16.msra.mxu1 %v1159_v38  ;;  %1130 = vmatprep.subr.bf16.mxu0 %v1129_v39  ;;  %v404_v60 = vld [vmem:[%s1280_s22 + $0x1d0] sm:$0xff]  ;;  %v405_v61 = vld [vmem:[%s1280_s22 + $0x1d8] sm:$0xff]  ;;  %v1167_v63 = vpack.c.bf16 %v387_v57, %v386_v55  ;;  %v1137_v0 = vpack.c.bf16 %v373_v59, %v372_v58  ;;  %v374_v6 = vld [vmem:[%s1280_s22 + $0xe0] sm:$0xff] }
  0x20   : > { %1162 = vmatprep.subr.bf16.mxu1 %v1161_v43  ;;  %v356_v1 = vld [vmem:[%s1280_s22 + $0x50] sm:$0xff]  ;;  %v357_v2 = vld [vmem:[%s1280_s22 + $0x58] sm:$0xff]  ;;  %v1169_v4 = vpack.c.bf16 %v405_v61, %v404_v60  ;;  %v375_v7 = vld [vmem:[%s1280_s22 + $0xe8] sm:$0xff] }
  0x21   : > { %v388_v3 = vld [vmem:[%s1280_s22 + $0x150] sm:$0xff]  ;;  %v389_v5 = vld [vmem:[%s1280_s22 + $0x158] sm:$0xff]  ;;  %v406_v8 = vld [vmem:[%s1280_s22 + $0x1e0] sm:$0xff]  ;;  %v1139_v10 = vpack.c.bf16 %v357_v2, %v356_v1  ;;  %v1141_v14 = vpack.c.bf16 %v375_v7, %v374_v6 }
  0x22   : > { %1132 = vmatpush3.bf16.msra.mxu0 %v1131_v50  ;;  %v407_v9 = vld [vmem:[%s1280_s22 + $0x1e8] sm:$0xff]  ;;  %v358_v11 = vld [vmem:[%s1280_s22 + $0x60] sm:$0xff]  ;;  %v1171_v13 = vpack.c.bf16 %v389_v5, %v388_v3  ;;  %v285_v17 = vld [vmem:[%s1337_s25 + $0x18] sm:$0xff] }
  0x23   : > { %1164 = vmatpush3.bf16.msra.mxu1 %v1163_v51  ;;  %1134 = vmatprep.subr.bf16.mxu0 %v1133_v52  ;;  %v359_v12 = vld [vmem:[%s1280_s22 + $0x68] sm:$0xff]  ;;  %v390_v15 = vld [vmem:[%s1280_s22 + $0x160] sm:$0xff]  ;;  %v1173_v18 = vpack.c.bf16 %v407_v9, %v406_v8  ;;  %v376_v20 = vld [vmem:[%s1280_s22 + $0xf0] sm:$0xff] }
  0x24   : > { %1166 = vmatprep.subr.bf16.mxu1 %v1165_v56  ;;  %v283_v16 = vld [vmem:[%s1337_s25 + $0x8] sm:$0xff]  ;;  %v377_v21 = vld [vmem:[%s1280_s22 + $0xf8] sm:$0xff]  ;;  %v408_v22 = vld [vmem:[%s1280_s22 + $0x1f0] sm:$0xff]  ;;  %619 = vmatprep.mubr.f32.mxu1 %v285_v17  ;;  %v1143_v24 = vpack.c.bf16 %v359_v12, %v358_v11 }
  0x25   : > { %v391_v19 = vld [vmem:[%s1280_s22 + $0x168] sm:$0xff]  ;;  %474 = vmatprep.mubr.f32.mxu0 %v283_v16  ;;  %v409_v23 = vld [vmem:[%s1280_s22 + $0x1f8] sm:$0xff]  ;;  %v1145_v26 = vpack.c.bf16 %v377_v21, %v376_v20  ;;  %v360_v27 = vld [vmem:[%s1280_s22 + $0x70] sm:$0xff] }
  0x26   : > { %1136 = vmatpush3.bf16.msra.mxu0 %v1135_v62  ;;  %v1175_v25 = vpack.c.bf16 %v391_v19, %v390_v15  ;;  %v361_v28 = vld [vmem:[%s1280_s22 + $0x78] sm:$0xff]  ;;  %v1177_v29 = vpack.c.bf16 %v409_v23, %v408_v22  ;;  %v392_v30 = vld [vmem:[%s1280_s22 + $0x170] sm:$0xff]  ;;  %v282_v34 = vld [vmem:[%s1337_s25] sm:$0xff] }
  0x27   : > { %1168 = vmatpush3.bf16.msra.mxu1 %v1167_v63  ;;  %1138 = vmatprep.subr.bf16.mxu0 %v1137_v0  ;;  %v393_v31 = vld [vmem:[%s1280_s22 + $0x178] sm:$0xff]  ;;  %v1147_v32 = vpack.c.bf16 %v361_v28, %v360_v27  ;;  %v284_v35 = vld [vmem:[%s1337_s25 + $0x10] sm:$0xff]  ;;  %v287_v36 = vld [vmem:[%s1337_s25 + $0x28] sm:$0xff] }
  0x28   : > { %1170 = vmatprep.subr.bf16.mxu1 %v1169_v4  ;;  %v1179_v33 = vpack.c.bf16 %v393_v31, %v392_v30  ;;  %v289_v37 = vld [vmem:[%s1337_s25 + $0x38] sm:$0xff]  ;;  %v286_v38 = vld [vmem:[%s1337_s25 + $0x20] sm:$0xff]  ;;  %v288_v39 = vld [vmem:[%s1337_s25 + $0x30] sm:$0xff] }
  0x29   : > { %v291_v40 = vld [vmem:[%s1337_s25 + $0x48] sm:$0xff]  ;;  %v293_v41 = vld [vmem:[%s1337_s25 + $0x58] sm:$0xff]  ;;  %v290_v42 = vld [vmem:[%s1337_s25 + $0x40] sm:$0xff] }
  0x2a   : > { %1140 = vmatpush3.bf16.msra.mxu0 %v1139_v10  ;;  %v292_v43 = vld [vmem:[%s1337_s25 + $0x50] sm:$0xff]  ;;  %v295_v44 = vld [vmem:[%s1337_s25 + $0x68] sm:$0xff]  ;;  %v297_v45 = vld [vmem:[%s1337_s25 + $0x78] sm:$0xff] }
  0x2b   : > { %1172 = vmatpush3.bf16.msra.mxu1 %v1171_v13  ;;  %1142 = vmatprep.subr.bf16.mxu0 %v1141_v14  ;;  %v294_v46 = vld [vmem:[%s1337_s25 + $0x60] sm:$0xff]  ;;  %v296_v47 = vld [vmem:[%s1337_s25 + $0x70] sm:$0xff]  ;;  %v299_v48 = vld [vmem:[%s1337_s25 + $0x88] sm:$0xff] }
  0x2c   : > { %1174 = vmatprep.subr.bf16.mxu1 %v1173_v18  ;;  %v301_v49 = vld [vmem:[%s1337_s25 + $0x98] sm:$0xff]  ;;  %v298_v50 = vld [vmem:[%s1337_s25 + $0x80] sm:$0xff]  ;;  %v300_v51 = vld [vmem:[%s1337_s25 + $0x90] sm:$0xff] }
  0x2d   : > { %v303_v52 = vld [vmem:[%s1337_s25 + $0xa8] sm:$0xff]  ;;  %v305_v53 = vld [vmem:[%s1337_s25 + $0xb8] sm:$0xff]  ;;  %v302_v54 = vld [vmem:[%s1337_s25 + $0xa0] sm:$0xff] }
  0x2e   : > { %1144 = vmatpush3.bf16.msra.mxu0 %v1143_v24  ;;  %v304_v55 = vld [vmem:[%s1337_s25 + $0xb0] sm:$0xff]  ;;  %v307_v56 = vld [vmem:[%s1337_s25 + $0xc8] sm:$0xff]  ;;  %v309_v57 = vld [vmem:[%s1337_s25 + $0xd8] sm:$0xff] }
  0x2f   : > { %1176 = vmatpush3.bf16.msra.mxu1 %v1175_v25  ;;  %1146 = vmatprep.subr.bf16.mxu0 %v1145_v26  ;;  %v306_v58 = vld [vmem:[%s1337_s25 + $0xc0] sm:$0xff]  ;;  %v308_v59 = vld [vmem:[%s1337_s25 + $0xd0] sm:$0xff]  ;;  %v311_v60 = vld [vmem:[%s1337_s25 + $0xe8] sm:$0xff] }
  0x30   : > { %1178 = vmatprep.subr.bf16.mxu1 %v1177_v29  ;;  %v313_v61 = vld [vmem:[%s1337_s25 + $0xf8] sm:$0xff]  ;;  %v310_v62 = vld [vmem:[%s1337_s25 + $0xe0] sm:$0xff]  ;;  %v312_v63 = vld [vmem:[%s1337_s25 + $0xf0] sm:$0xff] }
  0x31   : > { %v315_v0 = vld [vmem:[%s1337_s25 + $0x108] sm:$0xff]  ;;  %v317_v1 = vld [vmem:[%s1337_s25 + $0x118] sm:$0xff]  ;;  %v314_v2 = vld [vmem:[%s1337_s25 + $0x100] sm:$0xff] }
  0x32   : > { %1148 = vmatpush3.bf16.msra.mxu0 %v1147_v32  ;;  %v316_v3 = vld [vmem:[%s1337_s25 + $0x110] sm:$0xff]  ;;  %v319_v4 = vld [vmem:[%s1337_s25 + $0x128] sm:$0xff]  ;;  %v321_v5 = vld [vmem:[%s1337_s25 + $0x138] sm:$0xff] }
  0x33   : > { %1180 = vmatpush3.bf16.msra.mxu1 %v1179_v33  ;;  %v318_v6 = vld [vmem:[%s1337_s25 + $0x120] sm:$0xff]  ;;  %v320_v7 = vld [vmem:[%s1337_s25 + $0x130] sm:$0xff]  ;;  %v323_v8 = vld [vmem:[%s1337_s25 + $0x148] sm:$0xff] }
  0x34   : > { %v325_v9 = vld [vmem:[%s1337_s25 + $0x158] sm:$0xff]  ;;  %v322_v10 = vld [vmem:[%s1337_s25 + $0x140] sm:$0xff]  ;;  %v324_v11 = vld [vmem:[%s1337_s25 + $0x150] sm:$0xff] }
  0x35   : > { %475 = vmatmul.mubr.f32.vlgmr.msra.gmra.mrb[0].mxu0 %v282_v34  ;;  %v327_v12 = vld [vmem:[%s1337_s25 + $0x168] sm:$0xff]  ;;  %v329_v13 = vld [vmem:[%s1337_s25 + $0x178] sm:$0xff]  ;;  %v326_v14 = vld [vmem:[%s1337_s25 + $0x160] sm:$0xff] }
  0x36   : > { %620 = vmatmul.mubr.f32.vlgmr.msra.gmra.mrb[0].mxu1 %v284_v35  ;;  %479 = vmatprep.mubr.f32.mxu0 %v287_v36  ;;  %v328_v15 = vld [vmem:[%s1337_s25 + $0x170] sm:$0xff]  ;;  %v331_v16 = vld [vmem:[%s1337_s25 + $0x188] sm:$0xff]  ;;  %v333_v17 = vld [vmem:[%s1337_s25 + $0x198] sm:$0xff] }
  0x37   : > { %624 = vmatprep.mubr.f32.mxu1 %v289_v37  ;;  %v330_v18 = vld [vmem:[%s1337_s25 + $0x180] sm:$0xff]  ;;  %v332_v19 = vld [vmem:[%s1337_s25 + $0x190] sm:$0xff]  ;;  %v335_v20 = vld [vmem:[%s1337_s25 + $0x1a8] sm:$0xff] }
  0x38   : > { %v337_v21 = vld [vmem:[%s1337_s25 + $0x1b8] sm:$0xff]  ;;  %v334_v22 = vld [vmem:[%s1337_s25 + $0x1a0] sm:$0xff]  ;;  %v336_v23 = vld [vmem:[%s1337_s25 + $0x1b0] sm:$0xff] }
  0x39   : > { %480 = vmatmul.mubr.f32.gmra.mrb[2].mxu0 %v286_v38  ;;  %v339_v24 = vld [vmem:[%s1337_s25 + $0x1c8] sm:$0xff]  ;;  %v341_v25 = vld [vmem:[%s1337_s25 + $0x1d8] sm:$0xff]  ;;  %v338_v26 = vld [vmem:[%s1337_s25 + $0x1c0] sm:$0xff] }
  0x3a   : > { %625 = vmatmul.mubr.f32.gmra.mrb[2].mxu1 %v288_v39  ;;  %484 = vmatprep.mubr.f32.mxu0 %v291_v40  ;;  %v340_v27 = vld [vmem:[%s1337_s25 + $0x1d0] sm:$0xff]  ;;  %v343_v28 = vld [vmem:[%s1337_s25 + $0x1e8] sm:$0xff]  ;;  %v345_v29 = vld [vmem:[%s1337_s25 + $0x1f8] sm:$0xff] }
  0x3b   : > { %629 = vmatprep.mubr.f32.mxu1 %v293_v41  ;;  %v342_v30 = vld [vmem:[%s1337_s25 + $0x1e0] sm:$0xff]  ;;  %v344_v31 = vld [vmem:[%s1337_s25 + $0x1f0] sm:$0xff] }
  0x3d   : > { %485 = vmatmul.mubr.f32.gmra.mrb[4].mxu0 %v290_v42 }
  0x3e   : > { %630 = vmatmul.mubr.f32.gmra.mrb[4].mxu1 %v292_v43  ;;  %489 = vmatprep.mubr.f32.mxu0 %v295_v44 }
  0x3f   : > { %634 = vmatprep.mubr.f32.mxu1 %v297_v45 }
  0x41   : > { %490 = vmatmul.mubr.f32.gmra.mrb[6].mxu0 %v294_v46 }
  0x42   : > { %635 = vmatmul.mubr.f32.gmra.mrb[6].mxu1 %v296_v47  ;;  %494 = vmatprep.mubr.f32.mxu0 %v299_v48 }
  0x43   : > { %639 = vmatprep.mubr.f32.mxu1 %v301_v49 }
  0x45   : > { %495 = vmatmul.mubr.f32.gmra.mrb[8].mxu0 %v298_v50 }
  0x46   : > { %640 = vmatmul.mubr.f32.gmra.mrb[8].mxu1 %v300_v51  ;;  %499 = vmatprep.mubr.f32.mxu0 %v303_v52 }
  0x47   : > { %644 = vmatprep.mubr.f32.mxu1 %v305_v53 }
  0x49   : > { %500 = vmatmul.mubr.f32.gmra.mrb[10].mxu0 %v302_v54 }
  0x4a   : > { %645 = vmatmul.mubr.f32.gmra.mrb[10].mxu1 %v304_v55  ;;  %504 = vmatprep.mubr.f32.mxu0 %v307_v56 }
  0x4b   : > { %649 = vmatprep.mubr.f32.mxu1 %v309_v57 }
  0x4d   : > { %505 = vmatmul.mubr.f32.gmra.mrb[12].mxu0 %v306_v58 }
  0x4e   : > { %650 = vmatmul.mubr.f32.gmra.mrb[12].mxu1 %v308_v59  ;;  %509 = vmatprep.mubr.f32.mxu0 %v311_v60 }
  0x4f   : > { %654 = vmatprep.mubr.f32.mxu1 %v313_v61 }
  0x51   : > { %510 = vmatmul.mubr.f32.gmra.mrb[14].mxu0 %v310_v62 }
  0x52   : > { %655 = vmatmul.mubr.f32.gmra.mrb[14].mxu1 %v312_v63  ;;  %514 = vmatprep.mubr.f32.mxu0 %v315_v0 }
  0x53   : > { %659 = vmatprep.mubr.f32.mxu1 %v317_v1 }
  0x55   : > { %515 = vmatmul.mubr.f32.gmra.mrb[16].mxu0 %v314_v2 }
  0x56   : > { %660 = vmatmul.mubr.f32.gmra.mrb[16].mxu1 %v316_v3  ;;  %519 = vmatprep.mubr.f32.mxu0 %v319_v4 }
  0x57   : > { %664 = vmatprep.mubr.f32.mxu1 %v321_v5 }
  0x59   : > { %520 = vmatmul.mubr.f32.gmra.mrb[18].mxu0 %v318_v6 }
  0x5a   : > { %665 = vmatmul.mubr.f32.gmra.mrb[18].mxu1 %v320_v7  ;;  %524 = vmatprep.mubr.f32.mxu0 %v323_v8 }
  0x5b   : > { %669 = vmatprep.mubr.f32.mxu1 %v325_v9 }
  0x5d   : > { %525 = vmatmul.mubr.f32.gmra.mrb[20].mxu0 %v322_v10 }
  0x5e   : > { %670 = vmatmul.mubr.f32.gmra.mrb[20].mxu1 %v324_v11  ;;  %529 = vmatprep.mubr.f32.mxu0 %v327_v12 }
  0x5f   : > { %674 = vmatprep.mubr.f32.mxu1 %v329_v13 }
  0x61   : > { %530 = vmatmul.mubr.f32.gmra.mrb[22].mxu0 %v326_v14 }
  0x62   : > { %675 = vmatmul.mubr.f32.gmra.mrb[22].mxu1 %v328_v15  ;;  %534 = vmatprep.mubr.f32.mxu0 %v331_v16 }
  0x63   : > { %679 = vmatprep.mubr.f32.mxu1 %v333_v17 }
  0x65   : > { %535 = vmatmul.mubr.f32.gmra.mrb[24].mxu0 %v330_v18 }
  0x66   : > { %680 = vmatmul.mubr.f32.gmra.mrb[24].mxu1 %v332_v19  ;;  %539 = vmatprep.mubr.f32.mxu0 %v335_v20 }
  0x67   : > { %684 = vmatprep.mubr.f32.mxu1 %v337_v21 }
  0x69   : > { %540 = vmatmul.mubr.f32.gmra.mrb[26].mxu0 %v334_v22 }
  0x6a   : > { %685 = vmatmul.mubr.f32.gmra.mrb[26].mxu1 %v336_v23  ;;  %544 = vmatprep.mubr.f32.mxu0 %v339_v24 }
  0x6b   : > { %689 = vmatprep.mubr.f32.mxu1 %v341_v25 }
  0x6d   : > { %545 = vmatmul.mubr.f32.gmra.mrb[28].mxu0 %v338_v26 }
  0x6e   : > { %690 = vmatmul.mubr.f32.gmra.mrb[28].mxu1 %v340_v27  ;;  %549 = vmatprep.mubr.f32.mxu0 %v343_v28 }
  0x6f   : > { %694 = vmatprep.mubr.f32.mxu1 %v345_v29 }
  0x71   : > { %550 = vmatmul.mubr.f32.gmra.mrb[30].mxu0 %v342_v30 }
  0x72   : > { %695 = vmatmul.mubr.f32.gmra.mrb[30].mxu1 %v344_v31 }
 0x108   : > { %v989_v32 = vpop.f32.mrb[0].mxu0 }
 0x109   : > { %v1069_v33 = vpop.f32.mrb[0].mxu1  ;;  %v990_v34 = vpop.f32.mrb[1].mxu0 }
 0x10a   : > { %v991_v35 = vadd.f32 %v990_v34, %v989_v32  ;;  %v1070_v36 = vpop.f32.mrb[1].mxu1 }
 0x10b   : > { %v1071_v37 = vadd.f32 %v1070_v36, %v1069_v33 }
 0x10c   : > { %v992_v38 = vpop.f32.mrb[2].mxu0 }
 0x10d   : > { %v622_v39 = vadd.f32 %v1071_v37, %v991_v35  ;;  %v1072_v40 = vpop.f32.mrb[2].mxu1  ;;  %v993_v41 = vpop.f32.mrb[3].mxu0 }
 0x10e   : > { %v994_v42 = vadd.f32 %v993_v41, %v992_v38  ;;  %v1073_v43 = vpop.f32.mrb[3].mxu1 }
 0x10f   : > { %700 = vst [vmem:[%s1421_s29] sm:$0xff] %v622_v39  ;;  %v1074_v44 = vadd.f32 %v1073_v43, %v1072_v40  ;;  %v738_v51 = vmul.f32 %v622_v39, %v622_v39 }
 0x110   : > { %v995_v45 = vpop.f32.mrb[4].mxu0 }
 0x111   : > { %v627_v46 = vadd.f32 %v1074_v44, %v994_v42  ;;  %v1075_v47 = vpop.f32.mrb[4].mxu1  ;;  %v996_v48 = vpop.f32.mrb[5].mxu0 }
 0x112   : > { %v997_v49 = vadd.f32 %v996_v48, %v995_v45  ;;  %v1076_v50 = vpop.f32.mrb[5].mxu1 }
 0x113   : > { %701 = vst [vmem:[%s1421_s29 + $0x8] sm:$0xff] %v627_v46  ;;  %v716_v52 = vadd.f32 %v627_v46, %v622_v39  ;;  %v739_v53 = vmul.f32 %v627_v46, %v627_v46  ;;  %v1077_v54 = vadd.f32 %v1076_v50, %v1075_v47 }
 0x114   : > { %v998_v55 = vpop.f32.mrb[6].mxu0 }
 0x115   : > { %v754_v56 = vadd.f32 %v739_v53, %v738_v51  ;;  %v632_v57 = vadd.f32 %v1077_v54, %v997_v49  ;;  %v1078_v58 = vpop.f32.mrb[6].mxu1  ;;  %v999_v59 = vpop.f32.mrb[7].mxu0 }
 0x116   : > { %v1000_v60 = vadd.f32 %v999_v59, %v998_v55  ;;  %v1079_v61 = vpop.f32.mrb[7].mxu1 }
 0x117   : > { %702 = vst [vmem:[%s1421_s29 + $0x10] sm:$0xff] %v632_v57  ;;  %v717_v62 = vadd.f32 %v716_v52, %v632_v57  ;;  %v740_v63 = vmul.f32 %v632_v57, %v632_v57  ;;  %v1080_v0 = vadd.f32 %v1079_v61, %v1078_v58 }
 0x118   : > { %v1001_v1 = vpop.f32.mrb[8].mxu0 }
 0x119   : > { %v755_v2 = vadd.f32 %v754_v56, %v740_v63  ;;  %v637_v3 = vadd.f32 %v1080_v0, %v1000_v60  ;;  %v1081_v4 = vpop.f32.mrb[8].mxu1  ;;  %v1002_v5 = vpop.f32.mrb[9].mxu0 }
 0x11a   : > { %v1003_v6 = vadd.f32 %v1002_v5, %v1001_v1  ;;  %v1082_v7 = vpop.f32.mrb[9].mxu1 }
 0x11b   : > { %703 = vst [vmem:[%s1421_s29 + $0x18] sm:$0xff] %v637_v3  ;;  %v718_v8 = vadd.f32 %v717_v62, %v637_v3  ;;  %v741_v9 = vmul.f32 %v637_v3, %v637_v3  ;;  %v1083_v10 = vadd.f32 %v1082_v7, %v1081_v4 }
 0x11c   : > { %v1004_v11 = vpop.f32.mrb[10].mxu0 }
 0x11d   : > { %v756_v12 = vadd.f32 %v755_v2, %v741_v9  ;;  %v642_v13 = vadd.f32 %v1083_v10, %v1003_v6  ;;  %v1084_v14 = vpop.f32.mrb[10].mxu1  ;;  %v1005_v15 = vpop.f32.mrb[11].mxu0 }
 0x11e   : > { %v1006_v16 = vadd.f32 %v1005_v15, %v1004_v11  ;;  %v1085_v17 = vpop.f32.mrb[11].mxu1 }
 0x11f   : > { %704 = vst [vmem:[%s1421_s29 + $0x20] sm:$0xff] %v642_v13  ;;  %v719_v18 = vadd.f32 %v718_v8, %v642_v13  ;;  %v742_v19 = vmul.f32 %v642_v13, %v642_v13  ;;  %v1086_v20 = vadd.f32 %v1085_v17, %v1084_v14 }
 0x120   : > { %v1007_v21 = vpop.f32.mrb[12].mxu0 }
 0x121   : > { %v757_v22 = vadd.f32 %v756_v12, %v742_v19  ;;  %v647_v23 = vadd.f32 %v1086_v20, %v1006_v16  ;;  %v1087_v24 = vpop.f32.mrb[12].mxu1  ;;  %v1008_v25 = vpop.f32.mrb[13].mxu0 }
 0x122   : > { %v1009_v26 = vadd.f32 %v1008_v25, %v1007_v21  ;;  %v1088_v27 = vpop.f32.mrb[13].mxu1 }
 0x123   : > { %705 = vst [vmem:[%s1421_s29 + $0x28] sm:$0xff] %v647_v23  ;;  %v720_v28 = vadd.f32 %v719_v18, %v647_v23  ;;  %v743_v29 = vmul.f32 %v647_v23, %v647_v23  ;;  %v1089_v30 = vadd.f32 %v1088_v27, %v1087_v24 }
 0x124   : > { %v1010_v31 = vpop.f32.mrb[14].mxu0 }
 0x125   : > { %v758_v32 = vadd.f32 %v757_v22, %v743_v29  ;;  %v652_v33 = vadd.f32 %v1089_v30, %v1009_v26  ;;  %v1090_v34 = vpop.f32.mrb[14].mxu1  ;;  %v1011_v35 = vpop.f32.mrb[15].mxu0 }
 0x126   : > { %v1012_v36 = vadd.f32 %v1011_v35, %v1010_v31  ;;  %v1091_v37 = vpop.f32.mrb[15].mxu1 }
 0x127   : > { %706 = vst [vmem:[%s1421_s29 + $0x30] sm:$0xff] %v652_v33  ;;  %v721_v38 = vadd.f32 %v720_v28, %v652_v33  ;;  %v744_v39 = vmul.f32 %v652_v33, %v652_v33  ;;  %v1092_v40 = vadd.f32 %v1091_v37, %v1090_v34 }
 0x128   : > { %v1013_v41 = vpop.f32.mrb[16].mxu0 }
 0x129   : > { %v759_v42 = vadd.f32 %v758_v32, %v744_v39  ;;  %v657_v43 = vadd.f32 %v1092_v40, %v1012_v36  ;;  %v1093_v44 = vpop.f32.mrb[16].mxu1  ;;  %v1014_v45 = vpop.f32.mrb[17].mxu0 }
 0x12a   : > { %v1015_v46 = vadd.f32 %v1014_v45, %v1013_v41  ;;  %v1094_v47 = vpop.f32.mrb[17].mxu1 }
 0x12b   : > { %707 = vst [vmem:[%s1421_s29 + $0x38] sm:$0xff] %v657_v43  ;;  %v722_v48 = vadd.f32 %v721_v38, %v657_v43  ;;  %v745_v49 = vmul.f32 %v657_v43, %v657_v43  ;;  %v1095_v50 = vadd.f32 %v1094_v47, %v1093_v44 }
 0x12c   : > { %v1016_v51 = vpop.f32.mrb[18].mxu0 }
 0x12d   : > { %v760_v52 = vadd.f32 %v759_v42, %v745_v49  ;;  %v662_v53 = vadd.f32 %v1095_v50, %v1015_v46  ;;  %v1096_v54 = vpop.f32.mrb[18].mxu1  ;;  %v1017_v55 = vpop.f32.mrb[19].mxu0 }
 0x12e   : > { %v1018_v56 = vadd.f32 %v1017_v55, %v1016_v51  ;;  %v1097_v57 = vpop.f32.mrb[19].mxu1 }
 0x12f   : > { %708 = vst [vmem:[%s1421_s29 + $0x40] sm:$0xff] %v662_v53  ;;  %v723_v58 = vadd.f32 %v722_v48, %v662_v53  ;;  %v746_v59 = vmul.f32 %v662_v53, %v662_v53  ;;  %v1098_v60 = vadd.f32 %v1097_v57, %v1096_v54 }
 0x130   : > { %v1019_v61 = vpop.f32.mrb[20].mxu0 }
 0x131   : > { %v761_v62 = vadd.f32 %v760_v52, %v746_v59  ;;  %v667_v63 = vadd.f32 %v1098_v60, %v1018_v56  ;;  %v1099_v0 = vpop.f32.mrb[20].mxu1  ;;  %v1020_v1 = vpop.f32.mrb[21].mxu0 }
 0x132   : > { %v1021_v2 = vadd.f32 %v1020_v1, %v1019_v61  ;;  %v1100_v3 = vpop.f32.mrb[21].mxu1 }
 0x133   : > { %709 = vst [vmem:[%s1421_s29 + $0x48] sm:$0xff] %v667_v63  ;;  %v724_v4 = vadd.f32 %v723_v58, %v667_v63  ;;  %v747_v5 = vmul.f32 %v667_v63, %v667_v63  ;;  %v1101_v6 = vadd.f32 %v1100_v3, %v1099_v0 }
 0x134   : > { %v1022_v7 = vpop.f32.mrb[22].mxu0 }
 0x135   : > { %v762_v8 = vadd.f32 %v761_v62, %v747_v5  ;;  %v672_v9 = vadd.f32 %v1101_v6, %v1021_v2  ;;  %v1102_v10 = vpop.f32.mrb[22].mxu1  ;;  %v1023_v11 = vpop.f32.mrb[23].mxu0 }
 0x136   : > { %v1024_v12 = vadd.f32 %v1023_v11, %v1022_v7  ;;  %v1103_v13 = vpop.f32.mrb[23].mxu1 }
 0x137   : > { %710 = vst [vmem:[%s1421_s29 + $0x50] sm:$0xff] %v672_v9  ;;  %v725_v14 = vadd.f32 %v724_v4, %v672_v9  ;;  %v748_v15 = vmul.f32 %v672_v9, %v672_v9  ;;  %v1104_v16 = vadd.f32 %v1103_v13, %v1102_v10 }
 0x138   : > { %v1025_v17 = vpop.f32.mrb[24].mxu0 }
 0x139   : > { %v763_v18 = vadd.f32 %v762_v8, %v748_v15  ;;  %v677_v19 = vadd.f32 %v1104_v16, %v1024_v12  ;;  %v1105_v20 = vpop.f32.mrb[24].mxu1  ;;  %v1026_v21 = vpop.f32.mrb[25].mxu0 }
 0x13a   : > { %v1027_v22 = vadd.f32 %v1026_v21, %v1025_v17  ;;  %v1106_v23 = vpop.f32.mrb[25].mxu1 }
 0x13b   : > { %711 = vst [vmem:[%s1421_s29 + $0x58] sm:$0xff] %v677_v19  ;;  %v726_v24 = vadd.f32 %v725_v14, %v677_v19  ;;  %v749_v25 = vmul.f32 %v677_v19, %v677_v19  ;;  %v1107_v26 = vadd.f32 %v1106_v23, %v1105_v20 }
 0x13c   : > { %v1028_v27 = vpop.f32.mrb[26].mxu0 }
 0x13d   : > { %v764_v28 = vadd.f32 %v763_v18, %v749_v25  ;;  %v682_v29 = vadd.f32 %v1107_v26, %v1027_v22  ;;  %v1108_v30 = vpop.f32.mrb[26].mxu1  ;;  %v1029_v31 = vpop.f32.mrb[27].mxu0 }
 0x13e   : > { %v1030_v32 = vadd.f32 %v1029_v31, %v1028_v27  ;;  %v1109_v33 = vpop.f32.mrb[27].mxu1 }
 0x13f   : > { %712 = vst [vmem:[%s1421_s29 + $0x60] sm:$0xff] %v682_v29  ;;  %v727_v34 = vadd.f32 %v726_v24, %v682_v29  ;;  %v750_v35 = vmul.f32 %v682_v29, %v682_v29  ;;  %v1110_v36 = vadd.f32 %v1109_v33, %v1108_v30 }
 0x140   : > { %v1031_v37 = vpop.f32.mrb[28].mxu0 }
 0x141   : > { %v765_v38 = vadd.f32 %v764_v28, %v750_v35  ;;  %v687_v39 = vadd.f32 %v1110_v36, %v1030_v32  ;;  %v1111_v40 = vpop.f32.mrb[28].mxu1  ;;  %v1032_v41 = vpop.f32.mrb[29].mxu0 }
 0x142   : > { %v1033_v42 = vadd.f32 %v1032_v41, %v1031_v37  ;;  %v1112_v43 = vpop.f32.mrb[29].mxu1 }
 0x143   : > { %713 = vst [vmem:[%s1421_s29 + $0x68] sm:$0xff] %v687_v39  ;;  %v728_v44 = vadd.f32 %v727_v34, %v687_v39  ;;  %v751_v45 = vmul.f32 %v687_v39, %v687_v39  ;;  %v1113_v46 = vadd.f32 %v1112_v43, %v1111_v40 }
 0x144   : > { %v1034_v47 = vpop.f32.mrb[30].mxu0 }
 0x145   : > { %v766_v48 = vadd.f32 %v765_v38, %v751_v45  ;;  %v692_v49 = vadd.f32 %v1113_v46, %v1033_v42  ;;  %v1114_v50 = vpop.f32.mrb[30].mxu1  ;;  %v1035_v51 = vpop.f32.mrb[31].mxu0 }
 0x146   : > { %v1036_v52 = vadd.f32 %v1035_v51, %v1034_v47  ;;  %v1115_v53 = vpop.f32.mrb[31].mxu1 }
 0x147   : > { %714 = vst [vmem:[%s1421_s29 + $0x70] sm:$0xff] %v692_v49  ;;  %v729_v54 = vadd.f32 %v728_v44, %v692_v49  ;;  %v752_v55 = vmul.f32 %v692_v49, %v692_v49  ;;  %v1116_v56 = vadd.f32 %v1115_v53, %v1114_v50 }
 0x149   : > { %v767_v57 = vadd.f32 %v766_v48, %v752_v55  ;;  %v697_v58 = vadd.f32 %v1116_v56, %v1036_v52 }
 0x14b   : > { %715 = vst [vmem:[%s1421_s29 + $0x78] sm:$0xff] %v697_v58  ;;  %v730_v59 = vadd.f32 %v729_v54, %v697_v58  ;;  %v753_v60 = vmul.f32 %v697_v58, %v697_v58 }
 0x14d   : > { %v731_v61 = vrot.slane %v730_v59, 4  ;;  %v768_v62 = vadd.f32 %v767_v57, %v753_v60 }
 0x14f   : > { %v732_v63 = vadd.f32 %v731_v61, %v730_v59  ;;  %v769_v0 = vrot.slane %v768_v62, 4 }
 0x151   : > { %v733_v1 = vrot.slane %v732_v63, 2  ;;  %v770_v2 = vadd.f32 %v769_v0, %v768_v62 }
 0x153   : > { %v734_v3 = vadd.f32 %v733_v1, %v732_v63  ;;  %v771_v4 = vrot.slane %v770_v2, 2 }
 0x155   : > { %v735_v5 = vrot.slane %v734_v3, 1  ;;  %v772_v6 = vadd.f32 %v771_v4, %v770_v2 }
 0x157   : > { %v736_v7 = vadd.f32 %v735_v5, %v734_v3  ;;  %v773_v8 = vrot.slane %v772_v6, 1 }
 0x159   : > { %737 = vst [vmem:[%s275_s6] sm:$0x1] %v736_v7  ;;  %v774_v9 = vadd.f32 %v773_v8, %v772_v6 }
 0x15b   : > { %775 = vst [vmem:[%s281_s9] sm:$0x1] %v774_v9 }
 0x15c PF: > { %s15_s17 = sadd.s32 1, %s1227_s17   ;;  %s1461_s15 = smov %s1223_s16 }
 0x15d   : > { %p12_p5 = scmp.ge.s32.totalorder %s15_s17, 6   ;;  %s1462_s16 = smov %s1464_s18 }
 0x15f   :  { %14 = sbr.rel (!%p12_p5) target bundleno = 2 (0x2), region = 85 }

// kernel: generator_forward.16
= control target key start
LH: loop header
LB: loop body
LE: loop exit
PB: predicated region body
PF: predicated region fallthrough
CT: control target
= control target key end

     0   :  { %s896_s0 = inlined_call_operand.vmem [shape: f32[512,128], index: 0, kind: input, shape index: {}]   ;;  %s897_s1 = inlined_call_operand.vmem [shape: f32[1,128], index: 1, kind: input, shape index: {}]   ;;  %s898_s2 = inlined_call_operand.vmem [shape: f32[1,128], index: 2, kind: input, shape index: {}]   ;;  %s899_s3 = inlined_call_operand.vmem [shape: f32[512,128], index: 3, kind: output, shape index: {}]  }
   0x1   :  { %v14_v0 = vld [vmem:[%s896_s0] sm:$0xff]  ;;  %v15_v4 = vld [vmem:[%s896_s0 + $0x8] sm:$0xff]  ;;  %v16_v5 = vld [vmem:[%s896_s0 + $0x10] sm:$0xff] }
   0x2   :  { %v380_v1 = vld [vmem:[%s897_s1] ss:$0 sm:$0xff]  ;;  %v17_v6 = vld [vmem:[%s896_s0 + $0x18] sm:$0xff]  ;;  %v19_v11 = vld [vmem:[%s896_s0 + $0x28] sm:$0xff] }
   0x3   :  { %v385_v2 = vld [vmem:[%s898_s2] ss:$0 sm:$0xff]  ;;  %v85_v3 = vmul.f32 %v380_v1, %v14_v0  ;;  %v86_v7 = vmul.f32 %v380_v1, %v15_v4  ;;  %v87_v8 = vmul.f32 %v380_v1, %v16_v5  ;;  %v88_v9 = vmul.f32 %v380_v1, %v17_v6  ;;  %v20_v12 = vld [vmem:[%s896_s0 + $0x30] sm:$0xff]  ;;  %v21_v17 = vld [vmem:[%s896_s0 + $0x38] sm:$0xff] }
   0x4   :  { %v18_v10 = vld [vmem:[%s896_s0 + $0x20] sm:$0xff]  ;;  %v90_v15 = vmul.f32 %v380_v1, %v19_v11  ;;  %v91_v16 = vmul.f32 %v380_v1, %v20_v12  ;;  %v92_v21 = vmul.f32 %v380_v1, %v21_v17  ;;  %v23_v27 = vld [vmem:[%s896_s0 + $0x48] sm:$0xff]  ;;  %v24_v28 = vld [vmem:[%s896_s0 + $0x50] sm:$0xff] }
   0x5   :  { %v156_v13 = vadd.f32 %v385_v2, %v85_v3  ;;  %v89_v14 = vmul.f32 %v380_v1, %v18_v10  ;;  %v157_v18 = vadd.f32 %v385_v2, %v86_v7  ;;  %v158_v19 = vadd.f32 %v385_v2, %v87_v8  ;;  %v22_v22 = vld [vmem:[%s896_s0 + $0x40] sm:$0xff]  ;;  %v25_v29 = vld [vmem:[%s896_s0 + $0x58] sm:$0xff]  ;;  %v27_v35 = vld [vmem:[%s896_s0 + $0x68] sm:$0xff] }
   0x6   :  { %v159_v20 = vadd.f32 %v385_v2, %v88_v9  ;;  %v161_v25 = vadd.f32 %v385_v2, %v90_v15  ;;  %v162_v26 = vadd.f32 %v385_v2, %v91_v16  ;;  %v163_v33 = vadd.f32 %v385_v2, %v92_v21  ;;  %v26_v34 = vld [vmem:[%s896_s0 + $0x60] sm:$0xff]  ;;  %v28_v36 = vld [vmem:[%s896_s0 + $0x70] sm:$0xff]  ;;  %v29_v41 = vld [vmem:[%s896_s0 + $0x78] sm:$0xff] }
   0x7   :  { %v220_v23 = vmax.f32 %v156_v13, 0.0  ;;  %v160_v24 = vadd.f32 %v385_v2, %v89_v14  ;;  %v221_v30 = vmax.f32 %v157_v18, 0.0  ;;  %v222_v31 = vmax.f32 %v158_v19, 0.0  ;;  %v30_v54 = vld [vmem:[%s896_s0 + $0x80] sm:$0xff]  ;;  %v31_v59 = vld [vmem:[%s896_s0 + $0x88] sm:$0xff]  ;;  %v32_v60 = vld [vmem:[%s896_s0 + $0x90] sm:$0xff] }
   0x8   :  { %v223_v32 = vmax.f32 %v159_v20, 0.0  ;;  %v225_v38 = vmax.f32 %v161_v25, 0.0  ;;  %v226_v39 = vmax.f32 %v162_v26, 0.0  ;;  %v93_v40 = vmul.f32 %v380_v1, %v22_v22  ;;  %v33_v61 = vld [vmem:[%s896_s0 + $0x98] sm:$0xff]  ;;  %v34_v4 = vld [vmem:[%s896_s0 + $0xa0] sm:$0xff]  ;;  %v35_v5 = vld [vmem:[%s896_s0 + $0xa8] sm:$0xff] }
   0x9   :  { %284 = vst [vmem:[%s899_s3] sm:$0xff] %v220_v23  ;;  %v224_v37 = vmax.f32 %v160_v24, 0.0  ;;  %285 = vst [vmem:[%s899_s3 + $0x8] sm:$0xff] %v221_v30  ;;  %v227_v42 = vmax.f32 %v163_v33, 0.0  ;;  %v94_v43 = vmul.f32 %v380_v1, %v23_v27  ;;  %v95_v44 = vmul.f32 %v380_v1, %v24_v28  ;;  %v36_v6 = vld [vmem:[%s896_s0 + $0xb0] sm:$0xff]  ;;  %v37_v11 = vld [vmem:[%s896_s0 + $0xb8] sm:$0xff] }
   0xa   :  { %286 = vst [vmem:[%s899_s3 + $0x10] sm:$0xff] %v222_v31  ;;  %287 = vst [vmem:[%s899_s3 + $0x18] sm:$0xff] %v223_v32  ;;  %v96_v45 = vmul.f32 %v380_v1, %v25_v29  ;;  %v164_v46 = vadd.f32 %v385_v2, %v93_v40  ;;  %v97_v47 = vmul.f32 %v380_v1, %v26_v34  ;;  %v38_v24 = vld [vmem:[%s896_s0 + $0xc0] sm:$0xff]  ;;  %v39_v29 = vld [vmem:[%s896_s0 + $0xc8] sm:$0xff] }
   0xb   :  { %288 = vst [vmem:[%s899_s3 + $0x20] sm:$0xff] %v224_v37  ;;  %289 = vst [vmem:[%s899_s3 + $0x28] sm:$0xff] %v225_v38  ;;  %v98_v48 = vmul.f32 %v380_v1, %v27_v35  ;;  %v99_v49 = vmul.f32 %v380_v1, %v28_v36  ;;  %v165_v50 = vadd.f32 %v385_v2, %v94_v43  ;;  %v40_v30 = vld [vmem:[%s896_s0 + $0xd0] sm:$0xff]  ;;  %v41_v31 = vld [vmem:[%s896_s0 + $0xd8] sm:$0xff] }
   0xc   :  { %290 = vst [vmem:[%s899_s3 + $0x30] sm:$0xff] %v226_v39  ;;  %291 = vst [vmem:[%s899_s3 + $0x38] sm:$0xff] %v227_v42  ;;  %v166_v51 = vadd.f32 %v385_v2, %v95_v44  ;;  %v167_v52 = vadd.f32 %v385_v2, %v96_v45  ;;  %v100_v53 = vmul.f32 %v380_v1, %v29_v41  ;;  %v228_v55 = vmax.f32 %v164_v46, 0.0  ;;  %v42_v36 = vld [vmem:[%s896_s0 + $0xe0] sm:$0xff]  ;;  %v43_v37 = vld [vmem:[%s896_s0 + $0xe8] sm:$0xff] }
   0xd   :  { %v168_v56 = vadd.f32 %v385_v2, %v97_v47  ;;  %v169_v57 = vadd.f32 %v385_v2, %v98_v48  ;;  %v170_v58 = vadd.f32 %v385_v2, %v99_v49  ;;  %v229_v62 = vmax.f32 %v165_v50, 0.0  ;;  %v44_v38 = vld [vmem:[%s896_s0 + $0xf0] sm:$0xff]  ;;  %v45_v43 = vld [vmem:[%s896_s0 + $0xf8] sm:$0xff] }
   0xe   :  { %v230_v63 = vmax.f32 %v166_v51, 0.0  ;;  %v231_v0 = vmax.f32 %v167_v52, 0.0  ;;  %v171_v3 = vadd.f32 %v385_v2, %v100_v53  ;;  %292 = vst [vmem:[%s899_s3 + $0x40] sm:$0xff] %v228_v55  ;;  %v101_v10 = vmul.f32 %v380_v1, %v30_v54 }
   0xf   :  { %v232_v7 = vmax.f32 %v168_v56, 0.0  ;;  %v233_v8 = vmax.f32 %v169_v57, 0.0  ;;  %v234_v9 = vmax.f32 %v170_v58, 0.0  ;;  %293 = vst [vmem:[%s899_s3 + $0x48] sm:$0xff] %v229_v62  ;;  %v102_v13 = vmul.f32 %v380_v1, %v31_v59  ;;  %v46_v56 = vld [vmem:[%s896_s0 + $0x100] sm:$0xff]  ;;  %v48_v62 = vld [vmem:[%s896_s0 + $0x110] sm:$0xff] }
  0x10   :  { %294 = vst [vmem:[%s899_s3 + $0x50] sm:$0xff] %v230_v63  ;;  %295 = vst [vmem:[%s899_s3 + $0x58] sm:$0xff] %v231_v0  ;;  %v235_v12 = vmax.f32 %v171_v3, 0.0  ;;  %v103_v14 = vmul.f32 %v380_v1, %v32_v60  ;;  %v104_v15 = vmul.f32 %v380_v1, %v33_v61  ;;  %v172_v16 = vadd.f32 %v385_v2, %v101_v10  ;;  %v47_v61 = vld [vmem:[%s896_s0 + $0x108] sm:$0xff]  ;;  %v49_v63 = vld [vmem:[%s896_s0 + $0x118] sm:$0xff] }
  0x11   :  { %296 = vst [vmem:[%s899_s3 + $0x60] sm:$0xff] %v232_v7  ;;  %297 = vst [vmem:[%s899_s3 + $0x68] sm:$0xff] %v233_v8  ;;  %v105_v17 = vmul.f32 %v380_v1, %v34_v4  ;;  %v106_v18 = vmul.f32 %v380_v1, %v35_v5  ;;  %v107_v19 = vmul.f32 %v380_v1, %v36_v6  ;;  %v50_v6 = vld [vmem:[%s896_s0 + $0x120] sm:$0xff]  ;;  %v51_v7 = vld [vmem:[%s896_s0 + $0x128] sm:$0xff] }
  0x12   :  { %298 = vst [vmem:[%s899_s3 + $0x70] sm:$0xff] %v234_v9  ;;  %299 = vst [vmem:[%s899_s3 + $0x78] sm:$0xff] %v235_v12  ;;  %v173_v20 = vadd.f32 %v385_v2, %v102_v13  ;;  %v174_v21 = vadd.f32 %v385_v2, %v103_v14  ;;  %v175_v22 = vadd.f32 %v385_v2, %v104_v15  ;;  %v236_v25 = vmax.f32 %v172_v16, 0.0  ;;  %v52_v8 = vld [vmem:[%s896_s0 + $0x130] sm:$0xff]  ;;  %v53_v13 = vld [vmem:[%s896_s0 + $0x138] sm:$0xff] }
  0x13   :  { %v108_v23 = vmul.f32 %v380_v1, %v37_v11  ;;  %v176_v26 = vadd.f32 %v385_v2, %v105_v17  ;;  %v177_v27 = vadd.f32 %v385_v2, %v106_v18  ;;  %v178_v28 = vadd.f32 %v385_v2, %v107_v19 }
  0x14   :  { %v237_v32 = vmax.f32 %v173_v20, 0.0  ;;  %v238_v33 = vmax.f32 %v174_v21, 0.0  ;;  %v239_v34 = vmax.f32 %v175_v22, 0.0  ;;  %300 = vst [vmem:[%s899_s3 + $0x80] sm:$0xff] %v236_v25  ;;  %v109_v42 = vmul.f32 %v380_v1, %v38_v24 }
  0x15   :  { %v179_v35 = vadd.f32 %v385_v2, %v108_v23  ;;  %v240_v39 = vmax.f32 %v176_v26, 0.0  ;;  %v241_v40 = vmax.f32 %v177_v27, 0.0  ;;  %v242_v41 = vmax.f32 %v178_v28, 0.0  ;;  %v54_v26 = vld [vmem:[%s896_s0 + $0x140] sm:$0xff] }
  0x16   :  { %301 = vst [vmem:[%s899_s3 + $0x88] sm:$0xff] %v237_v32  ;;  %302 = vst [vmem:[%s899_s3 + $0x90] sm:$0xff] %v238_v33  ;;  %v110_v45 = vmul.f32 %v380_v1, %v39_v29  ;;  %v111_v46 = vmul.f32 %v380_v1, %v40_v30  ;;  %v112_v47 = vmul.f32 %v380_v1, %v41_v31  ;;  %v55_v31 = vld [vmem:[%s896_s0 + $0x148] sm:$0xff]  ;;  %v56_v32 = vld [vmem:[%s896_s0 + $0x150] sm:$0xff] }
  0x17   :  { %303 = vst [vmem:[%s899_s3 + $0x98] sm:$0xff] %v239_v34  ;;  %v243_v44 = vmax.f32 %v179_v35, 0.0  ;;  %304 = vst [vmem:[%s899_s3 + $0xa0] sm:$0xff] %v240_v39  ;;  %v180_v48 = vadd.f32 %v385_v2, %v109_v42  ;;  %v113_v49 = vmul.f32 %v380_v1, %v42_v36  ;;  %v114_v50 = vmul.f32 %v380_v1, %v43_v37  ;;  %v57_v33 = vld [vmem:[%s896_s0 + $0x158] sm:$0xff]  ;;  %v59_v39 = vld [vmem:[%s896_s0 + $0x168] sm:$0xff] }
  0x18   :  { %305 = vst [vmem:[%s899_s3 + $0xa8] sm:$0xff] %v241_v40  ;;  %306 = vst [vmem:[%s899_s3 + $0xb0] sm:$0xff] %v242_v41  ;;  %v115_v51 = vmul.f32 %v380_v1, %v44_v38  ;;  %v181_v52 = vadd.f32 %v385_v2, %v110_v45  ;;  %v182_v53 = vadd.f32 %v385_v2, %v111_v46  ;;  %v58_v38 = vld [vmem:[%s896_s0 + $0x160] sm:$0xff]  ;;  %v60_v40 = vld [vmem:[%s896_s0 + $0x170] sm:$0xff] }
  0x19   :  { %307 = vst [vmem:[%s899_s3 + $0xb8] sm:$0xff] %v243_v44  ;;  %v183_v54 = vadd.f32 %v385_v2, %v112_v47  ;;  %v116_v55 = vmul.f32 %v380_v1, %v45_v43  ;;  %v244_v57 = vmax.f32 %v180_v48, 0.0  ;;  %v184_v58 = vadd.f32 %v385_v2, %v113_v49  ;;  %v61_v45 = vld [vmem:[%s896_s0 + $0x178] sm:$0xff] }
  0x1a   :  { %v185_v59 = vadd.f32 %v385_v2, %v114_v50  ;;  %v186_v60 = vadd.f32 %v385_v2, %v115_v51  ;;  %v245_v0 = vmax.f32 %v181_v52, 0.0  ;;  %v246_v3 = vmax.f32 %v182_v53, 0.0 }
  0x1b   :  { %v247_v4 = vmax.f32 %v183_v54, 0.0  ;;  %v187_v5 = vadd.f32 %v385_v2, %v116_v55  ;;  %308 = vst [vmem:[%s899_s3 + $0xc0] sm:$0xff] %v244_v57  ;;  %v248_v9 = vmax.f32 %v184_v58, 0.0  ;;  %v117_v12 = vmul.f32 %v380_v1, %v46_v56  ;;  %v62_v58 = vld [vmem:[%s896_s0 + $0x180] sm:$0xff] }
  0x1c   :  { %v249_v10 = vmax.f32 %v185_v59, 0.0  ;;  %v250_v11 = vmax.f32 %v186_v60, 0.0  ;;  %309 = vst [vmem:[%s899_s3 + $0xc8] sm:$0xff] %v245_v0  ;;  %310 = vst [vmem:[%s899_s3 + $0xd0] sm:$0xff] %v246_v3  ;;  %v118_v15 = vmul.f32 %v380_v1, %v47_v61  ;;  %v119_v16 = vmul.f32 %v380_v1, %v48_v62  ;;  %v64_v0 = vld [vmem:[%s896_s0 + $0x190] sm:$0xff]  ;;  %v65_v3 = vld [vmem:[%s896_s0 + $0x198] sm:$0xff] }
  0x1d   :  { %311 = vst [vmem:[%s899_s3 + $0xd8] sm:$0xff] %v247_v4  ;;  %v251_v14 = vmax.f32 %v187_v5, 0.0  ;;  %v120_v17 = vmul.f32 %v380_v1, %v49_v63  ;;  %312 = vst [vmem:[%s899_s3 + $0xe0] sm:$0xff] %v248_v9  ;;  %v188_v18 = vadd.f32 %v385_v2, %v117_v12  ;;  %v121_v19 = vmul.f32 %v380_v1, %v50_v6  ;;  %v63_v63 = vld [vmem:[%s896_s0 + $0x188] sm:$0xff] }
  0x1e   :  { %313 = vst [vmem:[%s899_s3 + $0xe8] sm:$0xff] %v249_v10  ;;  %314 = vst [vmem:[%s899_s3 + $0xf0] sm:$0xff] %v250_v11  ;;  %v122_v20 = vmul.f32 %v380_v1, %v51_v7  ;;  %v123_v21 = vmul.f32 %v380_v1, %v52_v8  ;;  %v189_v22 = vadd.f32 %v385_v2, %v118_v15  ;;  %v66_v8 = vld [vmem:[%s896_s0 + $0x1a0] sm:$0xff]  ;;  %v67_v9 = vld [vmem:[%s896_s0 + $0x1a8] sm:$0xff] }
  0x1f   :  { %315 = vst [vmem:[%s899_s3 + $0xf8] sm:$0xff] %v251_v14  ;;  %v190_v23 = vadd.f32 %v385_v2, %v119_v16  ;;  %v191_v24 = vadd.f32 %v385_v2, %v120_v17  ;;  %v124_v25 = vmul.f32 %v380_v1, %v53_v13  ;;  %v252_v27 = vmax.f32 %v188_v18, 0.0  ;;  %v68_v10 = vld [vmem:[%s896_s0 + $0x1b0] sm:$0xff]  ;;  %v69_v15 = vld [vmem:[%s896_s0 + $0x1b8] sm:$0xff] }
  0x20   :  { %v192_v28 = vadd.f32 %v385_v2, %v121_v19  ;;  %v193_v29 = vadd.f32 %v385_v2, %v122_v20  ;;  %v194_v30 = vadd.f32 %v385_v2, %v123_v21  ;;  %v253_v34 = vmax.f32 %v189_v22, 0.0 }
  0x21   :  { %v254_v35 = vmax.f32 %v190_v23, 0.0  ;;  %v255_v36 = vmax.f32 %v191_v24, 0.0  ;;  %v195_v37 = vadd.f32 %v385_v2, %v124_v25  ;;  %316 = vst [vmem:[%s899_s3 + $0x100] sm:$0xff] %v252_v27  ;;  %v125_v44 = vmul.f32 %v380_v1, %v54_v26 }
  0x22   :  { %v256_v41 = vmax.f32 %v192_v28, 0.0  ;;  %v257_v42 = vmax.f32 %v193_v29, 0.0  ;;  %v258_v43 = vmax.f32 %v194_v30, 0.0  ;;  %317 = vst [vmem:[%s899_s3 + $0x108] sm:$0xff] %v253_v34  ;;  %v126_v47 = vmul.f32 %v380_v1, %v55_v31  ;;  %v70_v28 = vld [vmem:[%s896_s0 + $0x1c0] sm:$0xff]  ;;  %v72_v34 = vld [vmem:[%s896_s0 + $0x1d0] sm:$0xff] }
  0x23   :  { %318 = vst [vmem:[%s899_s3 + $0x110] sm:$0xff] %v254_v35  ;;  %319 = vst [vmem:[%s899_s3 + $0x118] sm:$0xff] %v255_v36  ;;  %v259_v46 = vmax.f32 %v195_v37, 0.0  ;;  %v127_v48 = vmul.f32 %v380_v1, %v56_v32  ;;  %v128_v49 = vmul.f32 %v380_v1, %v57_v33  ;;  %v196_v50 = vadd.f32 %v385_v2, %v125_v44  ;;  %v71_v33 = vld [vmem:[%s896_s0 + $0x1c8] sm:$0xff]  ;;  %v73_v35 = vld [vmem:[%s896_s0 + $0x1d8] sm:$0xff] }
  0x24   :  { %320 = vst [vmem:[%s899_s3 + $0x120] sm:$0xff] %v256_v41  ;;  %321 = vst [vmem:[%s899_s3 + $0x128] sm:$0xff] %v257_v42  ;;  %v129_v51 = vmul.f32 %v380_v1, %v58_v38  ;;  %v130_v52 = vmul.f32 %v380_v1, %v59_v39  ;;  %v131_v53 = vmul.f32 %v380_v1, %v60_v40  ;;  %v74_v40 = vld [vmem:[%s896_s0 + $0x1e0] sm:$0xff]  ;;  %v75_v41 = vld [vmem:[%s896_s0 + $0x1e8] sm:$0xff] }
  0x25   :  { %322 = vst [vmem:[%s899_s3 + $0x130] sm:$0xff] %v258_v43  ;;  %323 = vst [vmem:[%s899_s3 + $0x138] sm:$0xff] %v259_v46  ;;  %v197_v54 = vadd.f32 %v385_v2, %v126_v47  ;;  %v198_v55 = vadd.f32 %v385_v2, %v127_v48  ;;  %v199_v56 = vadd.f32 %v385_v2, %v128_v49  ;;  %v260_v59 = vmax.f32 %v196_v50, 0.0  ;;  %v76_v42 = vld [vmem:[%s896_s0 + $0x1f0] sm:$0xff]  ;;  %v77_v47 = vld [vmem:[%s896_s0 + $0x1f8] sm:$0xff] }
  0x26   :  { %v132_v57 = vmul.f32 %v380_v1, %v61_v45  ;;  %v200_v60 = vadd.f32 %v385_v2, %v129_v51  ;;  %v201_v61 = vadd.f32 %v385_v2, %v130_v52  ;;  %v202_v62 = vadd.f32 %v385_v2, %v131_v53 }
  0x27   :  { %v261_v4 = vmax.f32 %v197_v54, 0.0  ;;  %v262_v5 = vmax.f32 %v198_v55, 0.0  ;;  %v263_v6 = vmax.f32 %v199_v56, 0.0  ;;  %324 = vst [vmem:[%s899_s3 + $0x140] sm:$0xff] %v260_v59  ;;  %v133_v14 = vmul.f32 %v380_v1, %v62_v58 }
  0x28   :  { %v203_v7 = vadd.f32 %v385_v2, %v132_v57  ;;  %v264_v11 = vmax.f32 %v200_v60, 0.0  ;;  %v265_v12 = vmax.f32 %v201_v61, 0.0  ;;  %v266_v13 = vmax.f32 %v202_v62, 0.0 }
  0x29   :  { %325 = vst [vmem:[%s899_s3 + $0x148] sm:$0xff] %v261_v4  ;;  %326 = vst [vmem:[%s899_s3 + $0x150] sm:$0xff] %v262_v5  ;;  %v134_v17 = vmul.f32 %v380_v1, %v63_v63  ;;  %v135_v18 = vmul.f32 %v380_v1, %v64_v0  ;;  %v136_v19 = vmul.f32 %v380_v1, %v65_v3 }
  0x2a   :  { %327 = vst [vmem:[%s899_s3 + $0x158] sm:$0xff] %v263_v6  ;;  %v267_v16 = vmax.f32 %v203_v7, 0.0  ;;  %328 = vst [vmem:[%s899_s3 + $0x160] sm:$0xff] %v264_v11  ;;  %v204_v20 = vadd.f32 %v385_v2, %v133_v14  ;;  %v137_v21 = vmul.f32 %v380_v1, %v66_v8  ;;  %v138_v22 = vmul.f32 %v380_v1, %v67_v9 }
  0x2b   :  { %329 = vst [vmem:[%s899_s3 + $0x168] sm:$0xff] %v265_v12  ;;  %330 = vst [vmem:[%s899_s3 + $0x170] sm:$0xff] %v266_v13  ;;  %v139_v23 = vmul.f32 %v380_v1, %v68_v10  ;;  %v205_v24 = vadd.f32 %v385_v2, %v134_v17  ;;  %v206_v25 = vadd.f32 %v385_v2, %v135_v18 }
  0x2c   :  { %331 = vst [vmem:[%s899_s3 + $0x178] sm:$0xff] %v267_v16  ;;  %v207_v26 = vadd.f32 %v385_v2, %v136_v19  ;;  %v140_v27 = vmul.f32 %v380_v1, %v69_v15  ;;  %v268_v29 = vmax.f32 %v204_v20, 0.0  ;;  %v208_v30 = vadd.f32 %v385_v2, %v137_v21 }
  0x2d   :  { %v209_v31 = vadd.f32 %v385_v2, %v138_v22  ;;  %v210_v32 = vadd.f32 %v385_v2, %v139_v23  ;;  %v269_v36 = vmax.f32 %v205_v24, 0.0  ;;  %v270_v37 = vmax.f32 %v206_v25, 0.0 }
  0x2e   :  { %v271_v38 = vmax.f32 %v207_v26, 0.0  ;;  %v211_v39 = vadd.f32 %v385_v2, %v140_v27  ;;  %332 = vst [vmem:[%s899_s3 + $0x180] sm:$0xff] %v268_v29  ;;  %v272_v43 = vmax.f32 %v208_v30, 0.0  ;;  %v141_v46 = vmul.f32 %v380_v1, %v70_v28 }
  0x2f   :  { %v273_v44 = vmax.f32 %v209_v31, 0.0  ;;  %v274_v45 = vmax.f32 %v210_v32, 0.0  ;;  %333 = vst [vmem:[%s899_s3 + $0x188] sm:$0xff] %v269_v36  ;;  %334 = vst [vmem:[%s899_s3 + $0x190] sm:$0xff] %v270_v37  ;;  %v142_v49 = vmul.f32 %v380_v1, %v71_v33  ;;  %v143_v50 = vmul.f32 %v380_v1, %v72_v34 }
  0x30   :  { %335 = vst [vmem:[%s899_s3 + $0x198] sm:$0xff] %v271_v38  ;;  %v275_v48 = vmax.f32 %v211_v39, 0.0  ;;  %v144_v51 = vmul.f32 %v380_v1, %v73_v35  ;;  %336 = vst [vmem:[%s899_s3 + $0x1a0] sm:$0xff] %v272_v43  ;;  %v212_v52 = vadd.f32 %v385_v2, %v141_v46  ;;  %v145_v53 = vmul.f32 %v380_v1, %v74_v40 }
  0x31   :  { %337 = vst [vmem:[%s899_s3 + $0x1a8] sm:$0xff] %v273_v44  ;;  %338 = vst [vmem:[%s899_s3 + $0x1b0] sm:$0xff] %v274_v45  ;;  %v146_v54 = vmul.f32 %v380_v1, %v75_v41  ;;  %v147_v55 = vmul.f32 %v380_v1, %v76_v42  ;;  %v213_v56 = vadd.f32 %v385_v2, %v142_v49 }
  0x32   :  { %339 = vst [vmem:[%s899_s3 + $0x1b8] sm:$0xff] %v275_v48  ;;  %v214_v57 = vadd.f32 %v385_v2, %v143_v50  ;;  %v215_v58 = vadd.f32 %v385_v2, %v144_v51  ;;  %v148_v59 = vmul.f32 %v380_v1, %v77_v47  ;;  %v276_v60 = vmax.f32 %v212_v52, 0.0 }
  0x33   :  { %v216_v61 = vadd.f32 %v385_v2, %v145_v53  ;;  %v217_v62 = vadd.f32 %v385_v2, %v146_v54  ;;  %v218_v63 = vadd.f32 %v385_v2, %v147_v55  ;;  %v277_v0 = vmax.f32 %v213_v56, 0.0 }
  0x34   :  { %v278_v3 = vmax.f32 %v214_v57, 0.0  ;;  %v279_v4 = vmax.f32 %v215_v58, 0.0  ;;  %v219_v5 = vadd.f32 %v385_v2, %v148_v59  ;;  %340 = vst [vmem:[%s899_s3 + $0x1c0] sm:$0xff] %v276_v60 }
  0x35   :  { %v280_v6 = vmax.f32 %v216_v61, 0.0  ;;  %v281_v7 = vmax.f32 %v217_v62, 0.0  ;;  %v282_v8 = vmax.f32 %v218_v63, 0.0  ;;  %341 = vst [vmem:[%s899_s3 + $0x1c8] sm:$0xff] %v277_v0 }
  0x36   :  { %342 = vst [vmem:[%s899_s3 + $0x1d0] sm:$0xff] %v278_v3  ;;  %343 = vst [vmem:[%s899_s3 + $0x1d8] sm:$0xff] %v279_v4  ;;  %v283_v1 = vmax.f32 %v219_v5, 0.0 }
  0x37   :  { %344 = vst [vmem:[%s899_s3 + $0x1e0] sm:$0xff] %v280_v6  ;;  %345 = vst [vmem:[%s899_s3 + $0x1e8] sm:$0xff] %v281_v7 }
  0x38   :  { %346 = vst [vmem:[%s899_s3 + $0x1f0] sm:$0xff] %v282_v8  ;;  %347 = vst [vmem:[%s899_s3 + $0x1f8] sm:$0xff] %v283_v1 }

// kernel: generator_forward.17
= control target key start
LH: loop header
LB: loop body
LE: loop exit
PB: predicated region body
PF: predicated region fallthrough
CT: control target
= control target key end

     0   :  { %s1252_s9 = smov 0   ;;  %s1254_s10 = smov 0   ;;  %s1555_s0 = inlined_call_operand.vmem [shape: f32[4,512,256], index: 0, kind: input, shape index: {}]   ;;  %s1556_s1 = inlined_call_operand.vmem [shape: f32[4,256,128], index: 1, kind: input, shape index: {}]   ;;  %s1557_s2 = inlined_call_operand.vmem [shape: f32[4,512,128], index: 2, kind: output, shape index: {}]  }
   0x1   :  { %s1256_s11 = smov 0  }
   0x2 LB: > { %s24_s12 = sadd.s32 1, %s1230_s10  ;;  %p967_p0 = scmp.ge.s32.totalorder %s1234_s11, 1  ;;  %s1234_s11 = sphi %s1256_s11, %s12_s11   ;;  %s1230_s10 = sphi %s1254_s10, %s1559_s10   ;;  %s1226_s9 = sphi %s1252_s9, %s1558_s9  }
   0x3   : > { %p26_p1 = scmp.ge.s32.totalorder %s24_s12, 4  ;;  %p141_p2 = scmp.lt.s32.totalorder %s1234_s11, 5 }
   0x5   : > { %s1561_s12 = smov (%p26_p1, %s24_s12), 0  ;;  %p142_p3 = pnand %p967_p0, %p141_p2 }
   0x6   : > { %p174_p4 = scmp.lt.s32.totalorder (!%p142_p3), %s1226_s9, 3  ;;  %v1236_v0 = vmov (!%p142_p3), 0.0|0.0  }
   0x7   : > { %145 = sbr.rel (%p142_p3) target bundleno = 432 (0x1b0), region = 28  ;;  %979 = vmatprep.subr.bf16.mxu0 (!%p142_p3), %v1236_v0  ;;  %1027 = vmatprep.subr.bf16.mxu1 (!%p142_p3), %v1236_v0 }
   0xe   : > { %s1563_s9 = smov (!%p174_p4, %s1226_s9), 3 }
   0xf   : > { %s977_s13 = sshll.u32 %s1563_s9, 8  ;;  %s976_s17 = sshll.u32 %s1563_s9, 10 }
  0x10   : > { %s1278_s16 = scalar_lea.vmem %s1556_s1, %s977_s13  ;;  %s1292_s20 = scalar_lea.vmem %s1555_s0, %s976_s17 }
  0x11   : > { %v323_v1 = vld [vmem:[%s1278_s16] sm:$0xff]  ;;  %v324_v2 = vld [vmem:[%s1278_s16 + $0x8] sm:$0xff]  ;;  %v325_v3 = vld [vmem:[%s1278_s16 + $0x10] sm:$0xff]  ;;  %s978_s21 = sshll.u32 %s1563_s9, 9 }
  0x12   : > { %v980_v4 = vpack.c.bf16 %v324_v2, %v323_v1  ;;  %v326_v5 = vld [vmem:[%s1278_s16 + $0x18] sm:$0xff]  ;;  %v327_v7 = vld [vmem:[%s1278_s16 + $0x20] sm:$0xff]  ;;  %v328_v8 = vld [vmem:[%s1278_s16 + $0x28] sm:$0xff]  ;;  %s1480_s24 = scalar_lea.vmem %s1557_s2, %s978_s21 }
  0x13   : > { %v983_v6 = vpack.c.bf16 %v326_v5, %v325_v3  ;;  %v986_v9 = vpack.c.bf16 %v328_v8, %v327_v7  ;;  %v329_v10 = vld [vmem:[%s1278_s16 + $0x30] sm:$0xff]  ;;  %v330_v11 = vld [vmem:[%s1278_s16 + $0x38] sm:$0xff]  ;;  %v196_v12 = vld [vmem:[%s1292_s20 + $0x8] sm:$0xff] }
  0x14   : > { %981 = vmatpush1.bf16.msra.mxu0 %v980_v4  ;;  %1043 = vmatpush1.bf16.msra.mxu1 %v980_v4  ;;  %v989_v13 = vpack.c.bf16 %v330_v11, %v329_v10  ;;  %v260_v14 = vld [vmem:[%s1292_s20 + $0x208] sm:$0xff]  ;;  %v331_v15 = vld [vmem:[%s1278_s16 + $0x40] sm:$0xff]  ;;  %v333_v18 = vld [vmem:[%s1278_s16 + $0x50] sm:$0xff] }
  0x15   : > { %982 = vmatprep.subr.bf16.mxu0 %v1236_v0  ;;  %1028 = vmatprep.subr.bf16.mxu1 %v1236_v0  ;;  %v332_v16 = vld [vmem:[%s1278_s16 + $0x48] sm:$0xff]  ;;  %v334_v19 = vld [vmem:[%s1278_s16 + $0x58] sm:$0xff]  ;;  %v335_v21 = vld [vmem:[%s1278_s16 + $0x60] sm:$0xff] }
  0x16   : > { %419 = vmatprep.mubr.f32.mxu0 %v196_v12  ;;  %579 = vmatprep.mubr.f32.mxu1 %v260_v14  ;;  %v992_v17 = vpack.c.bf16 %v332_v16, %v331_v15  ;;  %v995_v20 = vpack.c.bf16 %v334_v19, %v333_v18  ;;  %v336_v22 = vld [vmem:[%s1278_s16 + $0x68] sm:$0xff]  ;;  %v337_v24 = vld [vmem:[%s1278_s16 + $0x70] sm:$0xff]  ;;  %v338_v25 = vld [vmem:[%s1278_s16 + $0x78] sm:$0xff] }
  0x17   : > { %v998_v23 = vpack.c.bf16 %v336_v22, %v335_v21  ;;  %v1001_v26 = vpack.c.bf16 %v338_v25, %v337_v24  ;;  %v339_v27 = vld [vmem:[%s1278_s16 + $0x80] sm:$0xff]  ;;  %v340_v28 = vld [vmem:[%s1278_s16 + $0x88] sm:$0xff]  ;;  %v341_v30 = vld [vmem:[%s1278_s16 + $0x90] sm:$0xff] }
  0x18   : > { %984 = vmatpush1.bf16.msra.mxu0 %v983_v6  ;;  %1044 = vmatpush1.bf16.msra.mxu1 %v983_v6  ;;  %v1004_v29 = vpack.c.bf16 %v340_v28, %v339_v27  ;;  %v342_v31 = vld [vmem:[%s1278_s16 + $0x98] sm:$0xff]  ;;  %v343_v33 = vld [vmem:[%s1278_s16 + $0xa0] sm:$0xff]  ;;  %v344_v34 = vld [vmem:[%s1278_s16 + $0xa8] sm:$0xff] }
  0x19   : > { %985 = vmatprep.subr.bf16.mxu0 %v1236_v0  ;;  %1029 = vmatprep.subr.bf16.mxu1 %v1236_v0  ;;  %v1007_v32 = vpack.c.bf16 %v342_v31, %v341_v30  ;;  %v1010_v35 = vpack.c.bf16 %v344_v34, %v343_v33  ;;  %v345_v36 = vld [vmem:[%s1278_s16 + $0xb0] sm:$0xff]  ;;  %v346_v37 = vld [vmem:[%s1278_s16 + $0xb8] sm:$0xff]  ;;  %v347_v39 = vld [vmem:[%s1278_s16 + $0xc0] sm:$0xff] }
  0x1a   : > { %v1013_v38 = vpack.c.bf16 %v346_v37, %v345_v36  ;;  %v348_v40 = vld [vmem:[%s1278_s16 + $0xc8] sm:$0xff]  ;;  %v349_v42 = vld [vmem:[%s1278_s16 + $0xd0] sm:$0xff]  ;;  %v350_v43 = vld [vmem:[%s1278_s16 + $0xd8] sm:$0xff] }
  0x1b   : > { %v1016_v41 = vpack.c.bf16 %v348_v40, %v347_v39  ;;  %v1019_v44 = vpack.c.bf16 %v350_v43, %v349_v42  ;;  %v351_v45 = vld [vmem:[%s1278_s16 + $0xe0] sm:$0xff]  ;;  %v352_v46 = vld [vmem:[%s1278_s16 + $0xe8] sm:$0xff]  ;;  %v353_v48 = vld [vmem:[%s1278_s16 + $0xf0] sm:$0xff] }
  0x1c   : > { %987 = vmatpush1.bf16.msra.mxu0 %v986_v9  ;;  %1045 = vmatpush1.bf16.msra.mxu1 %v986_v9  ;;  %v1022_v47 = vpack.c.bf16 %v352_v46, %v351_v45  ;;  %v354_v49 = vld [vmem:[%s1278_s16 + $0xf8] sm:$0xff]  ;;  %v195_v51 = vld [vmem:[%s1292_s20] sm:$0xff]  ;;  %v197_v55 = vld [vmem:[%s1292_s20 + $0x10] sm:$0xff] }
  0x1d   : > { %988 = vmatprep.subr.bf16.mxu0 %v1236_v0  ;;  %1030 = vmatprep.subr.bf16.mxu1 %v1236_v0  ;;  %v1025_v50 = vpack.c.bf16 %v354_v49, %v353_v48  ;;  %v259_v52 = vld [vmem:[%s1292_s20 + $0x200] sm:$0xff]  ;;  %v198_v53 = vld [vmem:[%s1292_s20 + $0x18] sm:$0xff]  ;;  %v261_v56 = vld [vmem:[%s1292_s20 + $0x210] sm:$0xff] }
  0x1e   : > { %v262_v54 = vld [vmem:[%s1292_s20 + $0x218] sm:$0xff]  ;;  %v200_v57 = vld [vmem:[%s1292_s20 + $0x28] sm:$0xff]  ;;  %v199_v59 = vld [vmem:[%s1292_s20 + $0x20] sm:$0xff] }
  0x1f   : > { %v264_v58 = vld [vmem:[%s1292_s20 + $0x228] sm:$0xff]  ;;  %v263_v60 = vld [vmem:[%s1292_s20 + $0x220] sm:$0xff]  ;;  %v202_v61 = vld [vmem:[%s1292_s20 + $0x38] sm:$0xff] }
  0x20   : > { %990 = vmatpush1.bf16.msra.mxu0 %v989_v13  ;;  %1046 = vmatpush1.bf16.msra.mxu1 %v989_v13  ;;  %v266_v62 = vld [vmem:[%s1292_s20 + $0x238] sm:$0xff]  ;;  %v201_v63 = vld [vmem:[%s1292_s20 + $0x30] sm:$0xff]  ;;  %v204_v1 = vld [vmem:[%s1292_s20 + $0x48] sm:$0xff] }
  0x21   : > { %991 = vmatprep.subr.bf16.mxu0 %v1236_v0  ;;  %1031 = vmatprep.subr.bf16.mxu1 %v1236_v0  ;;  %v268_v2 = vld [vmem:[%s1292_s20 + $0x248] sm:$0xff]  ;;  %v203_v3 = vld [vmem:[%s1292_s20 + $0x40] sm:$0xff]  ;;  %v206_v5 = vld [vmem:[%s1292_s20 + $0x58] sm:$0xff] }
  0x22   : > { %v267_v4 = vld [vmem:[%s1292_s20 + $0x240] sm:$0xff]  ;;  %v270_v6 = vld [vmem:[%s1292_s20 + $0x258] sm:$0xff]  ;;  %v205_v7 = vld [vmem:[%s1292_s20 + $0x50] sm:$0xff] }
  0x23   : > { %v269_v8 = vld [vmem:[%s1292_s20 + $0x250] sm:$0xff]  ;;  %v208_v9 = vld [vmem:[%s1292_s20 + $0x68] sm:$0xff]  ;;  %v207_v11 = vld [vmem:[%s1292_s20 + $0x60] sm:$0xff] }
  0x24   : > { %993 = vmatpush1.bf16.msra.mxu0 %v992_v17  ;;  %1047 = vmatpush1.bf16.msra.mxu1 %v992_v17  ;;  %v272_v10 = vld [vmem:[%s1292_s20 + $0x268] sm:$0xff]  ;;  %v271_v12 = vld [vmem:[%s1292_s20 + $0x260] sm:$0xff]  ;;  %v210_v13 = vld [vmem:[%s1292_s20 + $0x78] sm:$0xff] }
  0x25   : > { %994 = vmatprep.subr.bf16.mxu0 %v1236_v0  ;;  %1032 = vmatprep.subr.bf16.mxu1 %v1236_v0  ;;  %v274_v14 = vld [vmem:[%s1292_s20 + $0x278] sm:$0xff]  ;;  %v209_v15 = vld [vmem:[%s1292_s20 + $0x70] sm:$0xff]  ;;  %v212_v17 = vld [vmem:[%s1292_s20 + $0x88] sm:$0xff] }
  0x26   : > { %v273_v16 = vld [vmem:[%s1292_s20 + $0x270] sm:$0xff]  ;;  %v276_v18 = vld [vmem:[%s1292_s20 + $0x288] sm:$0xff]  ;;  %v211_v19 = vld [vmem:[%s1292_s20 + $0x80] sm:$0xff] }
  0x27   : > { %v214_v21 = vld [vmem:[%s1292_s20 + $0x98] sm:$0xff]  ;;  %v277_v24 = vld [vmem:[%s1292_s20 + $0x290] sm:$0xff]  ;;  %v216_v25 = vld [vmem:[%s1292_s20 + $0xa8] sm:$0xff] }
  0x28   : > { %996 = vmatpush1.bf16.msra.mxu0 %v995_v20  ;;  %1048 = vmatpush1.bf16.msra.mxu1 %v995_v20  ;;  %v275_v20 = vld [vmem:[%s1292_s20 + $0x280] sm:$0xff]  ;;  %v278_v22 = vld [vmem:[%s1292_s20 + $0x298] sm:$0xff]  ;;  %v217_v31 = vld [vmem:[%s1292_s20 + $0xb0] sm:$0xff] }
  0x29   : > { %997 = vmatprep.subr.bf16.mxu0 %v1236_v0  ;;  %1033 = vmatprep.subr.bf16.mxu1 %v1236_v0  ;;  %v215_v27 = vld [vmem:[%s1292_s20 + $0xa0] sm:$0xff]  ;;  %v282_v30 = vld [vmem:[%s1292_s20 + $0x2b8] sm:$0xff]  ;;  %v220_v33 = vld [vmem:[%s1292_s20 + $0xc8] sm:$0xff] }
  0x2a   : > { %v279_v28 = vld [vmem:[%s1292_s20 + $0x2a0] sm:$0xff]  ;;  %v284_v34 = vld [vmem:[%s1292_s20 + $0x2c8] sm:$0xff]  ;;  %v222_v37 = vld [vmem:[%s1292_s20 + $0xd8] sm:$0xff] }
  0x2b   : > { %v283_v36 = vld [vmem:[%s1292_s20 + $0x2c0] sm:$0xff]  ;;  %v221_v39 = vld [vmem:[%s1292_s20 + $0xd0] sm:$0xff]  ;;  %v288_v42 = vld [vmem:[%s1292_s20 + $0x2e8] sm:$0xff] }
  0x2c   : > { %999 = vmatpush1.bf16.msra.mxu0 %v998_v23  ;;  %1049 = vmatpush1.bf16.msra.mxu1 %v998_v23  ;;  %v213_v23 = vld [vmem:[%s1292_s20 + $0x90] sm:$0xff]  ;;  %v223_v43 = vld [vmem:[%s1292_s20 + $0xe0] sm:$0xff]  ;;  %v226_v45 = vld [vmem:[%s1292_s20 + $0xf8] sm:$0xff] }
  0x2d   : > { %1000 = vmatprep.subr.bf16.mxu0 %v1236_v0  ;;  %1034 = vmatprep.subr.bf16.mxu1 %v1236_v0  ;;  %v285_v40 = vld [vmem:[%s1292_s20 + $0x2d0] sm:$0xff]  ;;  %v290_v46 = vld [vmem:[%s1292_s20 + $0x2f8] sm:$0xff]  ;;  %v228_v49 = vld [vmem:[%s1292_s20 + $0x108] sm:$0xff] }
  0x2e   : > { %v289_v48 = vld [vmem:[%s1292_s20 + $0x2f0] sm:$0xff] }
  0x30   : > { %1002 = vmatpush1.bf16.msra.mxu0 %v1001_v26  ;;  %1050 = vmatpush1.bf16.msra.mxu1 %v1001_v26  ;;  %v280_v26 = vld [vmem:[%s1292_s20 + $0x2a8] sm:$0xff] }
  0x31   : > { %1003 = vmatprep.subr.bf16.mxu0 %v1236_v0  ;;  %1035 = vmatprep.subr.bf16.mxu1 %v1236_v0 }
  0x34   : > { %1005 = vmatpush1.bf16.msra.mxu0 %v1004_v29  ;;  %1051 = vmatpush1.bf16.msra.mxu1 %v1004_v29  ;;  %v218_v29 = vld [vmem:[%s1292_s20 + $0xb8] sm:$0xff] }
  0x35   : > { %1006 = vmatprep.subr.bf16.mxu0 %v1236_v0  ;;  %1036 = vmatprep.subr.bf16.mxu1 %v1236_v0 }
  0x38   : > { %1008 = vmatpush1.bf16.msra.mxu0 %v1007_v32  ;;  %1052 = vmatpush1.bf16.msra.mxu1 %v1007_v32  ;;  %v281_v32 = vld [vmem:[%s1292_s20 + $0x2b0] sm:$0xff] }
  0x39   : > { %1009 = vmatprep.subr.bf16.mxu0 %v1236_v0  ;;  %1037 = vmatprep.subr.bf16.mxu1 %v1236_v0 }
  0x3c   : > { %1011 = vmatpush1.bf16.msra.mxu0 %v1010_v35  ;;  %1053 = vmatpush1.bf16.msra.mxu1 %v1010_v35  ;;  %v219_v35 = vld [vmem:[%s1292_s20 + $0xc0] sm:$0xff] }
  0x3d   : > { %1012 = vmatprep.subr.bf16.mxu0 %v1236_v0  ;;  %1038 = vmatprep.subr.bf16.mxu1 %v1236_v0 }
  0x40   : > { %1014 = vmatpush1.bf16.msra.mxu0 %v1013_v38  ;;  %1054 = vmatpush1.bf16.msra.mxu1 %v1013_v38  ;;  %v286_v38 = vld [vmem:[%s1292_s20 + $0x2d8] sm:$0xff] }
  0x41   : > { %1015 = vmatprep.subr.bf16.mxu0 %v1236_v0  ;;  %1039 = vmatprep.subr.bf16.mxu1 %v1236_v0 }
  0x44   : > { %1017 = vmatpush1.bf16.msra.mxu0 %v1016_v41  ;;  %1055 = vmatpush1.bf16.msra.mxu1 %v1016_v41  ;;  %v224_v41 = vld [vmem:[%s1292_s20 + $0xe8] sm:$0xff] }
  0x45   : > { %1018 = vmatprep.subr.bf16.mxu0 %v1236_v0  ;;  %1040 = vmatprep.subr.bf16.mxu1 %v1236_v0 }
  0x48   : > { %1020 = vmatpush1.bf16.msra.mxu0 %v1019_v44  ;;  %1056 = vmatpush1.bf16.msra.mxu1 %v1019_v44  ;;  %v287_v44 = vld [vmem:[%s1292_s20 + $0x2e0] sm:$0xff] }
  0x49   : > { %1021 = vmatprep.subr.bf16.mxu0 %v1236_v0  ;;  %1041 = vmatprep.subr.bf16.mxu1 %v1236_v0 }
  0x4c   : > { %1023 = vmatpush1.bf16.msra.mxu0 %v1022_v47  ;;  %1057 = vmatpush1.bf16.msra.mxu1 %v1022_v47  ;;  %v225_v47 = vld [vmem:[%s1292_s20 + $0xf0] sm:$0xff] }
  0x4d   : > { %1024 = vmatprep.subr.bf16.mxu0 %v1236_v0  ;;  %1042 = vmatprep.subr.bf16.mxu1 %v1236_v0  ;;  %v265_v0 = vld [vmem:[%s1292_s20 + $0x230] sm:$0xff] }
  0x50   : > { %1026 = vmatpush1.bf16.msra.mxu0 %v1025_v50  ;;  %1058 = vmatpush1.bf16.msra.mxu1 %v1025_v50  ;;  %v292_v50 = vld [vmem:[%s1292_s20 + $0x308] sm:$0xff] }
  0x53   : > { %420 = vmatmul.mubr.f32.vlgmr.msra.gmra.mrb[0].mxu0 %v195_v51  ;;  %580 = vmatmul.mubr.f32.vlgmr.msra.gmra.mrb[0].mxu1 %v259_v52  ;;  %v227_v51 = vld [vmem:[%s1292_s20 + $0x100] sm:$0xff] }
  0x54   : > { %424 = vmatprep.mubr.f32.mxu0 %v198_v53  ;;  %584 = vmatprep.mubr.f32.mxu1 %v262_v54  ;;  %v291_v52 = vld [vmem:[%s1292_s20 + $0x300] sm:$0xff]  ;;  %v230_v53 = vld [vmem:[%s1292_s20 + $0x118] sm:$0xff] }
  0x55   : > { %v294_v54 = vld [vmem:[%s1292_s20 + $0x318] sm:$0xff] }
  0x57   : > { %425 = vmatmul.mubr.f32.gmra.mrb[2].mxu0 %v197_v55  ;;  %585 = vmatmul.mubr.f32.gmra.mrb[2].mxu1 %v261_v56  ;;  %v229_v55 = vld [vmem:[%s1292_s20 + $0x110] sm:$0xff] }
  0x58   : > { %429 = vmatprep.mubr.f32.mxu0 %v200_v57  ;;  %589 = vmatprep.mubr.f32.mxu1 %v264_v58  ;;  %v293_v56 = vld [vmem:[%s1292_s20 + $0x310] sm:$0xff]  ;;  %v232_v57 = vld [vmem:[%s1292_s20 + $0x128] sm:$0xff] }
  0x59   : > { %v296_v58 = vld [vmem:[%s1292_s20 + $0x328] sm:$0xff] }
  0x5b   : > { %430 = vmatmul.mubr.f32.gmra.mrb[4].mxu0 %v199_v59  ;;  %590 = vmatmul.mubr.f32.gmra.mrb[4].mxu1 %v263_v60  ;;  %v231_v59 = vld [vmem:[%s1292_s20 + $0x120] sm:$0xff] }
  0x5c   : > { %434 = vmatprep.mubr.f32.mxu0 %v202_v61  ;;  %594 = vmatprep.mubr.f32.mxu1 %v266_v62  ;;  %v295_v60 = vld [vmem:[%s1292_s20 + $0x320] sm:$0xff]  ;;  %v234_v61 = vld [vmem:[%s1292_s20 + $0x138] sm:$0xff] }
  0x5d   : > { %v298_v62 = vld [vmem:[%s1292_s20 + $0x338] sm:$0xff] }
  0x5f   : > { %435 = vmatmul.mubr.f32.gmra.mrb[6].mxu0 %v201_v63  ;;  %595 = vmatmul.mubr.f32.gmra.mrb[6].mxu1 %v265_v0  ;;  %v233_v63 = vld [vmem:[%s1292_s20 + $0x130] sm:$0xff] }
  0x60   : > { %439 = vmatprep.mubr.f32.mxu0 %v204_v1  ;;  %599 = vmatprep.mubr.f32.mxu1 %v268_v2  ;;  %v297_v0 = vld [vmem:[%s1292_s20 + $0x330] sm:$0xff]  ;;  %v236_v1 = vld [vmem:[%s1292_s20 + $0x148] sm:$0xff] }
  0x61   : > { %v300_v2 = vld [vmem:[%s1292_s20 + $0x348] sm:$0xff] }
  0x63   : > { %440 = vmatmul.mubr.f32.gmra.mrb[8].mxu0 %v203_v3  ;;  %600 = vmatmul.mubr.f32.gmra.mrb[8].mxu1 %v267_v4  ;;  %v235_v3 = vld [vmem:[%s1292_s20 + $0x140] sm:$0xff] }
  0x64   : > { %444 = vmatprep.mubr.f32.mxu0 %v206_v5  ;;  %604 = vmatprep.mubr.f32.mxu1 %v270_v6  ;;  %v299_v4 = vld [vmem:[%s1292_s20 + $0x340] sm:$0xff]  ;;  %v238_v5 = vld [vmem:[%s1292_s20 + $0x158] sm:$0xff] }
  0x65   : > { %v302_v6 = vld [vmem:[%s1292_s20 + $0x358] sm:$0xff] }
  0x67   : > { %445 = vmatmul.mubr.f32.gmra.mrb[10].mxu0 %v205_v7  ;;  %605 = vmatmul.mubr.f32.gmra.mrb[10].mxu1 %v269_v8  ;;  %v237_v7 = vld [vmem:[%s1292_s20 + $0x150] sm:$0xff] }
  0x68   : > { %449 = vmatprep.mubr.f32.mxu0 %v208_v9  ;;  %609 = vmatprep.mubr.f32.mxu1 %v272_v10  ;;  %v301_v8 = vld [vmem:[%s1292_s20 + $0x350] sm:$0xff]  ;;  %v240_v9 = vld [vmem:[%s1292_s20 + $0x168] sm:$0xff] }
  0x69   : > { %v304_v10 = vld [vmem:[%s1292_s20 + $0x368] sm:$0xff] }
  0x6b   : > { %450 = vmatmul.mubr.f32.gmra.mrb[12].mxu0 %v207_v11  ;;  %610 = vmatmul.mubr.f32.gmra.mrb[12].mxu1 %v271_v12  ;;  %v239_v11 = vld [vmem:[%s1292_s20 + $0x160] sm:$0xff] }
  0x6c   : > { %454 = vmatprep.mubr.f32.mxu0 %v210_v13  ;;  %614 = vmatprep.mubr.f32.mxu1 %v274_v14  ;;  %v303_v12 = vld [vmem:[%s1292_s20 + $0x360] sm:$0xff]  ;;  %v242_v13 = vld [vmem:[%s1292_s20 + $0x178] sm:$0xff] }
  0x6d   : > { %v306_v14 = vld [vmem:[%s1292_s20 + $0x378] sm:$0xff] }
  0x6f   : > { %455 = vmatmul.mubr.f32.gmra.mrb[14].mxu0 %v209_v15  ;;  %615 = vmatmul.mubr.f32.gmra.mrb[14].mxu1 %v273_v16  ;;  %v241_v15 = vld [vmem:[%s1292_s20 + $0x170] sm:$0xff] }
  0x70   : > { %459 = vmatprep.mubr.f32.mxu0 %v212_v17  ;;  %619 = vmatprep.mubr.f32.mxu1 %v276_v18  ;;  %v305_v16 = vld [vmem:[%s1292_s20 + $0x370] sm:$0xff]  ;;  %v244_v17 = vld [vmem:[%s1292_s20 + $0x188] sm:$0xff] }
  0x71   : > { %v308_v18 = vld [vmem:[%s1292_s20 + $0x388] sm:$0xff] }
  0x73   : > { %460 = vmatmul.mubr.f32.gmra.mrb[16].mxu0 %v211_v19  ;;  %620 = vmatmul.mubr.f32.gmra.mrb[16].mxu1 %v275_v20  ;;  %v243_v19 = vld [vmem:[%s1292_s20 + $0x180] sm:$0xff] }
  0x74   : > { %464 = vmatprep.mubr.f32.mxu0 %v214_v21  ;;  %624 = vmatprep.mubr.f32.mxu1 %v278_v22  ;;  %v307_v20 = vld [vmem:[%s1292_s20 + $0x380] sm:$0xff]  ;;  %v246_v21 = vld [vmem:[%s1292_s20 + $0x198] sm:$0xff] }
  0x75   : > { %v310_v22 = vld [vmem:[%s1292_s20 + $0x398] sm:$0xff] }
  0x77   : > { %465 = vmatmul.mubr.f32.gmra.mrb[18].mxu0 %v213_v23  ;;  %625 = vmatmul.mubr.f32.gmra.mrb[18].mxu1 %v277_v24  ;;  %v245_v23 = vld [vmem:[%s1292_s20 + $0x190] sm:$0xff] }
  0x78   : > { %469 = vmatprep.mubr.f32.mxu0 %v216_v25  ;;  %629 = vmatprep.mubr.f32.mxu1 %v280_v26  ;;  %v309_v24 = vld [vmem:[%s1292_s20 + $0x390] sm:$0xff]  ;;  %v248_v25 = vld [vmem:[%s1292_s20 + $0x1a8] sm:$0xff] }
  0x79   : > { %v312_v26 = vld [vmem:[%s1292_s20 + $0x3a8] sm:$0xff] }
  0x7b   : > { %470 = vmatmul.mubr.f32.gmra.mrb[20].mxu0 %v215_v27  ;;  %630 = vmatmul.mubr.f32.gmra.mrb[20].mxu1 %v279_v28  ;;  %v247_v27 = vld [vmem:[%s1292_s20 + $0x1a0] sm:$0xff] }
  0x7c   : > { %474 = vmatprep.mubr.f32.mxu0 %v218_v29  ;;  %634 = vmatprep.mubr.f32.mxu1 %v282_v30  ;;  %v311_v28 = vld [vmem:[%s1292_s20 + $0x3a0] sm:$0xff]  ;;  %v250_v29 = vld [vmem:[%s1292_s20 + $0x1b8] sm:$0xff] }
  0x7d   : > { %v314_v30 = vld [vmem:[%s1292_s20 + $0x3b8] sm:$0xff] }
  0x7f   : > { %475 = vmatmul.mubr.f32.gmra.mrb[22].mxu0 %v217_v31  ;;  %635 = vmatmul.mubr.f32.gmra.mrb[22].mxu1 %v281_v32  ;;  %v249_v31 = vld [vmem:[%s1292_s20 + $0x1b0] sm:$0xff] }
  0x80   : > { %479 = vmatprep.mubr.f32.mxu0 %v220_v33  ;;  %639 = vmatprep.mubr.f32.mxu1 %v284_v34  ;;  %v313_v32 = vld [vmem:[%s1292_s20 + $0x3b0] sm:$0xff]  ;;  %v252_v33 = vld [vmem:[%s1292_s20 + $0x1c8] sm:$0xff] }
  0x81   : > { %v316_v34 = vld [vmem:[%s1292_s20 + $0x3c8] sm:$0xff] }
  0x83   : > { %480 = vmatmul.mubr.f32.gmra.mrb[24].mxu0 %v219_v35  ;;  %640 = vmatmul.mubr.f32.gmra.mrb[24].mxu1 %v283_v36  ;;  %v251_v35 = vld [vmem:[%s1292_s20 + $0x1c0] sm:$0xff] }
  0x84   : > { %484 = vmatprep.mubr.f32.mxu0 %v222_v37  ;;  %644 = vmatprep.mubr.f32.mxu1 %v286_v38  ;;  %v315_v36 = vld [vmem:[%s1292_s20 + $0x3c0] sm:$0xff]  ;;  %v254_v37 = vld [vmem:[%s1292_s20 + $0x1d8] sm:$0xff] }
  0x85   : > { %v318_v38 = vld [vmem:[%s1292_s20 + $0x3d8] sm:$0xff] }
  0x87   : > { %485 = vmatmul.mubr.f32.gmra.mrb[26].mxu0 %v221_v39  ;;  %645 = vmatmul.mubr.f32.gmra.mrb[26].mxu1 %v285_v40  ;;  %v253_v39 = vld [vmem:[%s1292_s20 + $0x1d0] sm:$0xff] }
  0x88   : > { %489 = vmatprep.mubr.f32.mxu0 %v224_v41  ;;  %649 = vmatprep.mubr.f32.mxu1 %v288_v42  ;;  %v317_v40 = vld [vmem:[%s1292_s20 + $0x3d0] sm:$0xff]  ;;  %v256_v41 = vld [vmem:[%s1292_s20 + $0x1e8] sm:$0xff] }
  0x89   : > { %v320_v42 = vld [vmem:[%s1292_s20 + $0x3e8] sm:$0xff] }
  0x8b   : > { %490 = vmatmul.mubr.f32.gmra.mrb[28].mxu0 %v223_v43  ;;  %650 = vmatmul.mubr.f32.gmra.mrb[28].mxu1 %v287_v44  ;;  %v255_v43 = vld [vmem:[%s1292_s20 + $0x1e0] sm:$0xff] }
  0x8c   : > { %494 = vmatprep.mubr.f32.mxu0 %v226_v45  ;;  %654 = vmatprep.mubr.f32.mxu1 %v290_v46  ;;  %v319_v44 = vld [vmem:[%s1292_s20 + $0x3e0] sm:$0xff]  ;;  %v258_v45 = vld [vmem:[%s1292_s20 + $0x1f8] sm:$0xff] }
  0x8d   : > { %v322_v46 = vld [vmem:[%s1292_s20 + $0x3f8] sm:$0xff] }
  0x8f   : > { %495 = vmatmul.mubr.f32.gmra.mrb[30].mxu0 %v225_v47  ;;  %655 = vmatmul.mubr.f32.gmra.mrb[30].mxu1 %v289_v48  ;;  %v257_v47 = vld [vmem:[%s1292_s20 + $0x1f0] sm:$0xff] }
  0x90   : > { %499 = vmatprep.mubr.f32.mxu0 %v228_v49  ;;  %659 = vmatprep.mubr.f32.mxu1 %v292_v50  ;;  %v321_v48 = vld [vmem:[%s1292_s20 + $0x3f0] sm:$0xff] }
  0x93   : > { %500 = vmatmul.mubr.f32.gmra.mrb[32].mxu0 %v227_v51  ;;  %660 = vmatmul.mubr.f32.gmra.mrb[32].mxu1 %v291_v52 }
  0x94   : > { %504 = vmatprep.mubr.f32.mxu0 %v230_v53  ;;  %664 = vmatprep.mubr.f32.mxu1 %v294_v54 }
  0x97   : > { %505 = vmatmul.mubr.f32.gmra.mrb[34].mxu0 %v229_v55  ;;  %665 = vmatmul.mubr.f32.gmra.mrb[34].mxu1 %v293_v56 }
  0x98   : > { %509 = vmatprep.mubr.f32.mxu0 %v232_v57  ;;  %669 = vmatprep.mubr.f32.mxu1 %v296_v58 }
  0x9b   : > { %510 = vmatmul.mubr.f32.gmra.mrb[36].mxu0 %v231_v59  ;;  %670 = vmatmul.mubr.f32.gmra.mrb[36].mxu1 %v295_v60 }
  0x9c   : > { %514 = vmatprep.mubr.f32.mxu0 %v234_v61  ;;  %674 = vmatprep.mubr.f32.mxu1 %v298_v62 }
  0x9f   : > { %515 = vmatmul.mubr.f32.gmra.mrb[38].mxu0 %v233_v63  ;;  %675 = vmatmul.mubr.f32.gmra.mrb[38].mxu1 %v297_v0 }
  0xa0   : > { %519 = vmatprep.mubr.f32.mxu0 %v236_v1  ;;  %679 = vmatprep.mubr.f32.mxu1 %v300_v2 }
  0xa3   : > { %520 = vmatmul.mubr.f32.gmra.mrb[40].mxu0 %v235_v3  ;;  %680 = vmatmul.mubr.f32.gmra.mrb[40].mxu1 %v299_v4 }
  0xa4   : > { %524 = vmatprep.mubr.f32.mxu0 %v238_v5  ;;  %684 = vmatprep.mubr.f32.mxu1 %v302_v6 }
  0xa7   : > { %525 = vmatmul.mubr.f32.gmra.mrb[42].mxu0 %v237_v7  ;;  %685 = vmatmul.mubr.f32.gmra.mrb[42].mxu1 %v301_v8 }
  0xa8   : > { %529 = vmatprep.mubr.f32.mxu0 %v240_v9  ;;  %689 = vmatprep.mubr.f32.mxu1 %v304_v10 }
  0xab   : > { %530 = vmatmul.mubr.f32.gmra.mrb[44].mxu0 %v239_v11  ;;  %690 = vmatmul.mubr.f32.gmra.mrb[44].mxu1 %v303_v12 }
  0xac   : > { %534 = vmatprep.mubr.f32.mxu0 %v242_v13  ;;  %694 = vmatprep.mubr.f32.mxu1 %v306_v14 }
  0xaf   : > { %535 = vmatmul.mubr.f32.gmra.mrb[46].mxu0 %v241_v15  ;;  %695 = vmatmul.mubr.f32.gmra.mrb[46].mxu1 %v305_v16 }
  0xb0   : > { %539 = vmatprep.mubr.f32.mxu0 %v244_v17  ;;  %699 = vmatprep.mubr.f32.mxu1 %v308_v18 }
  0xb3   : > { %540 = vmatmul.mubr.f32.gmra.mrb[48].mxu0 %v243_v19  ;;  %700 = vmatmul.mubr.f32.gmra.mrb[48].mxu1 %v307_v20 }
  0xb4   : > { %544 = vmatprep.mubr.f32.mxu0 %v246_v21  ;;  %704 = vmatprep.mubr.f32.mxu1 %v310_v22 }
  0xb7   : > { %545 = vmatmul.mubr.f32.gmra.mrb[50].mxu0 %v245_v23  ;;  %705 = vmatmul.mubr.f32.gmra.mrb[50].mxu1 %v309_v24 }
  0xb8   : > { %549 = vmatprep.mubr.f32.mxu0 %v248_v25  ;;  %709 = vmatprep.mubr.f32.mxu1 %v312_v26 }
  0xbb   : > { %550 = vmatmul.mubr.f32.gmra.mrb[52].mxu0 %v247_v27  ;;  %710 = vmatmul.mubr.f32.gmra.mrb[52].mxu1 %v311_v28 }
  0xbc   : > { %554 = vmatprep.mubr.f32.mxu0 %v250_v29  ;;  %714 = vmatprep.mubr.f32.mxu1 %v314_v30 }
  0xbf   : > { %555 = vmatmul.mubr.f32.gmra.mrb[54].mxu0 %v249_v31  ;;  %715 = vmatmul.mubr.f32.gmra.mrb[54].mxu1 %v313_v32 }
  0xc0   : > { %559 = vmatprep.mubr.f32.mxu0 %v252_v33  ;;  %719 = vmatprep.mubr.f32.mxu1 %v316_v34 }
  0xc3   : > { %560 = vmatmul.mubr.f32.gmra.mrb[56].mxu0 %v251_v35  ;;  %720 = vmatmul.mubr.f32.gmra.mrb[56].mxu1 %v315_v36 }
  0xc4   : > { %564 = vmatprep.mubr.f32.mxu0 %v254_v37  ;;  %724 = vmatprep.mubr.f32.mxu1 %v318_v38 }
  0xc7   : > { %565 = vmatmul.mubr.f32.gmra.mrb[58].mxu0 %v253_v39  ;;  %725 = vmatmul.mubr.f32.gmra.mrb[58].mxu1 %v317_v40 }
  0xc8   : > { %569 = vmatprep.mubr.f32.mxu0 %v256_v41  ;;  %729 = vmatprep.mubr.f32.mxu1 %v320_v42 }
  0xcb   : > { %570 = vmatmul.mubr.f32.gmra.mrb[60].mxu0 %v255_v43  ;;  %730 = vmatmul.mubr.f32.gmra.mrb[60].mxu1 %v319_v44 }
  0xcc   : > { %574 = vmatprep.mubr.f32.mxu0 %v258_v45  ;;  %734 = vmatprep.mubr.f32.mxu1 %v322_v46 }
  0xcf   : > { %575 = vmatmul.mubr.f32.gmra.mrb[62].mxu0 %v257_v47  ;;  %735 = vmatmul.mubr.f32.gmra.mrb[62].mxu1 %v321_v48 }
 0x126   : > { %v421_v49 = vpop.f32.mrb[0].mxu0  ;;  %v581_v50 = vpop.f32.mrb[0].mxu1 }
 0x127   : > { %1084 = vtanh.f32 %v421_v49  ;;  %v423_v51 = vpop.f32.mrb[1].mxu0  ;;  %v583_v52 = vpop.f32.mrb[1].mxu1 }
 0x128   : > { %1086 = vtanh.f32 %v581_v50 }
 0x12a   : > { %v426_v53 = vpop.f32.mrb[2].mxu0  ;;  %v586_v54 = vpop.f32.mrb[2].mxu1 }
 0x12b   : > { %1088 = vtanh.f32 %v426_v53  ;;  %v428_v55 = vpop.f32.mrb[3].mxu0  ;;  %v588_v56 = vpop.f32.mrb[3].mxu1 }
 0x12c   : > { %1090 = vtanh.f32 %v586_v54 }
 0x12e   : > { %v431_v57 = vpop.f32.mrb[4].mxu0  ;;  %v591_v58 = vpop.f32.mrb[4].mxu1 }
 0x12f   : > { %1092 = vtanh.f32 %v431_v57  ;;  %v433_v59 = vpop.f32.mrb[5].mxu0  ;;  %v593_v60 = vpop.f32.mrb[5].mxu1 }
 0x130   : > { %1094 = vtanh.f32 %v591_v58 }
 0x131   : > { %v1085_v61 = vpop.eup %1084 }
 0x132   : > { %v1087_v62 = vpop.eup %1086  ;;  %804 = vst [vmem:[%s1480_s24] sm:$0xff] %v1085_v61  ;;  %v436_v63 = vpop.f32.mrb[6].mxu0 }
 0x133   : > { %v596_v0 = vpop.f32.mrb[6].mxu1  ;;  %836 = vst [vmem:[%s1480_s24 + $0x100] sm:$0xff] %v1087_v62  ;;  %1096 = vtanh.f32 %v436_v63  ;;  %v438_v1 = vpop.f32.mrb[7].mxu0 }
 0x134   : > { %v598_v2 = vpop.f32.mrb[7].mxu1  ;;  %1098 = vtanh.f32 %v596_v0 }
 0x135   : > { %v1089_v3 = vpop.eup %1088 }
 0x136   : > { %v1091_v4 = vpop.eup %1090  ;;  %805 = vst [vmem:[%s1480_s24 + $0x8] sm:$0xff] %v1089_v3  ;;  %v441_v5 = vpop.f32.mrb[8].mxu0 }
 0x137   : > { %v601_v6 = vpop.f32.mrb[8].mxu1  ;;  %837 = vst [vmem:[%s1480_s24 + $0x108] sm:$0xff] %v1091_v4  ;;  %1100 = vtanh.f32 %v441_v5  ;;  %v443_v7 = vpop.f32.mrb[9].mxu0 }
 0x138   : > { %v603_v8 = vpop.f32.mrb[9].mxu1  ;;  %1102 = vtanh.f32 %v601_v6 }
 0x139   : > { %v1093_v9 = vpop.eup %1092 }
 0x13a   : > { %v1095_v10 = vpop.eup %1094  ;;  %806 = vst [vmem:[%s1480_s24 + $0x10] sm:$0xff] %v1093_v9  ;;  %v446_v11 = vpop.f32.mrb[10].mxu0 }
 0x13b   : > { %v606_v12 = vpop.f32.mrb[10].mxu1  ;;  %838 = vst [vmem:[%s1480_s24 + $0x110] sm:$0xff] %v1095_v10  ;;  %1104 = vtanh.f32 %v446_v11  ;;  %v448_v13 = vpop.f32.mrb[11].mxu0 }
 0x13c   : > { %v608_v14 = vpop.f32.mrb[11].mxu1  ;;  %1106 = vtanh.f32 %v606_v12 }
 0x13d   : > { %v1097_v15 = vpop.eup %1096 }
 0x13e   : > { %v1099_v16 = vpop.eup %1098  ;;  %807 = vst [vmem:[%s1480_s24 + $0x18] sm:$0xff] %v1097_v15  ;;  %v451_v17 = vpop.f32.mrb[12].mxu0 }
 0x13f   : > { %v611_v18 = vpop.f32.mrb[12].mxu1  ;;  %839 = vst [vmem:[%s1480_s24 + $0x118] sm:$0xff] %v1099_v16  ;;  %1108 = vtanh.f32 %v451_v17  ;;  %v453_v19 = vpop.f32.mrb[13].mxu0 }
 0x140   : > { %v613_v20 = vpop.f32.mrb[13].mxu1  ;;  %1110 = vtanh.f32 %v611_v18 }
 0x141   : > { %v1101_v21 = vpop.eup %1100 }
 0x142   : > { %v1103_v22 = vpop.eup %1102  ;;  %808 = vst [vmem:[%s1480_s24 + $0x20] sm:$0xff] %v1101_v21  ;;  %v456_v23 = vpop.f32.mrb[14].mxu0 }
 0x143   : > { %v616_v24 = vpop.f32.mrb[14].mxu1  ;;  %840 = vst [vmem:[%s1480_s24 + $0x120] sm:$0xff] %v1103_v22  ;;  %1112 = vtanh.f32 %v456_v23  ;;  %v458_v25 = vpop.f32.mrb[15].mxu0 }
 0x144   : > { %v618_v26 = vpop.f32.mrb[15].mxu1  ;;  %1114 = vtanh.f32 %v616_v24 }
 0x145   : > { %v1105_v27 = vpop.eup %1104 }
 0x146   : > { %v1107_v28 = vpop.eup %1106  ;;  %809 = vst [vmem:[%s1480_s24 + $0x28] sm:$0xff] %v1105_v27  ;;  %v461_v29 = vpop.f32.mrb[16].mxu0 }
 0x147   : > { %v621_v30 = vpop.f32.mrb[16].mxu1  ;;  %841 = vst [vmem:[%s1480_s24 + $0x128] sm:$0xff] %v1107_v28  ;;  %1116 = vtanh.f32 %v461_v29  ;;  %v463_v31 = vpop.f32.mrb[17].mxu0 }
 0x148   : > { %v623_v32 = vpop.f32.mrb[17].mxu1  ;;  %1118 = vtanh.f32 %v621_v30 }
 0x149   : > { %v1109_v33 = vpop.eup %1108 }
 0x14a   : > { %v1111_v34 = vpop.eup %1110  ;;  %810 = vst [vmem:[%s1480_s24 + $0x30] sm:$0xff] %v1109_v33  ;;  %v466_v35 = vpop.f32.mrb[18].mxu0 }
 0x14b   : > { %v626_v36 = vpop.f32.mrb[18].mxu1  ;;  %842 = vst [vmem:[%s1480_s24 + $0x130] sm:$0xff] %v1111_v34  ;;  %1120 = vtanh.f32 %v466_v35  ;;  %v468_v37 = vpop.f32.mrb[19].mxu0 }
 0x14c   : > { %v628_v38 = vpop.f32.mrb[19].mxu1  ;;  %1122 = vtanh.f32 %v626_v36 }
 0x14d   : > { %v1113_v39 = vpop.eup %1112 }
 0x14e   : > { %v1115_v40 = vpop.eup %1114  ;;  %811 = vst [vmem:[%s1480_s24 + $0x38] sm:$0xff] %v1113_v39  ;;  %v471_v41 = vpop.f32.mrb[20].mxu0 }
 0x14f   : > { %v631_v42 = vpop.f32.mrb[20].mxu1  ;;  %843 = vst [vmem:[%s1480_s24 + $0x138] sm:$0xff] %v1115_v40  ;;  %1124 = vtanh.f32 %v471_v41  ;;  %v473_v43 = vpop.f32.mrb[21].mxu0 }
 0x150   : > { %v633_v44 = vpop.f32.mrb[21].mxu1  ;;  %1126 = vtanh.f32 %v631_v42 }
 0x151   : > { %v1117_v45 = vpop.eup %1116 }
 0x152   : > { %v1119_v46 = vpop.eup %1118  ;;  %812 = vst [vmem:[%s1480_s24 + $0x40] sm:$0xff] %v1117_v45  ;;  %v476_v47 = vpop.f32.mrb[22].mxu0 }
 0x153   : > { %v636_v48 = vpop.f32.mrb[22].mxu1  ;;  %844 = vst [vmem:[%s1480_s24 + $0x140] sm:$0xff] %v1119_v46  ;;  %1128 = vtanh.f32 %v476_v47  ;;  %v478_v49 = vpop.f32.mrb[23].mxu0 }
 0x154   : > { %v638_v50 = vpop.f32.mrb[23].mxu1  ;;  %1130 = vtanh.f32 %v636_v48 }
 0x155   : > { %v1121_v51 = vpop.eup %1120 }
 0x156   : > { %v1123_v52 = vpop.eup %1122  ;;  %813 = vst [vmem:[%s1480_s24 + $0x48] sm:$0xff] %v1121_v51  ;;  %v481_v53 = vpop.f32.mrb[24].mxu0 }
 0x157   : > { %v641_v54 = vpop.f32.mrb[24].mxu1  ;;  %845 = vst [vmem:[%s1480_s24 + $0x148] sm:$0xff] %v1123_v52  ;;  %1132 = vtanh.f32 %v481_v53  ;;  %v483_v55 = vpop.f32.mrb[25].mxu0 }
 0x158   : > { %v643_v56 = vpop.f32.mrb[25].mxu1  ;;  %1134 = vtanh.f32 %v641_v54 }
 0x159   : > { %v1125_v57 = vpop.eup %1124 }
 0x15a   : > { %v1127_v58 = vpop.eup %1126  ;;  %814 = vst [vmem:[%s1480_s24 + $0x50] sm:$0xff] %v1125_v57  ;;  %v486_v59 = vpop.f32.mrb[26].mxu0 }
 0x15b   : > { %v646_v60 = vpop.f32.mrb[26].mxu1  ;;  %846 = vst [vmem:[%s1480_s24 + $0x150] sm:$0xff] %v1127_v58  ;;  %1136 = vtanh.f32 %v486_v59  ;;  %v488_v61 = vpop.f32.mrb[27].mxu0 }
 0x15c   : > { %v648_v62 = vpop.f32.mrb[27].mxu1  ;;  %1138 = vtanh.f32 %v646_v60 }
 0x15d   : > { %v1129_v63 = vpop.eup %1128 }
 0x15e   : > { %v1131_v0 = vpop.eup %1130  ;;  %815 = vst [vmem:[%s1480_s24 + $0x58] sm:$0xff] %v1129_v63  ;;  %v491_v1 = vpop.f32.mrb[28].mxu0 }
 0x15f   : > { %v651_v2 = vpop.f32.mrb[28].mxu1  ;;  %847 = vst [vmem:[%s1480_s24 + $0x158] sm:$0xff] %v1131_v0  ;;  %1140 = vtanh.f32 %v491_v1  ;;  %v493_v3 = vpop.f32.mrb[29].mxu0 }
 0x160   : > { %v653_v4 = vpop.f32.mrb[29].mxu1  ;;  %1142 = vtanh.f32 %v651_v2 }
 0x161   : > { %v1133_v5 = vpop.eup %1132 }
 0x162   : > { %v1135_v6 = vpop.eup %1134  ;;  %816 = vst [vmem:[%s1480_s24 + $0x60] sm:$0xff] %v1133_v5  ;;  %v496_v7 = vpop.f32.mrb[30].mxu0 }
 0x163   : > { %v656_v8 = vpop.f32.mrb[30].mxu1  ;;  %848 = vst [vmem:[%s1480_s24 + $0x160] sm:$0xff] %v1135_v6  ;;  %1144 = vtanh.f32 %v496_v7  ;;  %v498_v9 = vpop.f32.mrb[31].mxu0 }
 0x164   : > { %v658_v10 = vpop.f32.mrb[31].mxu1  ;;  %1146 = vtanh.f32 %v656_v8 }
 0x165   : > { %v1137_v11 = vpop.eup %1136 }
 0x166   : > { %v1139_v12 = vpop.eup %1138  ;;  %817 = vst [vmem:[%s1480_s24 + $0x68] sm:$0xff] %v1137_v11  ;;  %v501_v13 = vpop.f32.mrb[32].mxu0 }
 0x167   : > { %v661_v14 = vpop.f32.mrb[32].mxu1  ;;  %849 = vst [vmem:[%s1480_s24 + $0x168] sm:$0xff] %v1139_v12  ;;  %1148 = vtanh.f32 %v501_v13  ;;  %v503_v15 = vpop.f32.mrb[33].mxu0 }
 0x168   : > { %v663_v16 = vpop.f32.mrb[33].mxu1  ;;  %1150 = vtanh.f32 %v661_v14 }
 0x169   : > { %v1141_v17 = vpop.eup %1140 }
 0x16a   : > { %v1143_v18 = vpop.eup %1142  ;;  %818 = vst [vmem:[%s1480_s24 + $0x70] sm:$0xff] %v1141_v17  ;;  %v506_v19 = vpop.f32.mrb[34].mxu0 }
 0x16b   : > { %v666_v20 = vpop.f32.mrb[34].mxu1  ;;  %850 = vst [vmem:[%s1480_s24 + $0x170] sm:$0xff] %v1143_v18  ;;  %1152 = vtanh.f32 %v506_v19  ;;  %v508_v21 = vpop.f32.mrb[35].mxu0 }
 0x16c   : > { %v668_v22 = vpop.f32.mrb[35].mxu1  ;;  %1154 = vtanh.f32 %v666_v20 }
 0x16d   : > { %v1145_v23 = vpop.eup %1144 }
 0x16e   : > { %v1147_v24 = vpop.eup %1146  ;;  %819 = vst [vmem:[%s1480_s24 + $0x78] sm:$0xff] %v1145_v23  ;;  %v511_v25 = vpop.f32.mrb[36].mxu0 }
 0x16f   : > { %v671_v26 = vpop.f32.mrb[36].mxu1  ;;  %851 = vst [vmem:[%s1480_s24 + $0x178] sm:$0xff] %v1147_v24  ;;  %1156 = vtanh.f32 %v511_v25  ;;  %v513_v27 = vpop.f32.mrb[37].mxu0 }
 0x170   : > { %v673_v28 = vpop.f32.mrb[37].mxu1  ;;  %1158 = vtanh.f32 %v671_v26 }
 0x171   : > { %v1149_v29 = vpop.eup %1148 }
 0x172   : > { %v1151_v30 = vpop.eup %1150  ;;  %820 = vst [vmem:[%s1480_s24 + $0x80] sm:$0xff] %v1149_v29  ;;  %v516_v31 = vpop.f32.mrb[38].mxu0 }
 0x173   : > { %v676_v32 = vpop.f32.mrb[38].mxu1  ;;  %852 = vst [vmem:[%s1480_s24 + $0x180] sm:$0xff] %v1151_v30  ;;  %1160 = vtanh.f32 %v516_v31  ;;  %v518_v33 = vpop.f32.mrb[39].mxu0 }
 0x174   : > { %v678_v34 = vpop.f32.mrb[39].mxu1  ;;  %1162 = vtanh.f32 %v676_v32 }
 0x175   : > { %v1153_v35 = vpop.eup %1152 }
 0x176   : > { %v1155_v36 = vpop.eup %1154  ;;  %821 = vst [vmem:[%s1480_s24 + $0x88] sm:$0xff] %v1153_v35  ;;  %v521_v37 = vpop.f32.mrb[40].mxu0 }
 0x177   : > { %v681_v38 = vpop.f32.mrb[40].mxu1  ;;  %853 = vst [vmem:[%s1480_s24 + $0x188] sm:$0xff] %v1155_v36  ;;  %1164 = vtanh.f32 %v521_v37  ;;  %v523_v39 = vpop.f32.mrb[41].mxu0 }
 0x178   : > { %v683_v40 = vpop.f32.mrb[41].mxu1  ;;  %1166 = vtanh.f32 %v681_v38 }
 0x179   : > { %v1157_v41 = vpop.eup %1156 }
 0x17a   : > { %v1159_v42 = vpop.eup %1158  ;;  %822 = vst [vmem:[%s1480_s24 + $0x90] sm:$0xff] %v1157_v41  ;;  %v526_v43 = vpop.f32.mrb[42].mxu0 }
 0x17b   : > { %v686_v44 = vpop.f32.mrb[42].mxu1  ;;  %854 = vst [vmem:[%s1480_s24 + $0x190] sm:$0xff] %v1159_v42  ;;  %1168 = vtanh.f32 %v526_v43  ;;  %v528_v45 = vpop.f32.mrb[43].mxu0 }
 0x17c   : > { %v688_v46 = vpop.f32.mrb[43].mxu1  ;;  %1170 = vtanh.f32 %v686_v44 }
 0x17d   : > { %v1161_v47 = vpop.eup %1160 }
 0x17e   : > { %v1163_v48 = vpop.eup %1162  ;;  %823 = vst [vmem:[%s1480_s24 + $0x98] sm:$0xff] %v1161_v47  ;;  %v531_v49 = vpop.f32.mrb[44].mxu0 }
 0x17f   : > { %v691_v50 = vpop.f32.mrb[44].mxu1  ;;  %855 = vst [vmem:[%s1480_s24 + $0x198] sm:$0xff] %v1163_v48  ;;  %1172 = vtanh.f32 %v531_v49  ;;  %v533_v51 = vpop.f32.mrb[45].mxu0 }
 0x180   : > { %v693_v52 = vpop.f32.mrb[45].mxu1  ;;  %1174 = vtanh.f32 %v691_v50 }
 0x181   : > { %v1165_v53 = vpop.eup %1164 }
 0x182   : > { %v1167_v54 = vpop.eup %1166  ;;  %824 = vst [vmem:[%s1480_s24 + $0xa0] sm:$0xff] %v1165_v53  ;;  %v536_v55 = vpop.f32.mrb[46].mxu0 }
 0x183   : > { %v696_v56 = vpop.f32.mrb[46].mxu1  ;;  %856 = vst [vmem:[%s1480_s24 + $0x1a0] sm:$0xff] %v1167_v54  ;;  %1176 = vtanh.f32 %v536_v55  ;;  %v538_v57 = vpop.f32.mrb[47].mxu0 }
 0x184   : > { %v698_v58 = vpop.f32.mrb[47].mxu1  ;;  %1178 = vtanh.f32 %v696_v56 }
 0x185   : > { %v1169_v59 = vpop.eup %1168 }
 0x186   : > { %v1171_v60 = vpop.eup %1170  ;;  %825 = vst [vmem:[%s1480_s24 + $0xa8] sm:$0xff] %v1169_v59  ;;  %v541_v61 = vpop.f32.mrb[48].mxu0 }
 0x187   : > { %v701_v62 = vpop.f32.mrb[48].mxu1  ;;  %857 = vst [vmem:[%s1480_s24 + $0x1a8] sm:$0xff] %v1171_v60  ;;  %1180 = vtanh.f32 %v541_v61  ;;  %v543_v63 = vpop.f32.mrb[49].mxu0 }
 0x188   : > { %v703_v0 = vpop.f32.mrb[49].mxu1  ;;  %1182 = vtanh.f32 %v701_v62 }
 0x189   : > { %v1173_v1 = vpop.eup %1172 }
 0x18a   : > { %v1175_v2 = vpop.eup %1174  ;;  %826 = vst [vmem:[%s1480_s24 + $0xb0] sm:$0xff] %v1173_v1  ;;  %v546_v3 = vpop.f32.mrb[50].mxu0 }
 0x18b   : > { %v706_v4 = vpop.f32.mrb[50].mxu1  ;;  %858 = vst [vmem:[%s1480_s24 + $0x1b0] sm:$0xff] %v1175_v2  ;;  %1184 = vtanh.f32 %v546_v3  ;;  %v548_v5 = vpop.f32.mrb[51].mxu0 }
 0x18c   : > { %v708_v6 = vpop.f32.mrb[51].mxu1  ;;  %1186 = vtanh.f32 %v706_v4 }
 0x18d   : > { %v1177_v7 = vpop.eup %1176 }
 0x18e   : > { %v1179_v8 = vpop.eup %1178  ;;  %827 = vst [vmem:[%s1480_s24 + $0xb8] sm:$0xff] %v1177_v7  ;;  %v551_v9 = vpop.f32.mrb[52].mxu0 }
 0x18f   : > { %v711_v10 = vpop.f32.mrb[52].mxu1  ;;  %859 = vst [vmem:[%s1480_s24 + $0x1b8] sm:$0xff] %v1179_v8  ;;  %1188 = vtanh.f32 %v551_v9  ;;  %v553_v11 = vpop.f32.mrb[53].mxu0 }
 0x190   : > { %v713_v12 = vpop.f32.mrb[53].mxu1  ;;  %1190 = vtanh.f32 %v711_v10 }
 0x191   : > { %v1181_v13 = vpop.eup %1180 }
 0x192   : > { %v1183_v14 = vpop.eup %1182  ;;  %828 = vst [vmem:[%s1480_s24 + $0xc0] sm:$0xff] %v1181_v13  ;;  %v556_v15 = vpop.f32.mrb[54].mxu0 }
 0x193   : > { %v716_v16 = vpop.f32.mrb[54].mxu1  ;;  %860 = vst [vmem:[%s1480_s24 + $0x1c0] sm:$0xff] %v1183_v14  ;;  %1192 = vtanh.f32 %v556_v15  ;;  %v558_v17 = vpop.f32.mrb[55].mxu0 }
 0x194   : > { %v718_v18 = vpop.f32.mrb[55].mxu1  ;;  %1194 = vtanh.f32 %v716_v16 }
 0x195   : > { %v1185_v19 = vpop.eup %1184 }
 0x196   : > { %v1187_v20 = vpop.eup %1186  ;;  %829 = vst [vmem:[%s1480_s24 + $0xc8] sm:$0xff] %v1185_v19  ;;  %v561_v21 = vpop.f32.mrb[56].mxu0 }
 0x197   : > { %v721_v22 = vpop.f32.mrb[56].mxu1  ;;  %861 = vst [vmem:[%s1480_s24 + $0x1c8] sm:$0xff] %v1187_v20  ;;  %1196 = vtanh.f32 %v561_v21  ;;  %v563_v23 = vpop.f32.mrb[57].mxu0 }
 0x198   : > { %v723_v24 = vpop.f32.mrb[57].mxu1  ;;  %1198 = vtanh.f32 %v721_v22 }
 0x199   : > { %v1189_v25 = vpop.eup %1188 }
 0x19a   : > { %v1191_v26 = vpop.eup %1190  ;;  %830 = vst [vmem:[%s1480_s24 + $0xd0] sm:$0xff] %v1189_v25  ;;  %v566_v27 = vpop.f32.mrb[58].mxu0 }
 0x19b   : > { %v726_v28 = vpop.f32.mrb[58].mxu1  ;;  %862 = vst [vmem:[%s1480_s24 + $0x1d0] sm:$0xff] %v1191_v26  ;;  %1200 = vtanh.f32 %v566_v27  ;;  %v568_v29 = vpop.f32.mrb[59].mxu0 }
 0x19c   : > { %v728_v30 = vpop.f32.mrb[59].mxu1  ;;  %1202 = vtanh.f32 %v726_v28 }
 0x19d   : > { %v1193_v31 = vpop.eup %1192 }
 0x19e   : > { %v1195_v32 = vpop.eup %1194  ;;  %831 = vst [vmem:[%s1480_s24 + $0xd8] sm:$0xff] %v1193_v31  ;;  %v571_v33 = vpop.f32.mrb[60].mxu0 }
 0x19f   : > { %v731_v34 = vpop.f32.mrb[60].mxu1  ;;  %863 = vst [vmem:[%s1480_s24 + $0x1d8] sm:$0xff] %v1195_v32  ;;  %1204 = vtanh.f32 %v571_v33  ;;  %v573_v35 = vpop.f32.mrb[61].mxu0 }
 0x1a0   : > { %v733_v36 = vpop.f32.mrb[61].mxu1  ;;  %1206 = vtanh.f32 %v731_v34 }
 0x1a1   : > { %v1197_v37 = vpop.eup %1196 }
 0x1a2   : > { %v1199_v38 = vpop.eup %1198  ;;  %832 = vst [vmem:[%s1480_s24 + $0xe0] sm:$0xff] %v1197_v37  ;;  %v576_v39 = vpop.f32.mrb[62].mxu0 }
 0x1a3   : > { %v736_v40 = vpop.f32.mrb[62].mxu1  ;;  %864 = vst [vmem:[%s1480_s24 + $0x1e0] sm:$0xff] %v1199_v38  ;;  %1208 = vtanh.f32 %v576_v39  ;;  %v578_v41 = vpop.f32.mrb[63].mxu0 }
 0x1a4   : > { %v738_v42 = vpop.f32.mrb[63].mxu1  ;;  %1210 = vtanh.f32 %v736_v40 }
 0x1a5   : > { %v1201_v43 = vpop.eup %1200 }
 0x1a6   : > { %v1203_v44 = vpop.eup %1202  ;;  %833 = vst [vmem:[%s1480_s24 + $0xe8] sm:$0xff] %v1201_v43 }
 0x1a7   : > { %865 = vst [vmem:[%s1480_s24 + $0x1e8] sm:$0xff] %v1203_v44 }
 0x1a9   : > { %v1205_v45 = vpop.eup %1204 }
 0x1aa   : > { %v1207_v46 = vpop.eup %1206  ;;  %834 = vst [vmem:[%s1480_s24 + $0xf0] sm:$0xff] %v1205_v45 }
 0x1ab   : > { %866 = vst [vmem:[%s1480_s24 + $0x1f0] sm:$0xff] %v1207_v46 }
 0x1ad   : > { %v1209_v47 = vpop.eup %1208 }
 0x1ae   : > { %v1211_v48 = vpop.eup %1210  ;;  %835 = vst [vmem:[%s1480_s24 + $0xf8] sm:$0xff] %v1209_v47 }
 0x1af   : > { %867 = vst [vmem:[%s1480_s24 + $0x1f8] sm:$0xff] %v1211_v48 }
 0x1b0 PF: > { %s12_s11 = sadd.s32 1, %s1234_s11   ;;  %s1558_s9 = smov %s1230_s10 }
 0x1b1   : > { %p9_p5 = scmp.ge.s32.totalorder %s12_s11, 6   ;;  %s1559_s10 = smov %s1561_s12 }
 0x1b3   :  { %11 = sbr.rel (!%p9_p5) target bundleno = 2 (0x2), region = 61 }

</bundles_post_ra>
